<compile_context>
chip_gen: v7x
topology: tpu7x:2x2x1
jax: 0.10.0
libtpu: 0.0.40
codegen_flags: <defaults>
</compile_context>

<pallas_src>
import functools
import numpy as np
import jax
import jax.numpy as jnp
from jax.experimental import pallas as pl
from jax.experimental.pallas import tpu as pltpu

_LANE = 128
_VMEM_LIMIT = 32 * 1024 * 1024      # explicit scoped-VMEM budget (v5e default is only 16 MiB)
_X_TILE_BYTES = 7 * 1024 * 1024     # bf16 X-tile budget -> <~21 MiB of live tiles per call


def _round_up(x, m):
    return (x + m - 1) // m * m


def _pick_tile(dim, cap, align):
    if dim <= cap:
        return dim
    t = (cap // align) * align
    while t >= align:
        if dim % t == 0:
            return t
        t -= align
    return dim


# ----------------------------- Pallas kernels -----------------------------

def _convmm_kernel(activation, x_ref, w_ref, b_ref, o_ref, psum_ref, psumsq_ref):
    """One M-tile of X_col @ W_col (+bias).  The whole (K, Co_p) weight is VMEM-resident
    (constant index_map), so there is no K grid axis and no accumulator round-trip.  The
    epilogue emits the (optionally tanh'ed) conv output plus per-tile BatchNorm partial
    sums written into lane-dense (8, Co_p) blocks (row 0 carries the data)."""
    y = jnp.dot(x_ref[...], w_ref[...], preferred_element_type=jnp.float32)
    y = y + b_ref[...]
    co = y.shape[1]
    row = jax.lax.broadcasted_iota(jnp.int32, (8, co), 0)
    s = jnp.broadcast_to(jnp.sum(y, axis=0, keepdims=True), (8, co))
    ss = jnp.broadcast_to(jnp.sum(y * y, axis=0, keepdims=True), (8, co))
    psum_ref[...] = jnp.where(row == 0, s, 0.0)
    psumsq_ref[...] = jnp.where(row == 0, ss, 0.0)
    if activation == "tanh":
        y = jnp.tanh(y)
    o_ref[...] = y


def _bn_relu_kernel(x_ref, scale_ref, shift_ref, o_ref):
    o_ref[...] = jnp.maximum(x_ref[...] * scale_ref[...] + shift_ref[...], 0.0)


def _bn_add_kernel(x_ref, scale_ref, shift_ref, res_ref, o_ref):
    o_ref[...] = x_ref[...] * scale_ref[...] + shift_ref[...] + res_ref[...]


def _attn_kernel(q_ref, k_ref, v_ref, o_ref):
    """One (batch, head) slice of softmax cross-attention, fully VMEM resident.
    q: (hw, ch), k/v: (ch, Kl), out: (ch, hw)."""
    logits = jnp.dot(q_ref[...], k_ref[...], preferred_element_type=jnp.float32)
    m = jnp.max(logits, axis=-1, keepdims=True)
    p = jnp.exp(logits - m)
    denom = jnp.sum(p, axis=-1, keepdims=True)
    scores = (p * pl.reciprocal(denom, approx=True)).astype(jnp.bfloat16)
    o_ref[...] = jax.lax.dot_general(
        v_ref[...], scores, (((1,), (1,)), ((), ())),
        preferred_element_type=jnp.float32)


# --------------------- cached pallas_call builders -------------------------

@functools.lru_cache(maxsize=None)
def _convmm_call(M, Kd, Co_p, activation):
    tm_cap = max(8, min(2048, ((_X_TILE_BYTES // (2 * Kd)) // 8) * 8))
    tm = _pick_tile(M, tm_cap, 8)
    n_m = M // tm
    return jax.jit(pl.pallas_call(
        functools.partial(_convmm_kernel, activation),
        out_shape=(jax.ShapeDtypeStruct((M, Co_p), jnp.float32),
                   jax.ShapeDtypeStruct((8 * n_m, Co_p), jnp.float32),
                   jax.ShapeDtypeStruct((8 * n_m, Co_p), jnp.float32)),
        grid_spec=pltpu.PrefetchScalarGridSpec(
            num_scalar_prefetch=0,
            grid=(n_m,),
            in_specs=[pl.BlockSpec((tm, Kd), lambda i: (i, 0)),
                      pl.BlockSpec((Kd, Co_p), lambda i: (0, 0)),   # whole weight resident
                      pl.BlockSpec((1, Co_p), lambda i: (0, 0))],
            out_specs=[pl.BlockSpec((tm, Co_p), lambda i: (i, 0)),
                       pl.BlockSpec((8, Co_p), lambda i: (i, 0)),
                       pl.BlockSpec((8, Co_p), lambda i: (i, 0))]),
        compiler_params=pltpu.CompilerParams(
            dimension_semantics=("parallel",),
            vmem_limit_bytes=_VMEM_LIMIT)))


def conv_matmul(x_col, w_col, bias_p, activation=None):
    M, Kd = x_col.shape
    Co_p = w_col.shape[1]
    return _convmm_call(M, Kd, Co_p, activation)(
        x_col.astype(jnp.bfloat16), w_col, bias_p)


@functools.lru_cache(maxsize=None)
def _bn_relu_call(M, C):
    tm = _pick_tile(M, 2048, 8)
    return jax.jit(pl.pallas_call(
        _bn_relu_kernel,
        out_shape=jax.ShapeDtypeStruct((M, C), jnp.float32),
        grid_spec=pltpu.PrefetchScalarGridSpec(
            num_scalar_prefetch=0,
            grid=(M // tm,),
            in_specs=[pl.BlockSpec((tm, C), lambda i: (i, 0)),
                      pl.BlockSpec((1, C), lambda i: (0, 0)),
                      pl.BlockSpec((1, C), lambda i: (0, 0))],
            out_specs=pl.BlockSpec((tm, C), lambda i: (i, 0))),
        compiler_params=pltpu.CompilerParams(
            dimension_semantics=("parallel",),
            vmem_limit_bytes=_VMEM_LIMIT)))


def bn_relu(y, scale, shift):
    M, C = y.shape
    return _bn_relu_call(M, C)(y, scale.reshape(1, C), shift.reshape(1, C))


@functools.lru_cache(maxsize=None)
def _bn_add_call(M, C):
    tm = _pick_tile(M, 1024, 8)
    return jax.jit(pl.pallas_call(
        _bn_add_kernel,
        out_shape=jax.ShapeDtypeStruct((M, C), jnp.float32),
        grid_spec=pltpu.PrefetchScalarGridSpec(
            num_scalar_prefetch=0,
            grid=(M // tm,),
            in_specs=[pl.BlockSpec((tm, C), lambda i: (i, 0)),
                      pl.BlockSpec((1, C), lambda i: (0, 0)),
                      pl.BlockSpec((1, C), lambda i: (0, 0)),
                      pl.BlockSpec((tm, C), lambda i: (i, 0))],
            out_specs=pl.BlockSpec((tm, C), lambda i: (i, 0))),
        compiler_params=pltpu.CompilerParams(
            dimension_semantics=("parallel",),
            vmem_limit_bytes=_VMEM_LIMIT)))


def bn_add(y, scale, shift, res):
    M, C = y.shape
    return _bn_add_call(M, C)(y, scale.reshape(1, C), shift.reshape(1, C), res)


@functools.lru_cache(maxsize=None)
def _attention_call(BH, hw, ch, Kl):
    return jax.jit(pl.pallas_call(
        _attn_kernel,
        out_shape=jax.ShapeDtypeStruct((BH, ch, hw), jnp.float32),
        grid_spec=pltpu.PrefetchScalarGridSpec(
            num_scalar_prefetch=0,
            grid=(BH,),
            in_specs=[pl.BlockSpec((None, hw, ch), lambda i: (i, 0, 0)),
                      pl.BlockSpec((None, ch, Kl), lambda i: (i, 0, 0)),
                      pl.BlockSpec((None, ch, Kl), lambda i: (i, 0, 0))],
            out_specs=pl.BlockSpec((None, ch, hw), lambda i: (i, 0, 0))),
        compiler_params=pltpu.CompilerParams(
            dimension_semantics=("parallel",),
            vmem_limit_bytes=_VMEM_LIMIT)))


def attention_pallas(Qm, Km, Vm):
    BH, hw, ch = Qm.shape
    Kl = Km.shape[2]
    return _attention_call(BH, hw, ch, Kl)(
        Qm.astype(jnp.bfloat16), Km.astype(jnp.bfloat16), Vm.astype(jnp.bfloat16))


# ------------------------------- JAX glue ---------------------------------

def _im2col(xp, k, s):
    N, Hp, Wp, C = xp.shape
    Ho = (Hp - k) // s + 1
    Wo = (Wp - k) // s + 1
    cols = jnp.concatenate(
        [xp[:, ky:ky + (Ho - 1) * s + 1:s, kx:kx + (Wo - 1) * s + 1:s, :]
         for ky in range(k) for kx in range(k)], axis=-1)
    return cols.reshape(N * Ho * Wo, k * k * C), (N, Ho, Wo)


def _conv_transpose_im2col(x_nhwc, k, s, pad, op):
    # TODO(synk): decompose the stride-2 transposed conv into s*s sub-convolutions so the
    # zero-stuffed rows (75% of X_col) never reach HBM (perf-review item #7).
    N, H, W, C = x_nhwc.shape
    if s > 1:
        Hs, Ws = (H - 1) * s + 1, (W - 1) * s + 1
        xs = jnp.zeros((N, Hs, Ws, C), x_nhwc.dtype).at[:, ::s, ::s, :].set(x_nhwc)
    else:
        xs = x_nhwc
    plo = k - 1 - pad
    phi = plo + op
    xp = jnp.pad(xs, ((0, 0), (plo, phi), (plo, phi), (0, 0)))
    return _im2col(xp, k, 1)


def _conv2d_pallas(x_nhwc, p, activation=None):
    xb = x_nhwc.astype(jnp.bfloat16)
    pad = p['pad']
    if pad > 0:
        xb = jnp.pad(xb, ((0, 0), (pad, pad), (pad, pad), (0, 0)),
                     mode='reflect' if p['pad_mode'] == 'reflect' else 'constant')
    cols, dims = _im2col(xb, p['k'], p['s'])
    y, ps, pss = conv_matmul(cols, p['w_col'], p['bias_p'], activation)
    return y, ps, pss, dims


def _deconv2d_pallas(x_nhwc, p):
    cols, dims = _conv_transpose_im2col(x_nhwc.astype(jnp.bfloat16),
                                        p['k'], p['s'], p['pad'], p['op'])
    y, ps, pss = conv_matmul(cols, p['w_col'], p['bias_p'], None)
    return y, ps, pss, dims


def _bn_scale_shift(psum, psumsq, M, gamma_p, beta_p, eps=1e-5):
    mean = jnp.sum(psum, axis=0) / M
    var = jnp.sum(psumsq, axis=0) / M - mean * mean      # biased (training-mode BN)
    inv = jax.lax.rsqrt(jnp.maximum(var, 0.0) + eps)
    scale = gamma_p * inv
    shift = beta_p - mean * scale
    return scale, shift


def _conv_bn_relu(x_nhwc, p):
    y, ps, pss, (N, Ho, Wo) = _conv2d_pallas(x_nhwc, p)
    scale, shift = _bn_scale_shift(ps, pss, y.shape[0], p['gamma_p'], p['beta_p'])
    y = bn_relu(y, scale, shift)
    return y[:, :p['cout']].reshape(N, Ho, Wo, p['cout'])


def _encoder_pallas(x_nhwc, layers):
    for p in layers:
        x_nhwc = _conv_bn_relu(x_nhwc, p)
    return x_nhwc


def _linear_pallas(x_flat, p):
    y, _, _ = conv_matmul(x_flat, p['w_col'], p['bias_p'], None)
    return y[:, :p['cout']]


def _mvn(x_nhwc, eps=1e-5):
    N, H, W, C = x_nhwc.shape
    flat = x_nhwc.reshape(N, H * W, C)
    mean = jnp.mean(flat, axis=1, keepdims=True)
    var = jnp.var(flat, axis=1, ddof=1, keepdims=True)   # torch .var() is unbiased
    return ((flat - mean) / jnp.sqrt(var + eps)).reshape(N, H, W, C)


def _attention_forward_pallas(cf, sf, ap, b, Kst):
    N, H, W, C = cf.shape
    hw, head = H * W, 8
    ch = C // head
    nc = _mvn(cf).reshape(b * hw, C)
    ns = _mvn(sf).reshape(b * Kst * hw, C)
    q = _linear_pallas(nc, ap['q'])
    k = _linear_pallas(ns, ap['k'])
    v = _linear_pallas(sf.reshape(b * Kst * hw, C), ap['v'])
    Qm = q.reshape(b, hw, head, ch).transpose(0, 2, 1, 3).reshape(b * head, hw, ch)
    Km = k.reshape(b, Kst, hw, head, ch).transpose(0, 3, 4, 1, 2).reshape(b * head, ch, Kst * hw)
    Vm = v.reshape(b, Kst, hw, head, ch).transpose(0, 3, 4, 1, 2).reshape(b * head, ch, Kst * hw)
    o = attention_pallas(Qm, Km, Vm)                                  # (b*head, ch, hw)
    att = o.reshape(b, head, ch, hw).transpose(0, 3, 1, 2).reshape(b * hw, C)
    att = _linear_pallas(att, ap['fusion'])
    return att.reshape(b, H, W, C)


def _resnet_block_pallas(x_nhwc, rb):
    N, H, W, C = x_nhwc.shape
    M = N * H * W
    res = x_nhwc.reshape(M, C)
    y, ps, pss, _ = _conv2d_pallas(x_nhwc, rb['c1'])
    scale, shift = _bn_scale_shift(ps, pss, M, rb['c1']['gamma_p'], rb['c1']['beta_p'])
    h = bn_relu(y, scale, shift)
    y2, ps2, pss2, _ = _conv2d_pallas(h.reshape(N, H, W, C), rb['c2'])
    scale2, shift2 = _bn_scale_shift(ps2, pss2, M, rb['c2']['gamma_p'], rb['c2']['beta_p'])
    out = bn_add(y2, scale2, shift2, res)
    return out.reshape(N, H, W, C)


def _deconv_bn_relu(x_nhwc, p):
    y, ps, pss, (N, Ho, Wo) = _deconv2d_pallas(x_nhwc, p)
    scale, shift = _bn_scale_shift(ps, pss, y.shape[0], p['gamma_p'], p['beta_p'])
    y = bn_relu(y, scale, shift)
    return y[:, :p['cout']].reshape(N, Ho, Wo, p['cout'])


def attention_generator_pallas(content_nchw, style_nkhw, params):
    b = content_nchw.shape[0]
    Kst = style_nkhw.shape[1]
    Hi, Wi = content_nchw.shape[2], content_nchw.shape[3]
    c_nhwc = jnp.transpose(content_nchw, (0, 2, 3, 1)).astype(jnp.float32)
    s_nhwc = jnp.transpose(style_nkhw.reshape(b * Kst, 1, Hi, Wi), (0, 2, 3, 1)).astype(jnp.float32)
    cf = _encoder_pallas(c_nhwc, params['content_enc'])
    sf = _encoder_pallas(s_nhwc, params['style_enc'])
    att = _attention_forward_pallas(cf, sf, params['att'], b, Kst)
    x = jnp.concatenate([cf, att], axis=-1)              # torch.cat(..., dim=1)
    for rb in params['blocks']:
        x = _resnet_block_pallas(x, rb)
    for up in params['ups']:
        x = _deconv_bn_relu(x, up)
    fp = params['final']
    y, _, _, (N, Ho, Wo) = _conv2d_pallas(x, fp, activation='tanh')
    out = y[:, :fp['cout']].reshape(N, Ho, Wo, fp['cout'])
    return jnp.transpose(out, (0, 3, 1, 2))


# ------------------------------ parameters ---------------------------------

def init_params(key):
    keys = iter(jax.random.split(key, 64))

    def nk():
        return next(keys)

    def conv_layer(cin, cout, k, s, pad, pad_mode, bias=False):
        w = jax.random.normal(nk(), (cout, cin, k, k), jnp.float32) / np.sqrt(cin * k * k)
        bvec = (jax.random.normal(nk(), (cout,), jnp.float32) * 0.1) if bias \
            else jnp.zeros((cout,), jnp.float32)
        co_p = _round_up(cout, _LANE)
        w_col = jnp.transpose(w, (2, 3, 1, 0)).reshape(k * k * cin, cout)
        w_col = jnp.pad(w_col, ((0, 0), (0, co_p - cout))).astype(jnp.bfloat16)
        return dict(w=w, b=bvec, w_col=w_col,
                    bias_p=jnp.pad(bvec, (0, co_p - cout)).reshape(1, co_p),
                    gamma=jnp.ones((cout,), jnp.float32),
                    beta=jnp.zeros((cout,), jnp.float32),
                    gamma_p=jnp.pad(jnp.ones((cout,), jnp.float32), (0, co_p - cout)),
                    beta_p=jnp.zeros((co_p,), jnp.float32),
                    cin=cin, cout=cout, co_p=co_p, k=k, s=s, pad=pad, pad_mode=pad_mode)

    def deconv_layer(cin, cout, k, s, pad, op):
        w = jax.random.normal(nk(), (cin, cout, k, k), jnp.float32) / np.sqrt(cin * k * k)
        co_p = _round_up(cout, _LANE)
        w_col = jnp.transpose(w[:, :, ::-1, ::-1], (2, 3, 0, 1)).reshape(k * k * cin, cout)
        w_col = jnp.pad(w_col, ((0, 0), (0, co_p - cout))).astype(jnp.bfloat16)
        return dict(w=w, w_col=w_col,
                    bias_p=jnp.zeros((1, co_p), jnp.float32),
                    gamma=jnp.ones((cout,), jnp.float32),
                    beta=jnp.zeros((cout,), jnp.float32),
                    gamma_p=jnp.pad(jnp.ones((cout,), jnp.float32), (0, co_p - cout)),
                    beta_p=jnp.zeros((co_p,), jnp.float32),
                    cin=cin, cout=cout, co_p=co_p, k=k, s=s, pad=pad, op=op)

    def encoder():
        return [conv_layer(1, 64, 7, 1, 3, 'reflect'),
                conv_layer(64, 128, 3, 2, 1, 'zero'),
                conv_layer(128, 256, 3, 2, 1, 'zero')]

    return dict(
        content_enc=encoder(),
        style_enc=encoder(),
        att=dict(q=conv_layer(256, 256, 1, 1, 0, 'zero', bias=True),
                 k=conv_layer(256, 256, 1, 1, 0, 'zero', bias=True),
                 v=conv_layer(256, 256, 1, 1, 0, 'zero', bias=True),
                 fusion=conv_layer(256, 256, 1, 1, 0, 'zero', bias=True)),
        blocks=[dict(c1=conv_layer(512, 512, 3, 1, 1, 'reflect'),
                     c2=conv_layer(512, 512, 3, 1, 1, 'reflect')) for _ in range(6)],
        ups=[deconv_layer(512, 256, 3, 2, 1, 1),
             deconv_layer(256, 128, 3, 2, 1, 1)],
        final=conv_layer(128, 1, 7, 1, 3, 'reflect', bias=True))


# ------------------------- plain-JAX reference ------------------------------

def attention_generator_ref(content_nchw, style_nkhw, params):
    b = content_nchw.shape[0]
    Kst = style_nkhw.shape[1]
    Hi, Wi = content_nchw.shape[2], content_nchw.shape[3]
    x_c = jnp.transpose(content_nchw, (0, 2, 3, 1)).astype(jnp.float32)
    x_s = jnp.transpose(style_nkhw.reshape(b * Kst, 1, Hi, Wi), (0, 2, 3, 1)).astype(jnp.float32)

    def bn(y, p):
        mean = jnp.mean(y, axis=(0, 1, 2))
        var = jnp.var(y, axis=(0, 1, 2))
        return (y - mean) * jax.lax.rsqrt(var + 1e-5) * p['gamma'] + p['beta']

    def conv(x, p, use_bias=False):
        pad = p['pad']
        if pad > 0:
            x = jnp.pad(x, ((0, 0), (pad, pad), (pad, pad), (0, 0)),
                        mode='reflect' if p['pad_mode'] == 'reflect' else 'constant')
        wf = jnp.transpose(p['w'], (2, 3, 1, 0)).astype(jnp.bfloat16)
        y = jax.lax.conv_general_dilated(
            x.astype(jnp.bfloat16), wf, (p['s'], p['s']), 'VALID',
            dimension_numbers=('NHWC', 'HWIO', 'NHWC'),
            preferred_element_type=jnp.float32)
        if use_bias:
            y = y + p['b']
        return y

    def deconv(x, p):
        wf = jnp.transpose(p['w'][:, :, ::-1, ::-1], (2, 3, 0, 1)).astype(jnp.bfloat16)
        plo = p['k'] - 1 - p['pad']
        phi = plo + p['op']
        return jax.lax.conv_general_dilated(
            x.astype(jnp.bfloat16), wf, (1, 1), [(plo, phi), (plo, phi)],
            lhs_dilation=(p['s'], p['s']),
            dimension_numbers=('NHWC', 'HWIO', 'NHWC'),
            preferred_element_type=jnp.float32)

    def encoder(x, layers):
        for p in layers:
            x = jnp.maximum(bn(conv(x, p), p), 0.0)
        return x

    cf = encoder(x_c, params['content_enc'])
    sf = encoder(x_s, params['style_enc'])

    ap = params['att']

    def lin(x, p):
        w = p['w'].reshape(p['cout'], p['cin']).T.astype(jnp.bfloat16)
        return jnp.dot(x.astype(jnp.bfloat16), w, preferred_element_type=jnp.float32) + p['b']

    H, W, C = cf.shape[1], cf.shape[2], cf.shape[3]
    hw, head = H * W, 8
    ch = C // head
    q = lin(_mvn(cf).reshape(b, hw, C), ap['q'])
    kk = lin(_mvn(sf).reshape(b * Kst, hw, C), ap['k'])
    vv = lin(sf.reshape(b * Kst, hw, C), ap['v'])
    Q = q.reshape(b, hw, head, ch).transpose(0, 2, 3, 1)
    Km = kk.reshape(b, Kst, hw, head, ch).transpose(0, 3, 4, 1, 2).reshape(b, head, ch, Kst * hw)
    Vm = vv.reshape(b, Kst, hw, head, ch).transpose(0, 3, 4, 1, 2).reshape(b, head, ch, Kst * hw)
    logits = jnp.einsum('bhcx,bhcy->bhxy', Q.astype(jnp.bfloat16), Km.astype(jnp.bfloat16),
                        preferred_element_type=jnp.float32)
    sm = jax.nn.softmax(logits, axis=-1)
    o = jnp.einsum('bhxy,bhcy->bhcx', sm.astype(jnp.bfloat16), Vm.astype(jnp.bfloat16),
                   preferred_element_type=jnp.float32)
    att = o.reshape(b, C, hw).transpose(0, 2, 1)
    att = lin(att, ap['fusion']).reshape(b, H, W, C)

    x = jnp.concatenate([cf, att], axis=-1)
    for rb in params['blocks']:
        h = jnp.maximum(bn(conv(x, rb['c1']), rb['c1']), 0.0)
        h = bn(conv(h, rb['c2']), rb['c2'])
        x = x + h
    for up in params['ups']:
        x = jnp.maximum(bn(deconv(x, up), up), 0.0)
    y = jnp.tanh(conv(x, params['final'], use_bias=True))
    return jnp.transpose(y, (0, 3, 1, 2))


# --------------------------------- main ------------------------------------

if __name__ == "__main__":
    root = jax.random.PRNGKey(0)
    kp, kc, ks = jax.random.split(root, 3)
    params = init_params(kp)

    b, Kst = 2, 2     # small batch; 64x64 inputs as implied by the module
    content = jax.random.normal(kc, (b, 1, 64, 64), jnp.float32)
    styles = jax.random.normal(ks, (b, Kst, 64, 64), jnp.float32)

    out = jax.block_until_ready(attention_generator_pallas(content, styles, params))
    assert out.shape == (b, 1, 64, 64), out.shape

    ref = jax.block_until_ready(attention_generator_ref(content, styles, params))
    err = float(jnp.max(jnp.abs(out - ref)))
    assert err < 1e-1, f"max |pallas - reference| = {err}"
    print("KERNEL_OK")
</pallas_src>

<mosaic_0001>
module attributes {stable_mosaic.version = 11 : i64} {
  func.func @_convmm_kernel(%arg0: i32, %arg1: memref<2048x49xbf16, #tpu.memory_space<vmem>>, %arg2: memref<49x128xbf16, #tpu.memory_space<vmem>>, %arg3: memref<1x128xf32, #tpu.memory_space<vmem>>, %arg4: memref<2048x128xf32, #tpu.memory_space<vmem>>, %arg5: memref<8x128xf32, #tpu.memory_space<vmem>>, %arg6: memref<8x128xf32, #tpu.memory_space<vmem>>) attributes {dimension_semantics = [#tpu.dimension_semantics<parallel>], iteration_bounds = array<i64: 4>, scalar_prefetch = 0 : i64, scratch_operands = 0 : i64, tpu.core_type = #tpu.core_type<tc>, window_params = [{transform_indices = @transform_0, window_bounds = array<i64: 2048, 49>}, {pipeline_mode = #tpu.pipeline_mode<synchronous>, transform_indices = @transform_1, window_bounds = array<i64: 49, 128>}, {pipeline_mode = #tpu.pipeline_mode<synchronous>, transform_indices = @transform_2, window_bounds = array<i64: 1, 128>}, {transform_indices = @transform_3, window_bounds = array<i64: 2048, 128>}, {transform_indices = @transform_4, window_bounds = array<i64: 8, 128>}, {transform_indices = @transform_5, window_bounds = array<i64: 8, 128>}]} {
    %c0 = arith.constant 0 : index
    %c0_0 = arith.constant 0 : index
    %0 = vector.load %arg1[%c0, %c0_0] : memref<2048x49xbf16, #tpu.memory_space<vmem>>, vector<2048x49xbf16>
    %c0_1 = arith.constant 0 : index
    %c0_2 = arith.constant 0 : index
    %1 = vector.load %arg2[%c0_1, %c0_2] : memref<49x128xbf16, #tpu.memory_space<vmem>>, vector<49x128xbf16>
    %cst = arith.constant dense<0.000000e+00> : vector<2048x128xf32>
    %2 = tpu.matmul %0, %1, %cst {dimension_numbers = #tpu.dot_dimension_numbers<[1], [0], [0], [1], [0, 0, 1, 1], [], []>} : vector<2048x49xbf16>, vector<49x128xbf16>, vector<2048x128xf32> -> vector<2048x128xf32>
    %c0_3 = arith.constant 0 : index
    %c0_4 = arith.constant 0 : index
    %3 = vector.load %arg3[%c0_3, %c0_4] : memref<1x128xf32, #tpu.memory_space<vmem>>, vector<1x128xf32>
    %4 = vector.broadcast %3 : vector<1x128xf32> to vector<2048x128xf32>
    %5 = arith.addf %2, %4 : vector<2048x128xf32>
    %6 = tpu.iota {dimensions = array<i32: 0>} : vector<8x128xi32>
    %cst_5 = arith.constant dense<0.000000e+00> : vector<128xf32>
    %7 = vector.multi_reduction <add>, %5, %cst_5 [0] : vector<2048x128xf32> to vector<128xf32>
    %8 = vector.shape_cast %7 : vector<128xf32> to vector<1x128xf32>
    %9 = vector.shape_cast %8 : vector<1x128xf32> to vector<1x128xf32>
    %10 = vector.broadcast %9 : vector<1x128xf32> to vector<8x128xf32>
    %11 = arith.mulf %5, %5 : vector<2048x128xf32>
    %cst_6 = arith.constant dense<0.000000e+00> : vector<128xf32>
    %12 = vector.multi_reduction <add>, %11, %cst_6 [0] : vector<2048x128xf32> to vector<128xf32>
    %13 = vector.shape_cast %12 : vector<128xf32> to vector<1x128xf32>
    %14 = vector.shape_cast %13 : vector<1x128xf32> to vector<1x128xf32>
    %15 = vector.broadcast %14 : vector<1x128xf32> to vector<8x128xf32>
    %c0_i32 = arith.constant 0 : i32
    %16 = vector.broadcast %c0_i32 : i32 to vector<8x128xi32>
    %17 = arith.cmpi eq, %6, %16 : vector<8x128xi32>
    %cst_7 = arith.constant 0.000000e+00 : f32
    %18 = vector.broadcast %cst_7 : f32 to vector<8x128xf32>
    %19 = arith.select %17, %10, %18 : vector<8x128xi1>, vector<8x128xf32>
    %c0_8 = arith.constant 0 : index
    %c0_9 = arith.constant 0 : index
    %20 = vector.load %arg5[%c0_8, %c0_9] : memref<8x128xf32, #tpu.memory_space<vmem>>, vector<8x128xf32>
    tpu.vector_store %arg5[%c0_8, %c0_9], %19 {strides = array<i32>} : memref<8x128xf32, #tpu.memory_space<vmem>>, vector<8x128xf32>,
    %c0_i32_10 = arith.constant 0 : i32
    %21 = vector.broadcast %c0_i32_10 : i32 to vector<8x128xi32>
    %22 = arith.cmpi eq, %6, %21 : vector<8x128xi32>
    %cst_11 = arith.constant 0.000000e+00 : f32
    %23 = vector.broadcast %cst_11 : f32 to vector<8x128xf32>
    %24 = arith.select %22, %15, %23 : vector<8x128xi1>, vector<8x128xf32>
    %c0_12 = arith.constant 0 : index
    %c0_13 = arith.constant 0 : index
    %25 = vector.load %arg6[%c0_12, %c0_13] : memref<8x128xf32, #tpu.memory_space<vmem>>, vector<8x128xf32>
    tpu.vector_store %arg6[%c0_12, %c0_13], %24 {strides = array<i32>} : memref<8x128xf32, #tpu.memory_space<vmem>>, vector<8x128xf32>,
    %c0_14 = arith.constant 0 : index
    %c0_15 = arith.constant 0 : index
    %26 = vector.load %arg4[%c0_14, %c0_15] : memref<2048x128xf32, #tpu.memory_space<vmem>>, vector<2048x128xf32>
    tpu.vector_store %arg4[%c0_14, %c0_15], %5 {strides = array<i32>} : memref<2048x128xf32, #tpu.memory_space<vmem>>, vector<2048x128xf32>,
    return
  }
  func.func @transform_0(%arg0: i32) -> (i32, i32) {
    %c0_i32 = arith.constant 0 : i32
    %c0_i32_0 = arith.constant 0 : i32
    return %arg0, %c0_i32 : i32, i32
  }
  func.func @transform_1(%arg0: i32) -> (i32, i32) {
    %c0_i32 = arith.constant 0 : i32
    %c0_i32_0 = arith.constant 0 : i32
    %c0_i32_1 = arith.constant 0 : i32
    return %c0_i32, %c0_i32_0 : i32, i32
  }
  func.func @transform_2(%arg0: i32) -> (i32, i32) {
    %c0_i32 = arith.constant 0 : i32
    %c0_i32_0 = arith.constant 0 : i32
    %c0_i32_1 = arith.constant 0 : i32
    return %c0_i32, %c0_i32_0 : i32, i32
  }
  func.func @transform_3(%arg0: i32) -> (i32, i32) {
    %c0_i32 = arith.constant 0 : i32
    %c0_i32_0 = arith.constant 0 : i32
    return %arg0, %c0_i32 : i32, i32
  }
  func.func @transform_4(%arg0: i32) -> (i32, i32) {
    %c0_i32 = arith.constant 0 : i32
    %c0_i32_0 = arith.constant 0 : i32
    return %arg0, %c0_i32 : i32, i32
  }
  func.func @transform_5(%arg0: i32) -> (i32, i32) {
    %c0_i32 = arith.constant 0 : i32
    %c0_i32_0 = arith.constant 0 : i32
    return %arg0, %c0_i32 : i32, i32
  }
}

</mosaic_0001>

<bundles_post_ra>
// kernel: tpu_custom_call.1
= control target key start
LH: loop header
LB: loop body
LE: loop exit
PB: predicated region body
PF: predicated region fallthrough
CT: control target
= control target key end

     0   :  { %11 = vsyncpa [#allocation3], 0  ;;  %s6718_s0 = inlined_call_operand.vmem [shape: bf16[8192,49], index: 0, kind: input, shape index: {}]   ;;  %s6719_s1 = inlined_call_operand.hbm [shape: bf16[49,128], index: 1, kind: input, shape index: {}]   ;;  %s6720_s2 = inlined_call_operand.hbm [shape: f32[1,128], index: 2, kind: input, shape index: {}]   ;;  %s6721_s3 = inlined_call_operand.hbm [shape: f32[8192,128], index: 3, kind: output, shape index: {0}]   ;;  %s6722_s4 = inlined_call_operand.hbm [shape: f32[32,128], index: 4, kind: output, shape index: {1}]   ;;  %s6723_s5 = inlined_call_operand.hbm [shape: f32[32,128], index: 5, kind: output, shape index: {2}]  }
   0x1   :  { %12 = vsyncpa [#allocation6], 0 }
   0x2   :  { %13 = vsyncpa [#allocation4], 0 }
   0x3   :  { %15 = vsyncpa [#allocation4 + $0x1], 0 }
   0x4   :  { %16 = vsyncpa [#allocation9], 0 }
   0x5   :  { %18 = vsyncpa [#allocation9 + $0x1], 0  ;;  %s5037_s18 = smov 0   ;;  %s5039_s19 = smov 0  }
   0x6   :  { %s5041_s20 = smov 0   ;;  %s5043_s21 = smov 0  }
   0x7 LB: > { %s5058_s22 = sadd.s32 4294967295, %s4995_s21   ;;  %s3888_s23 = sadd.s32 4294967294, %s4995_s21   ;;  %s4995_s21 = sphi %s5043_s21, %s6821_s21   ;;  %s4991_s20 = sphi %s5041_s20, %s6820_s20   ;;  %s4987_s19 = sphi %s5039_s19, %s6819_s19   ;;  %s4983_s18 = sphi %s5037_s18, %s6818_s18  }
   0x8   : > { %s5062_s24 = sadd.s32 1, %s4995_s21   ;;  %s99_s25 = sadd.s32 1, %s4991_s20 }
   0x9   : > { %s96_s26 = ssub.s32 %s4995_s21, %s5062_s24  ;;  %p109_p0 = scmp.ne.s32.totalorder %s4991_s20, %s4987_s19 }
   0xa   : > { %p97_p1 = scmp.eq.s32.totalorder %s96_s26, 0  ;;  %p110_p2 = scmp.eq.s32.totalorder %s5058_s22, 3 }
   0xb   : > { %p115_p3 = scmp.ne.s32.totalorder %s4987_s19, %s4983_s18  ;;  %p116_p4 = scmp.eq.s32.totalorder %s3888_s23, 3 }
   0xc   : > { %s5075_s27 = scalar_select %p97_p1, %s4991_s20, %s99_s25  }
   0xd   : > { %p5077_p5 = por %p110_p2, %p109_p0  ;;  %p5081_p6 = por %p116_p4, %p115_p3 }
   0xe   : > { %p3889_p7 = scmp.ge.s32.totalorder %s4995_s21, 1  ;;  %p175_p8 = scmp.lt.s32.totalorder %s4995_s21, 5 }
   0xf   : > { %s6767_s28 = scalar_select %p5077_p5, 1, 0 }
  0x10   : > { %s6768_s29 = scalar_select %p5081_p6, 1, 0 }
  0x11   : > { %p6724_p9 = scmp.eq.s32.totalorder %s5058_s22, 0  ;;  %p5088_p10 = pnand %p3889_p7, %p175_p8 }
  0x12   : > { %s4997_s6 = smov [#allocation2]   ;;  %s4998_s9 = smov [#allocation5]  }
  0x13   : > { %s6769_s30 = scalar_select %p5088_p10, 1, 0 }
  0x14   : > { %s187_s7 = sshll.u32 %s4997_s6, 4  ;;  %p4590_p11 = pneg %p5088_p10  ;;  %s188_s7 = int_to_ptr.vmem [resolvable:$true] %s187_s7 }
  0x15   : > { %s201_s10 = sshll.u32 %s4998_s9, 4  ;;  %s4809_s13 = scalar_lea.hbm %s6719_s1, 448  ;;  %s5100_s10 = int_to_ptr.vmem [resolvable:$true] %s201_s10 }
  0x16   : > { %p5096_p12 = pnand %p6724_p9, %p4590_p11  ;;  %p4810_p13 = scmp.ne.s32.totalorder %s6719_s1, %s4809_s13 }
  0x17   : > { %p4816_p3 = scmp.lt.u32.totalorder %s4809_s13, %s6719_s1 }
  0x18   : > { %p4811_p0 = pneg %p5096_p12 }
  0x1a   : > { %p4812_p1 = pnand %p4811_p0, %p4810_p13 }
  0x1c   : > { %p4813_p2 = pneg %p4812_p1 }
  0x1e   : > { %p4818_p4 = pnand %p4816_p3, %p4813_p2 }
  0x20   : > { %4821 = shalt.err (!%p4818_p4)
}
  0x21   : > { %s4822_s25 = scalar_lea.vmem %s188_s7, 448  ;;  %p4830_p9 = scmp.lt.s32.totalorder %s188_s7, %s188_s7 }
  0x22   : > { %p4823_p7 = scmp.ne.s32.totalorder %s188_s7, %s4822_s25  ;;  %p4831_p6 = scmp.lt.s32.totalorder %s4822_s25, %s4822_s25 }
  0x24   : > { %p4825_p8 = pnand %p4823_p7, %p4811_p0  ;;  %p4832_p5 = por %p4831_p6, %p4830_p9 }
  0x26   : > { %p4826_p11 = pneg %p4825_p8 }
  0x28   : > { %p4833_p10 = pnand %p4832_p5, %p4826_p11 }
  0x2a   : > { %4836 = shalt.err (!%p4833_p10)
}
  0x2b   : > { %s4999_s26 = smov 64   ;;  %s5000_s6 = smov 4  }
  0x2c   : > { %4593 = dma.hbm_to_vmem [thread:$0]  (!%p5096_p12), %s6719_s1, 448, %s188_s7, [#allocation3], %s4999_s26, %s4999_s26, %s5000_s6  }
  0x2d   : > { %s4837_s14 = scalar_lea.hbm %s6720_s2, 16 }
  0x2e   : > { %p4838_p13 = scmp.ne.s32.totalorder %s6720_s2, %s4837_s14  ;;  %p4844_p9 = scmp.lt.u32.totalorder %s4837_s14, %s6720_s2 }
  0x30   : > { %p4840_p5 = pnand %p4838_p13, %p4811_p0 }
  0x32   : > { %p4841_p6 = pneg %p4840_p5 }
  0x34   : > { %p4846_p10 = pnand %p4844_p9, %p4841_p6 }
  0x36   : > { %4849 = shalt.err (!%p4846_p10)
}
  0x37   : > { %s4850_s7 = scalar_lea.vmem %s5100_s10, 16  ;;  %s4857_s26 = scalar_lea.vmem %s5100_s10, 32 }
  0x38   : > { %p4851_p1 = scmp.ne.s32.totalorder %s5100_s10, %s4850_s7  ;;  %p4858_p4 = scmp.lt.s32.totalorder %s5100_s10, %s5100_s10 }
  0x39   : > { %p4859_p7 = scmp.lt.s32.totalorder %s4857_s26, %s4850_s7 }
  0x3a   : > { %p4853_p2 = pnand %p4851_p1, %p4811_p0 }
  0x3b   : > { %p4860_p8 = por %p4859_p7, %p4858_p4 }
  0x3c   : > { %p4854_p3 = pneg %p4853_p2 }
  0x3e   : > { %p4861_p11 = pnand %p4860_p8, %p4854_p3 }
  0x40   : > { %4864 = shalt.err (!%p4861_p11)
}
  0x41   : > { %4596 = dma.hbm_to_vmem [thread:$0]  (!%p5096_p12), %s6720_s2, 16, %s5100_s10, [#allocation6]  }
  0x42   : > { %p6771_p13 = scmp.ne.s32.totalorder %s6769_s30, 0 }
  0x44   : > { %223 = sbr.rel (%p6771_p13) target bundleno = 887 (0x377), region = 32 }
  0x4b   : > { %p6772_p0 = scmp.eq.s32.totalorder %s5058_s22, 0 }
  0x4d   : > { %4966 = dma.done.wait (%p6772_p0), [#allocation3], 448   ;;  %p6773_p5 = pmov %p6772_p0 }
  0x4e   : > { %p6774_p6 = pmov %p6772_p0 }
  0x4f   : > { %4968 = vsyncadd (%p6773_p5), [#allocation3], 4294966848 }
  0x50   : > { %4970 = dma.done.wait (%p6774_p6), [#allocation6], 16   ;;  %p6775_p9 = pmov %p6772_p0 }
  0x51   : > { %s3899_s8 = sshll.u32 %s5058_s22, 8  ;;  %v4651_v0 = vld [vmem:[#allocation2] sm:$0xff]   ;;  %vm1589_vm0 = vcmask 1040384   ;;  %v4652_v1 = vld [vmem:[#allocation2 + $0x8] sm:$0xff]   ;;  %v4653_v2 = vld [vmem:[#allocation2 + $0x10] sm:$0xff]   ;;  %vm1204_vm1 = vcmask 400384  }
  0x52   : > { %4972 = vsyncadd (%p6775_p9), [#allocation6], 4294967280  ;;  %p266_p10 = scmp.lt.s32.totalorder %s3899_s8, 1023  ;;  %4304 = vmatprep.subr.bf16.mxu0 %v4651_v0  ;;  %4568 = vmatprep.subr.bf16.mxu1 %v4651_v0  ;;  %v4654_v3 = vld [vmem:[#allocation2 + $0x18] ss:$0 sps:$4 sm:$0x11]  }
  0x53   : > { %4305 = vmatpush3.bf16.msra.mxu0 %v4651_v0  ;;  %4572 = vmatpush3.bf16.msra.mxu1 %v4651_v0  ;;  %v5001_v5 = vmov 0   ;;  %s5317_s13 = sand.u32 1, %s4987_s19   ;;  %s4171_s16 = sshll.u32 %s5058_s22, 15 }
  0x54   : > { %s6823_s8 = smov (!%p266_p10, %s3899_s8), 1023  ;;  %4306 = vmatprep.subr.bf16.mxu0 %v4652_v1  ;;  %4569 = vmatprep.subr.bf16.mxu1 %v4652_v1  ;;  %v1591_v6 = vsel %vm1589_vm0, 65535, %v5001_v5  ;;  %s3896_s14 = sshll.u32 %s5317_s13, 11 }
  0x55   : > { %s3900_s10 = sshll.u32 %s6823_s8, 2  ;;  %v1593_v7 = vand.u32 %v4654_v3, %v1591_v6  ;;  %s5334_s15 = scalar_lea.vmem [#allocation7], %s3896_s14 }
  0x56   : > { %s5164_s12 = scalar_lea.vmem %s6718_s0, %s3900_s10  ;;  %s3717_s17 = sshll.u32 %s5334_s15, 4  ;;  %s6444_s17 = int_to_ptr.vmem [resolvable:$true] %s3717_s17 }
  0x57   : > { %v4655_v4 = vld [vmem:[%s5164_s12] sm:$0xff]   ;;  %4307 = vmatpush3.bf16.msra.mxu0 %v4652_v1  ;;  %4573 = vmatpush3.bf16.msra.mxu1 %v4652_v1  ;;  %v4656_v8 = vld [vmem:[%s5164_s12 + $0x8] sm:$0xff]   ;;  %v4657_v9 = vld [vmem:[%s5164_s12 + $0x10] sm:$0xff]   ;;  %s6442_s26 = scalar_lea.hbm %s6721_s3, %s4171_s16  ;;  %s3694_s6 = scalar_lea.sflag [#allocation4], %s5317_s13 }
  0x58   : > { %4312 = vmatprep.mubr.msk.bf16.mxu0 %vm1204_vm1, %v4655_v4  ;;  %4308 = vmatprep.subr.bf16.mxu0 %v4653_v2  ;;  %v4658_v10 = vld [vmem:[%s5164_s12 + $0x18] sm:$0xff]   ;;  %v4659_v11 = vld [vmem:[%s5164_s12 + $0x20] sm:$0xff]   ;;  %v4660_v12 = vld [vmem:[%s5164_s12 + $0x28] sm:$0xff]   ;;  %s4865_s9 = scalar_lea.vmem %s6444_s17, 32768  ;;  %p6804_p1 = scmp.ne.s32.totalorder %s6767_s28, 0 }
  0x59   : > { %4570 = vmatprep.subr.bf16.mxu1 %v4653_v2  ;;  %v4661_v13 = vld [vmem:[%s5164_s12 + $0x30] sm:$0xff]   ;;  %v4662_v14 = vld [vmem:[%s5164_s12 + $0x38] sm:$0xff]   ;;  %v4663_v15 = vld [vmem:[%s5164_s12 + $0x40] sm:$0xff]   ;;  %p4866_p12 = scmp.ne.s32.totalorder %s6444_s17, %s4865_s9  ;;  %s5002_s8 = smov [#allocation7]  }
  0x5a   : > { %v4664_v16 = vld [vmem:[%s5164_s12 + $0x48] sm:$0xff]   ;;  %v4665_v17 = vld [vmem:[%s5164_s12 + $0x50] sm:$0xff]   ;;  %v4666_v18 = vld [vmem:[%s5164_s12 + $0x58] sm:$0xff]   ;;  %s4869_s10 = sshll.u32 %s5002_s8, 4  ;;  %s4870_s10 = int_to_ptr.vmem [resolvable:$false] %s4869_s10 }
  0x5b   : > { %4309 = vmatpush3.bf16.msra.mxu0 %v4653_v2  ;;  %4574 = vmatpush3.bf16.msra.mxu1 %v4653_v2  ;;  %v4667_v19 = vld [vmem:[%s5164_s12 + $0x60] sm:$0xff]   ;;  %v4668_v20 = vld [vmem:[%s5164_s12 + $0x68] sm:$0xff]   ;;  %v4669_v21 = vld [vmem:[%s5164_s12 + $0x70] sm:$0xff]   ;;  %p4867_p2 = pnand %p4866_p12, %p6804_p1  ;;  %s4871_s30 = scalar_lea.vmem %s4870_s10, 65536 }
  0x5c   : > { %4310 = vmatprep.subr.bf16.mxu0 %v1593_v7  ;;  %4571 = vmatprep.subr.bf16.mxu1 %v1593_v7  ;;  %v4670_v22 = vld [vmem:[%s5164_s12 + $0x78] sm:$0xff]   ;;  %v4671_v23 = vld [vmem:[%s5164_s12 + $0x80] sm:$0xff]   ;;  %v4672_v24 = vld [vmem:[%s5164_s12 + $0x88] sm:$0xff]   ;;  %p4872_p4 = scmp.lt.s32.totalorder %s6444_s17, %s4870_s10  ;;  %p4873_p7 = scmp.lt.s32.totalorder %s4871_s30, %s4865_s9 }
  0x5d   : > { %v4673_v25 = vld [vmem:[%s5164_s12 + $0x90] sm:$0xff]   ;;  %v4674_v26 = vld [vmem:[%s5164_s12 + $0x98] sm:$0xff]   ;;  %v4675_v27 = vld [vmem:[%s5164_s12 + $0xa0] sm:$0xff]   ;;  %p4868_p3 = pneg %p4867_p2 }
  0x5e   : > { %v4676_v28 = vld [vmem:[%s5164_s12 + $0xa8] sm:$0xff]   ;;  %v4677_v29 = vld [vmem:[%s5164_s12 + $0xb0] sm:$0xff]   ;;  %v4678_v30 = vld [vmem:[%s5164_s12 + $0xb8] sm:$0xff]   ;;  %p4874_p8 = por %p4873_p7, %p4872_p4 }
  0x5f   : > { %4311 = vmatpush3.bf16.msra.mxu0 %v1593_v7  ;;  %4575 = vmatpush3.bf16.msra.mxu1 %v1593_v7  ;;  %v4679_v31 = vld [vmem:[%s5164_s12 + $0xc0] sm:$0xff]   ;;  %v4680_v32 = vld [vmem:[%s5164_s12 + $0xc8] sm:$0xff]   ;;  %v4681_v33 = vld [vmem:[%s5164_s12 + $0xd0] sm:$0xff]  }
  0x60   : > { %v4682_v34 = vld [vmem:[%s5164_s12 + $0xd8] sm:$0xff]   ;;  %v4683_v35 = vld [vmem:[%s5164_s12 + $0xe0] sm:$0xff]   ;;  %v4684_v36 = vld [vmem:[%s5164_s12 + $0xe8] sm:$0xff]   ;;  %p4875_p11 = pnand %p4874_p8, %p4868_p3 }
  0x61   : > { %v4685_v37 = vld [vmem:[%s5164_s12 + $0xf0] sm:$0xff]   ;;  %v4686_v38 = vld [vmem:[%s5164_s12 + $0xf8] sm:$0xff]   ;;  %v4687_v39 = vld [vmem:[%s5164_s12 + $0x100] sm:$0xff]  }
  0x62   : > { %4313 = vmatmul.mubr.msk.bf16.vlgmr.msra.gmra.mrb[0].mxu0 %vm1204_vm1, %v4656_v8  ;;  %v4719_v40 = vld [vmem:[%s5164_s12 + $0x200] sm:$0xff]   ;;  %v4720_v41 = vld [vmem:[%s5164_s12 + $0x208] sm:$0xff]   ;;  %v4689_v43 = vld [vmem:[%s5164_s12 + $0x110] sm:$0xff]  }
  0x63   : > { %4316 = vmatprep.mubr.msk.bf16.mxu0 %vm1204_vm1, %v4657_v9  ;;  %v4688_v42 = vld [vmem:[%s5164_s12 + $0x108] sm:$0xff]   ;;  %4440 = vmatprep.mubr.msk.bf16.mxu1 %vm1204_vm1, %v4719_v40  ;;  %v4721_v44 = vld [vmem:[%s5164_s12 + $0x210] sm:$0xff]   ;;  %v4722_v45 = vld [vmem:[%s5164_s12 + $0x218] sm:$0xff]  }
  0x64   : > { %4441 = vmatmul.mubr.msk.bf16.vlgmr.msra.gmra.mrb[0].mxu1 %vm1204_vm1, %v4720_v41  ;;  %v4690_v46 = vld [vmem:[%s5164_s12 + $0x118] sm:$0xff]   ;;  %v4691_v47 = vld [vmem:[%s5164_s12 + $0x120] sm:$0xff]   ;;  %v4724_v49 = vld [vmem:[%s5164_s12 + $0x228] sm:$0xff]  }
  0x65   : > { %4444 = vmatprep.mubr.msk.bf16.mxu1 %vm1204_vm1, %v4721_v44  ;;  %v4723_v48 = vld [vmem:[%s5164_s12 + $0x220] sm:$0xff]   ;;  %v4692_v50 = vld [vmem:[%s5164_s12 + $0x128] sm:$0xff]   ;;  %v4693_v51 = vld [vmem:[%s5164_s12 + $0x130] sm:$0xff]  }
  0x66   : > { %v4725_v52 = vld [vmem:[%s5164_s12 + $0x230] sm:$0xff]   ;;  %v4726_v53 = vld [vmem:[%s5164_s12 + $0x238] sm:$0xff]   ;;  %v4695_v55 = vld [vmem:[%s5164_s12 + $0x140] sm:$0xff]  }
  0x67   : > { %v4694_v54 = vld [vmem:[%s5164_s12 + $0x138] sm:$0xff]   ;;  %v4727_v56 = vld [vmem:[%s5164_s12 + $0x240] sm:$0xff]   ;;  %v4728_v57 = vld [vmem:[%s5164_s12 + $0x248] sm:$0xff]  }
  0x68   : > { %v4696_v58 = vld [vmem:[%s5164_s12 + $0x148] sm:$0xff]   ;;  %v4697_v59 = vld [vmem:[%s5164_s12 + $0x150] sm:$0xff]   ;;  %v4730_v61 = vld [vmem:[%s5164_s12 + $0x258] sm:$0xff]  }
  0x69   : > { %v4729_v60 = vld [vmem:[%s5164_s12 + $0x250] sm:$0xff]   ;;  %v4698_v62 = vld [vmem:[%s5164_s12 + $0x158] sm:$0xff]   ;;  %v4699_v63 = vld [vmem:[%s5164_s12 + $0x160] sm:$0xff]  }
  0x6a   : > { %4317 = vmatmul.mubr.msk.bf16.gmra.mrb[4].mxu0 %vm1204_vm1, %v4658_v10  ;;  %v4731_v0 = vld [vmem:[%s5164_s12 + $0x260] sm:$0xff]   ;;  %v4732_v1 = vld [vmem:[%s5164_s12 + $0x268] sm:$0xff]   ;;  %v4701_v3 = vld [vmem:[%s5164_s12 + $0x170] sm:$0xff]  }
  0x6b   : > { %4320 = vmatprep.mubr.msk.bf16.mxu0 %vm1204_vm1, %v4659_v11  ;;  %v4700_v2 = vld [vmem:[%s5164_s12 + $0x168] sm:$0xff]   ;;  %v4733_v4 = vld [vmem:[%s5164_s12 + $0x270] sm:$0xff]   ;;  %v4734_v5 = vld [vmem:[%s5164_s12 + $0x278] sm:$0xff]  }
  0x6c   : > { %4445 = vmatmul.mubr.msk.bf16.gmra.mrb[4].mxu1 %vm1204_vm1, %v4722_v45  ;;  %v4702_v6 = vld [vmem:[%s5164_s12 + $0x178] sm:$0xff]   ;;  %v4703_v7 = vld [vmem:[%s5164_s12 + $0x180] sm:$0xff]   ;;  %v4736_v9 = vld [vmem:[%s5164_s12 + $0x288] sm:$0xff]  }
  0x6d   : > { %4448 = vmatprep.mubr.msk.bf16.mxu1 %vm1204_vm1, %v4723_v48  ;;  %v4735_v8 = vld [vmem:[%s5164_s12 + $0x280] sm:$0xff]   ;;  %v4704_v10 = vld [vmem:[%s5164_s12 + $0x188] sm:$0xff]   ;;  %v4705_v11 = vld [vmem:[%s5164_s12 + $0x190] sm:$0xff]  }
  0x6e   : > { %v4744_v41 = vld [vmem:[%s5164_s12 + $0x2c8] sm:$0xff]  }
  0x6f   : > { %v4712_v44 = vld [vmem:[%s5164_s12 + $0x1c8] sm:$0xff]  }
  0x72   : > { %4321 = vmatmul.mubr.msk.bf16.gmra.mrb[8].mxu0 %vm1204_vm1, %v4660_v12  ;;  %v4737_v12 = vld [vmem:[%s5164_s12 + $0x290] sm:$0xff]  }
  0x73   : > { %4324 = vmatprep.mubr.msk.bf16.mxu0 %vm1204_vm1, %v4661_v13  ;;  %v4738_v13 = vld [vmem:[%s5164_s12 + $0x298] sm:$0xff]  }
  0x74   : > { %4449 = vmatmul.mubr.msk.bf16.gmra.mrb[8].mxu1 %vm1204_vm1, %v4724_v49 }
  0x75   : > { %4452 = vmatprep.mubr.msk.bf16.mxu1 %vm1204_vm1, %v4725_v52 }
  0x7a   : > { %4325 = vmatmul.mubr.msk.bf16.gmra.mrb[12].mxu0 %vm1204_vm1, %v4662_v14  ;;  %v4706_v14 = vld [vmem:[%s5164_s12 + $0x198] sm:$0xff]  }
  0x7b   : > { %4328 = vmatprep.mubr.msk.bf16.mxu0 %vm1204_vm1, %v4663_v15  ;;  %v4707_v15 = vld [vmem:[%s5164_s12 + $0x1a0] sm:$0xff]  }
  0x7c   : > { %4453 = vmatmul.mubr.msk.bf16.gmra.mrb[12].mxu1 %vm1204_vm1, %v4726_v53 }
  0x7d   : > { %4456 = vmatprep.mubr.msk.bf16.mxu1 %vm1204_vm1, %v4727_v56 }
  0x82   : > { %4329 = vmatmul.mubr.msk.bf16.gmra.mrb[16].mxu0 %vm1204_vm1, %v4664_v16  ;;  %v4739_v16 = vld [vmem:[%s5164_s12 + $0x2a0] sm:$0xff]  }
  0x83   : > { %4332 = vmatprep.mubr.msk.bf16.mxu0 %vm1204_vm1, %v4665_v17  ;;  %v4740_v17 = vld [vmem:[%s5164_s12 + $0x2a8] sm:$0xff]  }
  0x84   : > { %4457 = vmatmul.mubr.msk.bf16.gmra.mrb[16].mxu1 %vm1204_vm1, %v4728_v57 }
  0x85   : > { %4460 = vmatprep.mubr.msk.bf16.mxu1 %vm1204_vm1, %v4729_v60  ;;  %v4745_v60 = vld [vmem:[%s5164_s12 + $0x2d0] sm:$0xff]  }
  0x8a   : > { %4333 = vmatmul.mubr.msk.bf16.gmra.mrb[20].mxu0 %vm1204_vm1, %v4666_v18  ;;  %v4708_v18 = vld [vmem:[%s5164_s12 + $0x1a8] sm:$0xff]  }
  0x8b   : > { %4336 = vmatprep.mubr.msk.bf16.mxu0 %vm1204_vm1, %v4667_v19  ;;  %v4709_v19 = vld [vmem:[%s5164_s12 + $0x1b0] sm:$0xff]  }
  0x8c   : > { %4461 = vmatmul.mubr.msk.bf16.gmra.mrb[20].mxu1 %vm1204_vm1, %v4730_v61 }
  0x8d   : > { %4464 = vmatprep.mubr.msk.bf16.mxu1 %vm1204_vm1, %v4731_v0 }
  0x92   : > { %4337 = vmatmul.mubr.msk.bf16.gmra.mrb[24].mxu0 %vm1204_vm1, %v4668_v20  ;;  %v5323_v20 = vld [vmem:[#allocation5] ss:$0 sm:$0xff] }
  0x93   : > { %4340 = vmatprep.mubr.msk.bf16.mxu0 %vm1204_vm1, %v4669_v21  ;;  %v4741_v21 = vld [vmem:[%s5164_s12 + $0x2b0] sm:$0xff]  }
  0x94   : > { %4465 = vmatmul.mubr.msk.bf16.gmra.mrb[24].mxu1 %vm1204_vm1, %v4732_v1  ;;  %v4746_v1 = vld [vmem:[%s5164_s12 + $0x2d8] sm:$0xff]  }
  0x95   : > { %4468 = vmatprep.mubr.msk.bf16.mxu1 %vm1204_vm1, %v4733_v4  ;;  %v4714_v4 = vld [vmem:[%s5164_s12 + $0x1d8] sm:$0xff]  }
  0x9a   : > { %4341 = vmatmul.mubr.msk.bf16.gmra.mrb[28].mxu0 %vm1204_vm1, %v4670_v22 }
  0x9b   : > { %4344 = vmatprep.mubr.msk.bf16.mxu0 %vm1204_vm1, %v4671_v23  ;;  %v4742_v23 = vld [vmem:[%s5164_s12 + $0x2b8] sm:$0xff]  }
  0x9c   : > { %4469 = vmatmul.mubr.msk.bf16.gmra.mrb[28].mxu1 %vm1204_vm1, %v4734_v5 }
  0x9d   : > { %4472 = vmatprep.mubr.msk.bf16.mxu1 %vm1204_vm1, %v4735_v8 }
  0xa2   : > { %4345 = vmatmul.mubr.msk.bf16.gmra.mrb[32].mxu0 %vm1204_vm1, %v4672_v24 }
  0xa3   : > { %4348 = vmatprep.mubr.msk.bf16.mxu0 %vm1204_vm1, %v4673_v25 }
  0xa4   : > { %4473 = vmatmul.mubr.msk.bf16.gmra.mrb[32].mxu1 %vm1204_vm1, %v4736_v9 }
  0xa5   : > { %4476 = vmatprep.mubr.msk.bf16.mxu1 %vm1204_vm1, %v4737_v12 }
  0xaa   : > { %4349 = vmatmul.mubr.msk.bf16.gmra.mrb[36].mxu0 %vm1204_vm1, %v4674_v26  ;;  %v4710_v26 = vld [vmem:[%s5164_s12 + $0x1b8] sm:$0xff]  }
  0xab   : > { %4352 = vmatprep.mubr.msk.bf16.mxu0 %vm1204_vm1, %v4675_v27 }
  0xac   : > { %4477 = vmatmul.mubr.msk.bf16.gmra.mrb[36].mxu1 %vm1204_vm1, %v4738_v13 }
  0xad   : > { %4480 = vmatprep.mubr.msk.bf16.mxu1 %vm1204_vm1, %v4739_v16 }
  0xb2   : > { %4353 = vmatmul.mubr.msk.bf16.gmra.mrb[40].mxu0 %vm1204_vm1, %v4676_v28 }
  0xb3   : > { %4356 = vmatprep.mubr.msk.bf16.mxu0 %vm1204_vm1, %v4677_v29  ;;  %v4711_v29 = vld [vmem:[%s5164_s12 + $0x1c0] sm:$0xff]  }
  0xb4   : > { %4481 = vmatmul.mubr.msk.bf16.gmra.mrb[40].mxu1 %vm1204_vm1, %v4740_v17 }
  0xb5   : > { %4484 = vmatprep.mubr.msk.bf16.mxu1 %vm1204_vm1, %v4741_v21  ;;  %v4747_v21 = vld [vmem:[%s5164_s12 + $0x2e0] sm:$0xff]  }
  0xba   : > { %4357 = vmatmul.mubr.msk.bf16.gmra.mrb[44].mxu0 %vm1204_vm1, %v4678_v30 }
  0xbb   : > { %4360 = vmatprep.mubr.msk.bf16.mxu0 %vm1204_vm1, %v4679_v31 }
  0xbc   : > { %4485 = vmatmul.mubr.msk.bf16.gmra.mrb[44].mxu1 %vm1204_vm1, %v4742_v23 }
  0xc2   : > { %4361 = vmatmul.mubr.msk.bf16.gmra.mrb[48].mxu0 %vm1204_vm1, %v4680_v32 }
  0xc3   : > { %4364 = vmatprep.mubr.msk.bf16.mxu0 %vm1204_vm1, %v4681_v33 }
  0xca   : > { %4365 = vmatmul.mubr.msk.bf16.gmra.mrb[52].mxu0 %vm1204_vm1, %v4682_v34 }
  0xcb   : > { %4368 = vmatprep.mubr.msk.bf16.mxu0 %vm1204_vm1, %v4683_v35 }
  0xd2   : > { %4369 = vmatmul.mubr.msk.bf16.gmra.mrb[56].mxu0 %vm1204_vm1, %v4684_v36  ;;  %v4743_v36 = vld [vmem:[%s5164_s12 + $0x2c0] sm:$0xff]  }
  0xd3   : > { %4372 = vmatprep.mubr.msk.bf16.mxu0 %vm1204_vm1, %v4685_v37  ;;  %4488 = vmatprep.mubr.msk.bf16.mxu1 %vm1204_vm1, %v4743_v36 }
  0xd4   : > { %4489 = vmatmul.mubr.msk.bf16.gmra.mrb[48].mxu1 %vm1204_vm1, %v4744_v41 }
  0xd5   : > { %4492 = vmatprep.mubr.msk.bf16.mxu1 %vm1204_vm1, %v4745_v60 }
  0xda   : > { %4373 = vmatmul.mubr.msk.bf16.gmra.mrb[60].mxu0 %vm1204_vm1, %v4686_v38 }
  0xdb   : > { %4376 = vmatprep.mubr.msk.bf16.mxu0 %vm1204_vm1, %v4687_v39 }
  0xdc   : > { %4493 = vmatmul.mubr.msk.bf16.gmra.mrb[52].mxu1 %vm1204_vm1, %v4746_v1 }
  0xdd   : > { %4496 = vmatprep.mubr.msk.bf16.mxu1 %vm1204_vm1, %v4747_v21 }
  0xe2   : > { %4377 = vmatmul.mubr.msk.bf16.gmra.mrb[64].mxu0 %vm1204_vm1, %v4688_v42 }
  0xe3   : > { %4380 = vmatprep.mubr.msk.bf16.mxu0 %vm1204_vm1, %v4689_v43 }
  0xea   : > { %4381 = vmatmul.mubr.msk.bf16.gmra.mrb[68].mxu0 %vm1204_vm1, %v4690_v46 }
  0xeb   : > { %4384 = vmatprep.mubr.msk.bf16.mxu0 %vm1204_vm1, %v4691_v47 }
  0xf2   : > { %4385 = vmatmul.mubr.msk.bf16.gmra.mrb[72].mxu0 %vm1204_vm1, %v4692_v50  ;;  %v4713_v50 = vld [vmem:[%s5164_s12 + $0x1d0] sm:$0xff]  }
  0xf3   : > { %4388 = vmatprep.mubr.msk.bf16.mxu0 %vm1204_vm1, %v4693_v51 }
  0xfa   : > { %4389 = vmatmul.mubr.msk.bf16.gmra.mrb[76].mxu0 %vm1204_vm1, %v4694_v54 }
  0xfb   : > { %4392 = vmatprep.mubr.msk.bf16.mxu0 %vm1204_vm1, %v4695_v55 }
 0x102   : > { %4393 = vmatmul.mubr.msk.bf16.gmra.mrb[80].mxu0 %vm1204_vm1, %v4696_v58 }
 0x103   : > { %4396 = vmatprep.mubr.msk.bf16.mxu0 %vm1204_vm1, %v4697_v59 }
 0x10a   : > { %4397 = vmatmul.mubr.msk.bf16.gmra.mrb[84].mxu0 %vm1204_vm1, %v4698_v62 }
 0x10b   : > { %4400 = vmatprep.mubr.msk.bf16.mxu0 %vm1204_vm1, %v4699_v63 }
 0x112   : > { %4401 = vmatmul.mubr.msk.bf16.gmra.mrb[88].mxu0 %vm1204_vm1, %v4700_v2 }
 0x113   : > { %4404 = vmatprep.mubr.msk.bf16.mxu0 %vm1204_vm1, %v4701_v3 }
 0x11a   : > { %4405 = vmatmul.mubr.msk.bf16.gmra.mrb[92].mxu0 %vm1204_vm1, %v4702_v6 }
 0x11b   : > { %4408 = vmatprep.mubr.msk.bf16.mxu0 %vm1204_vm1, %v4703_v7 }
 0x122   : > { %4409 = vmatmul.mubr.msk.bf16.gmra.mrb[96].mxu0 %vm1204_vm1, %v4704_v10  ;;  %v4715_v10 = vld [vmem:[%s5164_s12 + $0x1e0] sm:$0xff]  }
 0x123   : > { %4412 = vmatprep.mubr.msk.bf16.mxu0 %vm1204_vm1, %v4705_v11 }
 0x12a   : > { %4413 = vmatmul.mubr.msk.bf16.gmra.mrb[100].mxu0 %vm1204_vm1, %v4706_v14 }
 0x12b   : > { %4416 = vmatprep.mubr.msk.bf16.mxu0 %vm1204_vm1, %v4707_v15 }
 0x132   : > { %4417 = vmatmul.mubr.msk.bf16.gmra.mrb[104].mxu0 %vm1204_vm1, %v4708_v18 }
 0x133   : > { %4420 = vmatprep.mubr.msk.bf16.mxu0 %vm1204_vm1, %v4709_v19 }
 0x135   : > { %v4314_v22 = vpop.f32.mrb[0].mxu0 }
 0x136   : > { %v1638_v24 = vadd.f32 %v4314_v22, %v5323_v20  ;;  %v1629_v25 = vpop.f32.mrb[1].mxu0 }
 0x137   : > { %v1630_v27 = vadd.f32 %v5323_v20, %v1629_v25  ;;  %v4315_v28 = vpop.f32.mrb[2].mxu0 }
 0x138   : > { %3439 = vst [vmem:[%s5334_s15 + $0x10] sm:$0xff] %v1638_v24  ;;  %v1641_v30 = vadd.f32 %v4315_v28, %v5323_v20  ;;  %v1632_v31 = vpop.f32.mrb[3].mxu0  ;;  %v2917_v37 = vmul.f32 %v1638_v24, %v1638_v24 }
 0x139   : > { %3437 = vst [vmem:[%s5334_s15] sm:$0xff] %v1630_v27  ;;  %v1633_v32 = vadd.f32 %v5323_v20, %v1632_v31  ;;  %v2915_v33 = vmul.f32 %v1630_v27, %v1630_v27 }
 0x13a   : > { %3440 = vst [vmem:[%s5334_s15 + $0x18] sm:$0xff] %v1641_v30  ;;  %4421 = vmatmul.mubr.msk.bf16.gmra.mrb[108].mxu0 %vm1204_vm1, %v4710_v26  ;;  %v2918_v45 = vmul.f32 %v1641_v30, %v1641_v30  ;;  %v4748_v26 = vld [vmem:[%s5164_s12 + $0x2e8] sm:$0xff]  }
 0x13b   : > { %v2654_v34 = vadd.f32 %v1633_v32, %v1630_v27  ;;  %v2916_v35 = vmul.f32 %v1633_v32, %v1633_v32  ;;  %3438 = vst [vmem:[%s5334_s15 + $0x8] sm:$0xff] %v1633_v32  ;;  %4424 = vmatprep.mubr.msk.bf16.mxu0 %vm1204_vm1, %v4711_v29  ;;  %v4716_v29 = vld [vmem:[%s5164_s12 + $0x1e8] sm:$0xff]   ;;  %4497 = vmatmul.mubr.msk.bf16.gmra.mrb[56].mxu1 %vm1204_vm1, %v4748_v26 }
 0x13d   : > { %v2655_v38 = vadd.f32 %v2654_v34, %v1638_v24  ;;  %v3171_v39 = vadd.f32 %v2916_v35, %v2915_v33  ;;  %v4318_v40 = vpop.f32.mrb[4].mxu0  ;;  %v4717_v35 = vld [vmem:[%s5164_s12 + $0x1f0] sm:$0xff]  }
 0x13e   : > { %v1654_v42 = vadd.f32 %v4318_v40, %v5323_v20  ;;  %v1645_v43 = vpop.f32.mrb[5].mxu0 }
 0x13f   : > { %v2656_v46 = vadd.f32 %v2655_v38, %v1641_v30  ;;  %v3172_v47 = vadd.f32 %v3171_v39, %v2917_v37  ;;  %v1646_v48 = vadd.f32 %v5323_v20, %v1645_v43  ;;  %v4319_v49 = vpop.f32.mrb[6].mxu0 }
 0x140   : > { %3443 = vst [vmem:[%s5334_s15 + $0x30] sm:$0xff] %v1654_v42  ;;  %v1657_v51 = vadd.f32 %v4319_v49, %v5323_v20  ;;  %v1648_v52 = vpop.f32.mrb[7].mxu0  ;;  %v2921_v61 = vmul.f32 %v1654_v42, %v1654_v42 }
 0x141   : > { %v3173_v53 = vadd.f32 %v3172_v47, %v2918_v45  ;;  %v2657_v54 = vadd.f32 %v2656_v46, %v1646_v48  ;;  %v2919_v55 = vmul.f32 %v1646_v48, %v1646_v48  ;;  %3441 = vst [vmem:[%s5334_s15 + $0x20] sm:$0xff] %v1646_v48  ;;  %v1649_v56 = vadd.f32 %v5323_v20, %v1648_v52  ;;  %v4749_v45 = vld [vmem:[%s5164_s12 + $0x2f0] sm:$0xff]  }
 0x142   : > { %3444 = vst [vmem:[%s5334_s15 + $0x38] sm:$0xff] %v1657_v51  ;;  %4425 = vmatmul.mubr.msk.bf16.gmra.mrb[112].mxu0 %vm1204_vm1, %v4712_v44  ;;  %v2922_v5 = vmul.f32 %v1657_v51, %v1657_v51  ;;  %4500 = vmatprep.mubr.msk.bf16.mxu1 %vm1204_vm1, %v4749_v45 }
 0x143   : > { %v3174_v57 = vadd.f32 %v3173_v53, %v2919_v55  ;;  %v2658_v58 = vadd.f32 %v2657_v54, %v1649_v56  ;;  %v2920_v59 = vmul.f32 %v1649_v56, %v1649_v56  ;;  %3442 = vst [vmem:[%s5334_s15 + $0x28] sm:$0xff] %v1649_v56  ;;  %4428 = vmatprep.mubr.msk.bf16.mxu0 %vm1204_vm1, %v4713_v50  ;;  %v4750_v50 = vld [vmem:[%s5164_s12 + $0x2f8] sm:$0xff]  }
 0x144   : > { %v4718_v53 = vld [vmem:[%s5164_s12 + $0x1f8] sm:$0xff]   ;;  %4501 = vmatmul.mubr.msk.bf16.gmra.mrb[60].mxu1 %vm1204_vm1, %v4750_v50 }
 0x145   : > { %v2659_v62 = vadd.f32 %v2658_v58, %v1654_v42  ;;  %v3175_v63 = vadd.f32 %v3174_v57, %v2920_v59  ;;  %v4322_v0 = vpop.f32.mrb[8].mxu0 }
 0x146   : > { %v1670_v2 = vadd.f32 %v4322_v0, %v5323_v20  ;;  %v1661_v3 = vpop.f32.mrb[9].mxu0 }
 0x147   : > { %v2660_v6 = vadd.f32 %v2659_v62, %v1657_v51  ;;  %v3176_v7 = vadd.f32 %v3175_v63, %v2921_v61  ;;  %v1662_v8 = vadd.f32 %v5323_v20, %v1661_v3  ;;  %v4323_v9 = vpop.f32.mrb[10].mxu0 }
 0x148   : > { %3447 = vst [vmem:[%s5334_s15 + $0x50] sm:$0xff] %v1670_v2  ;;  %v1673_v11 = vadd.f32 %v4323_v9, %v5323_v20  ;;  %v1664_v12 = vpop.f32.mrb[11].mxu0  ;;  %v2925_v22 = vmul.f32 %v1670_v2, %v1670_v2  ;;  %v4752_v9 = vld [vmem:[%s5164_s12 + $0x308] sm:$0xff]  }
 0x149   : > { %v3177_v13 = vadd.f32 %v3176_v7, %v2922_v5  ;;  %v2661_v14 = vadd.f32 %v2660_v6, %v1662_v8  ;;  %v2923_v15 = vmul.f32 %v1662_v8, %v1662_v8  ;;  %3445 = vst [vmem:[%s5334_s15 + $0x40] sm:$0xff] %v1662_v8  ;;  %v1665_v16 = vadd.f32 %v5323_v20, %v1664_v12 }
 0x14a   : > { %3448 = vst [vmem:[%s5334_s15 + $0x58] sm:$0xff] %v1673_v11  ;;  %4429 = vmatmul.mubr.msk.bf16.gmra.mrb[116].mxu0 %vm1204_vm1, %v4714_v4  ;;  %v2926_v30 = vmul.f32 %v1673_v11, %v1673_v11  ;;  %v4751_v4 = vld [vmem:[%s5164_s12 + $0x300] sm:$0xff]  }
 0x14b   : > { %v3178_v17 = vadd.f32 %v3177_v13, %v2923_v15  ;;  %v2662_v18 = vadd.f32 %v2661_v14, %v1665_v16  ;;  %v2924_v19 = vmul.f32 %v1665_v16, %v1665_v16  ;;  %3446 = vst [vmem:[%s5334_s15 + $0x48] sm:$0xff] %v1665_v16  ;;  %4432 = vmatprep.mubr.msk.bf16.mxu0 %vm1204_vm1, %v4715_v10 }
 0x14c   : > { %4504 = vmatprep.mubr.msk.bf16.mxu1 %vm1204_vm1, %v4751_v4 }
 0x14d   : > { %v2663_v23 = vadd.f32 %v2662_v18, %v1670_v2  ;;  %v3179_v24 = vadd.f32 %v3178_v17, %v2924_v19  ;;  %v4326_v25 = vpop.f32.mrb[12].mxu0  ;;  %4505 = vmatmul.mubr.msk.bf16.gmra.mrb[64].mxu1 %vm1204_vm1, %v4752_v9 }
 0x14e   : > { %v1686_v27 = vadd.f32 %v4326_v25, %v5323_v20  ;;  %v1677_v28 = vpop.f32.mrb[13].mxu0 }
 0x14f   : > { %v2664_v31 = vadd.f32 %v2663_v23, %v1673_v11  ;;  %v3180_v32 = vadd.f32 %v3179_v24, %v2925_v22  ;;  %v1678_v33 = vadd.f32 %v5323_v20, %v1677_v28  ;;  %v4327_v34 = vpop.f32.mrb[14].mxu0 }
 0x150   : > { %3451 = vst [vmem:[%s5334_s15 + $0x70] sm:$0xff] %v1686_v27  ;;  %v1689_v36 = vadd.f32 %v4327_v34, %v5323_v20  ;;  %v1680_v37 = vpop.f32.mrb[15].mxu0  ;;  %v2929_v46 = vmul.f32 %v1686_v27, %v1686_v27 }
 0x151   : > { %v3181_v38 = vadd.f32 %v3180_v32, %v2926_v30  ;;  %v2665_v39 = vadd.f32 %v2664_v31, %v1678_v33  ;;  %v2927_v40 = vmul.f32 %v1678_v33, %v1678_v33  ;;  %3449 = vst [vmem:[%s5334_s15 + $0x60] sm:$0xff] %v1678_v33  ;;  %v1681_v41 = vadd.f32 %v5323_v20, %v1680_v37  ;;  %v4754_v32 = vld [vmem:[%s5164_s12 + $0x318] sm:$0xff]  }
 0x152   : > { %3452 = vst [vmem:[%s5334_s15 + $0x78] sm:$0xff] %v1689_v36  ;;  %4433 = vmatmul.mubr.msk.bf16.gmra.mrb[120].mxu0 %vm1204_vm1, %v4716_v29  ;;  %v2930_v54 = vmul.f32 %v1689_v36, %v1689_v36 }
 0x153   : > { %v3182_v42 = vadd.f32 %v3181_v38, %v2927_v40  ;;  %v2666_v43 = vadd.f32 %v2665_v39, %v1681_v41  ;;  %v2928_v44 = vmul.f32 %v1681_v41, %v1681_v41  ;;  %3450 = vst [vmem:[%s5334_s15 + $0x68] sm:$0xff] %v1681_v41  ;;  %4436 = vmatprep.mubr.msk.bf16.mxu0 %vm1204_vm1, %v4717_v35 }
 0x155   : > { %v2667_v47 = vadd.f32 %v2666_v43, %v1686_v27  ;;  %v3183_v48 = vadd.f32 %v3182_v42, %v2928_v44  ;;  %v4330_v49 = vpop.f32.mrb[16].mxu0  ;;  %v4753_v27 = vld [vmem:[%s5164_s12 + $0x310] sm:$0xff]  }
 0x156   : > { %v1702_v51 = vadd.f32 %v4330_v49, %v5323_v20  ;;  %v1693_v52 = vpop.f32.mrb[17].mxu0  ;;  %4508 = vmatprep.mubr.msk.bf16.mxu1 %vm1204_vm1, %v4753_v27  ;;  %v4755_v49 = vld [vmem:[%s5164_s12 + $0x320] sm:$0xff]  }
 0x157   : > { %v2668_v55 = vadd.f32 %v2667_v47, %v1689_v36  ;;  %v3184_v56 = vadd.f32 %v3183_v48, %v2929_v46  ;;  %v1694_v57 = vadd.f32 %v5323_v20, %v1693_v52  ;;  %v4331_v58 = vpop.f32.mrb[18].mxu0  ;;  %4509 = vmatmul.mubr.msk.bf16.gmra.mrb[68].mxu1 %vm1204_vm1, %v4754_v32 }
 0x158   : > { %3455 = vst [vmem:[%s5334_s15 + $0x90] sm:$0xff] %v1702_v51  ;;  %v1705_v59 = vadd.f32 %v4331_v58, %v5323_v20  ;;  %v1696_v60 = vpop.f32.mrb[19].mxu0  ;;  %v2933_v5 = vmul.f32 %v1702_v51, %v1702_v51  ;;  %4512 = vmatprep.mubr.msk.bf16.mxu1 %vm1204_vm1, %v4755_v49 }
 0x159   : > { %v3185_v61 = vadd.f32 %v3184_v56, %v2930_v54  ;;  %v2669_v62 = vadd.f32 %v2668_v55, %v1694_v57  ;;  %v2931_v63 = vmul.f32 %v1694_v57, %v1694_v57  ;;  %3453 = vst [vmem:[%s5334_s15 + $0x80] sm:$0xff] %v1694_v57  ;;  %v1697_v0 = vadd.f32 %v5323_v20, %v1696_v60  ;;  %v4756_v54 = vld [vmem:[%s5164_s12 + $0x328] sm:$0xff]  }
 0x15a   : > { %3456 = vst [vmem:[%s5334_s15 + $0x98] sm:$0xff] %v1705_v59  ;;  %4437 = vmatmul.mubr.msk.bf16.gmra.mrb[124].mxu0 %vm1204_vm1, %v4718_v53  ;;  %v2934_v12 = vmul.f32 %v1705_v59, %v1705_v59 }
 0x15b   : > { %v3186_v1 = vadd.f32 %v3185_v61, %v2931_v63  ;;  %v2670_v2 = vadd.f32 %v2669_v62, %v1697_v0  ;;  %v2932_v3 = vmul.f32 %v1697_v0, %v1697_v0  ;;  %3454 = vst [vmem:[%s5334_s15 + $0x88] sm:$0xff] %v1697_v0 }
 0x15d   : > { %v2671_v6 = vadd.f32 %v2670_v2, %v1702_v51  ;;  %v3187_v7 = vadd.f32 %v3186_v1, %v2932_v3  ;;  %v4334_v8 = vpop.f32.mrb[20].mxu0 }
 0x15e   : > { %v1718_v10 = vadd.f32 %v4334_v8, %v5323_v20  ;;  %v1709_v11 = vpop.f32.mrb[21].mxu0 }
 0x15f   : > { %v2672_v13 = vadd.f32 %v2671_v6, %v1705_v59  ;;  %v3188_v14 = vadd.f32 %v3187_v7, %v2933_v5  ;;  %v1710_v15 = vadd.f32 %v5323_v20, %v1709_v11  ;;  %v4335_v16 = vpop.f32.mrb[22].mxu0  ;;  %4513 = vmatmul.mubr.msk.bf16.gmra.mrb[72].mxu1 %vm1204_vm1, %v4756_v54  ;;  %v4757_v7 = vld [vmem:[%s5164_s12 + $0x330] sm:$0xff]  }
 0x160   : > { %3459 = vst [vmem:[%s5334_s15 + $0xb0] sm:$0xff] %v1718_v10  ;;  %v1721_v17 = vadd.f32 %v4335_v16, %v5323_v20  ;;  %v1712_v18 = vpop.f32.mrb[23].mxu0  ;;  %v2937_v28 = vmul.f32 %v1718_v10, %v1718_v10  ;;  %4516 = vmatprep.mubr.msk.bf16.mxu1 %vm1204_vm1, %v4757_v7 }
 0x161   : > { %v3189_v19 = vadd.f32 %v3188_v14, %v2934_v12  ;;  %v2673_v21 = vadd.f32 %v2672_v13, %v1710_v15  ;;  %v2935_v22 = vmul.f32 %v1710_v15, %v1710_v15  ;;  %3457 = vst [vmem:[%s5334_s15 + $0xa0] sm:$0xff] %v1710_v15  ;;  %v1713_v23 = vadd.f32 %v5323_v20, %v1712_v18  ;;  %v4758_v12 = vld [vmem:[%s5164_s12 + $0x338] sm:$0xff]  }
 0x162   : > { %3460 = vst [vmem:[%s5334_s15 + $0xb8] sm:$0xff] %v1721_v17  ;;  %v2938_v35 = vmul.f32 %v1721_v17, %v1721_v17 }
 0x163   : > { %v3190_v24 = vadd.f32 %v3189_v19, %v2935_v22  ;;  %v2674_v25 = vadd.f32 %v2673_v21, %v1713_v23  ;;  %v2936_v26 = vmul.f32 %v1713_v23, %v1713_v23  ;;  %3458 = vst [vmem:[%s5334_s15 + $0xa8] sm:$0xff] %v1713_v23 }
 0x165   : > { %v2675_v29 = vadd.f32 %v2674_v25, %v1718_v10  ;;  %v3191_v30 = vadd.f32 %v3190_v24, %v2936_v26  ;;  %v4338_v31 = vpop.f32.mrb[24].mxu0 }
 0x166   : > { %v1734_v33 = vadd.f32 %v4338_v31, %v5323_v20  ;;  %v1725_v34 = vpop.f32.mrb[25].mxu0 }
 0x167   : > { %v2676_v36 = vadd.f32 %v2675_v29, %v1721_v17  ;;  %v3192_v37 = vadd.f32 %v3191_v30, %v2937_v28  ;;  %v1726_v38 = vadd.f32 %v5323_v20, %v1725_v34  ;;  %v4339_v39 = vpop.f32.mrb[26].mxu0  ;;  %4517 = vmatmul.mubr.msk.bf16.gmra.mrb[76].mxu1 %vm1204_vm1, %v4758_v12  ;;  %v4759_v30 = vld [vmem:[%s5164_s12 + $0x340] sm:$0xff]  }
 0x168   : > { %3463 = vst [vmem:[%s5334_s15 + $0xd0] sm:$0xff] %v1734_v33  ;;  %v1737_v40 = vadd.f32 %v4339_v39, %v5323_v20  ;;  %v1728_v41 = vpop.f32.mrb[27].mxu0  ;;  %v2941_v50 = vmul.f32 %v1734_v33, %v1734_v33  ;;  %4520 = vmatprep.mubr.msk.bf16.mxu1 %vm1204_vm1, %v4759_v30 }
 0x169   : > { %v3193_v42 = vadd.f32 %v3192_v37, %v2938_v35  ;;  %v2677_v43 = vadd.f32 %v2676_v36, %v1726_v38  ;;  %v2939_v44 = vmul.f32 %v1726_v38, %v1726_v38  ;;  %3461 = vst [vmem:[%s5334_s15 + $0xc0] sm:$0xff] %v1726_v38  ;;  %v1729_v45 = vadd.f32 %v5323_v20, %v1728_v41  ;;  %v4760_v35 = vld [vmem:[%s5164_s12 + $0x348] sm:$0xff]  }
 0x16a   : > { %3464 = vst [vmem:[%s5334_s15 + $0xd8] sm:$0xff] %v1737_v40  ;;  %v2942_v57 = vmul.f32 %v1737_v40, %v1737_v40 }
 0x16b   : > { %v3194_v46 = vadd.f32 %v3193_v42, %v2939_v44  ;;  %v2678_v47 = vadd.f32 %v2677_v43, %v1729_v45  ;;  %v2940_v48 = vmul.f32 %v1729_v45, %v1729_v45  ;;  %3462 = vst [vmem:[%s5334_s15 + $0xc8] sm:$0xff] %v1729_v45 }
 0x16d   : > { %v2679_v51 = vadd.f32 %v2678_v47, %v1734_v33  ;;  %v3195_v52 = vadd.f32 %v3194_v46, %v2940_v48  ;;  %v4342_v53 = vpop.f32.mrb[28].mxu0 }
 0x16e   : > { %v1750_v55 = vadd.f32 %v4342_v53, %v5323_v20  ;;  %v1741_v56 = vpop.f32.mrb[29].mxu0 }
 0x16f   : > { %v2680_v58 = vadd.f32 %v2679_v51, %v1737_v40  ;;  %v3196_v59 = vadd.f32 %v3195_v52, %v2941_v50  ;;  %v1742_v60 = vadd.f32 %v5323_v20, %v1741_v56  ;;  %v4343_v61 = vpop.f32.mrb[30].mxu0  ;;  %4521 = vmatmul.mubr.msk.bf16.gmra.mrb[80].mxu1 %vm1204_vm1, %v4760_v35  ;;  %v4761_v52 = vld [vmem:[%s5164_s12 + $0x350] sm:$0xff]  }
 0x170   : > { %3467 = vst [vmem:[%s5334_s15 + $0xf0] sm:$0xff] %v1750_v55  ;;  %v1753_v62 = vadd.f32 %v4343_v61, %v5323_v20  ;;  %v1744_v63 = vpop.f32.mrb[31].mxu0  ;;  %v2945_v8 = vmul.f32 %v1750_v55, %v1750_v55  ;;  %4524 = vmatprep.mubr.msk.bf16.mxu1 %vm1204_vm1, %v4761_v52 }
 0x171   : > { %v3197_v0 = vadd.f32 %v3196_v59, %v2942_v57  ;;  %v2681_v1 = vadd.f32 %v2680_v58, %v1742_v60  ;;  %v2943_v2 = vmul.f32 %v1742_v60, %v1742_v60  ;;  %3465 = vst [vmem:[%s5334_s15 + $0xe0] sm:$0xff] %v1742_v60  ;;  %v1745_v3 = vadd.f32 %v5323_v20, %v1744_v63  ;;  %v4762_v57 = vld [vmem:[%s5164_s12 + $0x358] sm:$0xff]  }
 0x172   : > { %3468 = vst [vmem:[%s5334_s15 + $0xf8] sm:$0xff] %v1753_v62  ;;  %v2946_v15 = vmul.f32 %v1753_v62, %v1753_v62 }
 0x173   : > { %v3198_v4 = vadd.f32 %v3197_v0, %v2943_v2  ;;  %v2682_v5 = vadd.f32 %v2681_v1, %v1745_v3  ;;  %v2944_v6 = vmul.f32 %v1745_v3, %v1745_v3  ;;  %3466 = vst [vmem:[%s5334_s15 + $0xe8] sm:$0xff] %v1745_v3 }
 0x175   : > { %v2683_v9 = vadd.f32 %v2682_v5, %v1750_v55  ;;  %v3199_v10 = vadd.f32 %v3198_v4, %v2944_v6  ;;  %v4346_v11 = vpop.f32.mrb[32].mxu0 }
 0x176   : > { %v1766_v13 = vadd.f32 %v4346_v11, %v5323_v20  ;;  %v1757_v14 = vpop.f32.mrb[33].mxu0 }
 0x177   : > { %v2684_v16 = vadd.f32 %v2683_v9, %v1753_v62  ;;  %v3200_v17 = vadd.f32 %v3199_v10, %v2945_v8  ;;  %v1758_v18 = vadd.f32 %v5323_v20, %v1757_v14  ;;  %v4347_v19 = vpop.f32.mrb[34].mxu0  ;;  %4525 = vmatmul.mubr.msk.bf16.gmra.mrb[84].mxu1 %vm1204_vm1, %v4762_v57  ;;  %v4763_v10 = vld [vmem:[%s5164_s12 + $0x360] sm:$0xff]  }
 0x178   : > { %3471 = vst [vmem:[%s5334_s15 + $0x110] sm:$0xff] %v1766_v13  ;;  %v1769_v21 = vadd.f32 %v4347_v19, %v5323_v20  ;;  %v1760_v22 = vpop.f32.mrb[35].mxu0  ;;  %v2949_v31 = vmul.f32 %v1766_v13, %v1766_v13  ;;  %4528 = vmatprep.mubr.msk.bf16.mxu1 %vm1204_vm1, %v4763_v10 }
 0x179   : > { %v3201_v23 = vadd.f32 %v3200_v17, %v2946_v15  ;;  %v2685_v24 = vadd.f32 %v2684_v16, %v1758_v18  ;;  %v2947_v25 = vmul.f32 %v1758_v18, %v1758_v18  ;;  %3469 = vst [vmem:[%s5334_s15 + $0x100] sm:$0xff] %v1758_v18  ;;  %v1761_v26 = vadd.f32 %v5323_v20, %v1760_v22  ;;  %v4764_v15 = vld [vmem:[%s5164_s12 + $0x368] sm:$0xff]  }
 0x17a   : > { %3472 = vst [vmem:[%s5334_s15 + $0x118] sm:$0xff] %v1769_v21  ;;  %v2950_v38 = vmul.f32 %v1769_v21, %v1769_v21 }
 0x17b   : > { %v3202_v27 = vadd.f32 %v3201_v23, %v2947_v25  ;;  %v2686_v28 = vadd.f32 %v2685_v24, %v1761_v26  ;;  %v2948_v29 = vmul.f32 %v1761_v26, %v1761_v26  ;;  %3470 = vst [vmem:[%s5334_s15 + $0x108] sm:$0xff] %v1761_v26 }
 0x17d   : > { %v2687_v32 = vadd.f32 %v2686_v28, %v1766_v13  ;;  %v3203_v33 = vadd.f32 %v3202_v27, %v2948_v29  ;;  %v4350_v34 = vpop.f32.mrb[36].mxu0 }
 0x17e   : > { %v1782_v36 = vadd.f32 %v4350_v34, %v5323_v20  ;;  %v1773_v37 = vpop.f32.mrb[37].mxu0 }
 0x17f   : > { %v2688_v39 = vadd.f32 %v2687_v32, %v1769_v21  ;;  %v3204_v40 = vadd.f32 %v3203_v33, %v2949_v31  ;;  %v1774_v41 = vadd.f32 %v5323_v20, %v1773_v37  ;;  %v4351_v42 = vpop.f32.mrb[38].mxu0  ;;  %4529 = vmatmul.mubr.msk.bf16.gmra.mrb[88].mxu1 %vm1204_vm1, %v4764_v15  ;;  %v4765_v33 = vld [vmem:[%s5164_s12 + $0x370] sm:$0xff]  }
 0x180   : > { %3475 = vst [vmem:[%s5334_s15 + $0x130] sm:$0xff] %v1782_v36  ;;  %v1785_v43 = vadd.f32 %v4351_v42, %v5323_v20  ;;  %v1776_v44 = vpop.f32.mrb[39].mxu0  ;;  %v2953_v53 = vmul.f32 %v1782_v36, %v1782_v36  ;;  %4532 = vmatprep.mubr.msk.bf16.mxu1 %vm1204_vm1, %v4765_v33 }
 0x181   : > { %v3205_v45 = vadd.f32 %v3204_v40, %v2950_v38  ;;  %v2689_v46 = vadd.f32 %v2688_v39, %v1774_v41  ;;  %v2951_v47 = vmul.f32 %v1774_v41, %v1774_v41  ;;  %3473 = vst [vmem:[%s5334_s15 + $0x120] sm:$0xff] %v1774_v41  ;;  %v1777_v48 = vadd.f32 %v5323_v20, %v1776_v44  ;;  %v4766_v38 = vld [vmem:[%s5164_s12 + $0x378] sm:$0xff]  }
 0x182   : > { %3476 = vst [vmem:[%s5334_s15 + $0x138] sm:$0xff] %v1785_v43  ;;  %v2954_v60 = vmul.f32 %v1785_v43, %v1785_v43 }
 0x183   : > { %v3206_v49 = vadd.f32 %v3205_v45, %v2951_v47  ;;  %v2690_v50 = vadd.f32 %v2689_v46, %v1777_v48  ;;  %v2952_v51 = vmul.f32 %v1777_v48, %v1777_v48  ;;  %3474 = vst [vmem:[%s5334_s15 + $0x128] sm:$0xff] %v1777_v48 }
 0x185   : > { %v2691_v54 = vadd.f32 %v2690_v50, %v1782_v36  ;;  %v3207_v55 = vadd.f32 %v3206_v49, %v2952_v51  ;;  %v4354_v56 = vpop.f32.mrb[40].mxu0 }
 0x186   : > { %v1798_v58 = vadd.f32 %v4354_v56, %v5323_v20  ;;  %v1789_v59 = vpop.f32.mrb[41].mxu0 }
 0x187   : > { %v2692_v61 = vadd.f32 %v2691_v54, %v1785_v43  ;;  %v3208_v62 = vadd.f32 %v3207_v55, %v2953_v53  ;;  %v1790_v63 = vadd.f32 %v5323_v20, %v1789_v59  ;;  %v4355_v0 = vpop.f32.mrb[42].mxu0  ;;  %4533 = vmatmul.mubr.msk.bf16.gmra.mrb[92].mxu1 %vm1204_vm1, %v4766_v38  ;;  %v4767_v55 = vld [vmem:[%s5164_s12 + $0x380] sm:$0xff]  }
 0x188   : > { %3479 = vst [vmem:[%s5334_s15 + $0x150] sm:$0xff] %v1798_v58  ;;  %v1801_v1 = vadd.f32 %v4355_v0, %v5323_v20  ;;  %v1792_v2 = vpop.f32.mrb[43].mxu0  ;;  %v2957_v11 = vmul.f32 %v1798_v58, %v1798_v58  ;;  %4536 = vmatprep.mubr.msk.bf16.mxu1 %vm1204_vm1, %v4767_v55  ;;  %v4442_v55 = vpop.f32.mrb[0].mxu1 }
 0x189   : > { %v3209_v3 = vadd.f32 %v3208_v62, %v2954_v60  ;;  %v2693_v4 = vadd.f32 %v2692_v61, %v1790_v63  ;;  %v2955_v5 = vmul.f32 %v1790_v63, %v1790_v63  ;;  %3477 = vst [vmem:[%s5334_s15 + $0x140] sm:$0xff] %v1790_v63  ;;  %v1793_v6 = vadd.f32 %v5323_v20, %v1792_v2  ;;  %v4768_v60 = vld [vmem:[%s5164_s12 + $0x388] sm:$0xff]  }
 0x18a   : > { %3480 = vst [vmem:[%s5334_s15 + $0x158] sm:$0xff] %v1801_v1  ;;  %v2958_v18 = vmul.f32 %v1801_v1, %v1801_v1 }
 0x18b   : > { %v3210_v7 = vadd.f32 %v3209_v3, %v2955_v5  ;;  %v2694_v8 = vadd.f32 %v2693_v4, %v1793_v6  ;;  %v2956_v9 = vmul.f32 %v1793_v6, %v1793_v6  ;;  %3478 = vst [vmem:[%s5334_s15 + $0x148] sm:$0xff] %v1793_v6 }
 0x18d   : > { %v2695_v12 = vadd.f32 %v2694_v8, %v1798_v58  ;;  %v3211_v13 = vadd.f32 %v3210_v7, %v2956_v9  ;;  %v4358_v14 = vpop.f32.mrb[44].mxu0 }
 0x18e   : > { %v1814_v16 = vadd.f32 %v4358_v14, %v5323_v20  ;;  %v1805_v17 = vpop.f32.mrb[45].mxu0 }
 0x18f   : > { %v2696_v19 = vadd.f32 %v2695_v12, %v1801_v1  ;;  %v3212_v21 = vadd.f32 %v3211_v13, %v2957_v11  ;;  %v1806_v22 = vadd.f32 %v5323_v20, %v1805_v17  ;;  %v4359_v23 = vpop.f32.mrb[46].mxu0  ;;  %4537 = vmatmul.mubr.msk.bf16.gmra.mrb[96].mxu1 %vm1204_vm1, %v4768_v60  ;;  %v4769_v13 = vld [vmem:[%s5164_s12 + $0x390] sm:$0xff]  }
 0x190   : > { %3483 = vst [vmem:[%s5334_s15 + $0x170] sm:$0xff] %v1814_v16  ;;  %v1817_v24 = vadd.f32 %v4359_v23, %v5323_v20  ;;  %v1808_v25 = vpop.f32.mrb[47].mxu0  ;;  %v2961_v34 = vmul.f32 %v1814_v16, %v1814_v16  ;;  %4540 = vmatprep.mubr.msk.bf16.mxu1 %vm1204_vm1, %v4769_v13 }
 0x191   : > { %v3213_v26 = vadd.f32 %v3212_v21, %v2958_v18  ;;  %v2697_v27 = vadd.f32 %v2696_v19, %v1806_v22  ;;  %v2959_v28 = vmul.f32 %v1806_v22, %v1806_v22  ;;  %3481 = vst [vmem:[%s5334_s15 + $0x160] sm:$0xff] %v1806_v22  ;;  %v1809_v29 = vadd.f32 %v5323_v20, %v1808_v25  ;;  %v4770_v18 = vld [vmem:[%s5164_s12 + $0x398] sm:$0xff]  }
 0x192   : > { %3484 = vst [vmem:[%s5334_s15 + $0x178] sm:$0xff] %v1817_v24  ;;  %v2962_v41 = vmul.f32 %v1817_v24, %v1817_v24 }
 0x193   : > { %v3214_v30 = vadd.f32 %v3213_v26, %v2959_v28  ;;  %v2698_v31 = vadd.f32 %v2697_v27, %v1809_v29  ;;  %v2960_v32 = vmul.f32 %v1809_v29, %v1809_v29  ;;  %3482 = vst [vmem:[%s5334_s15 + $0x168] sm:$0xff] %v1809_v29 }
 0x195   : > { %v2699_v35 = vadd.f32 %v2698_v31, %v1814_v16  ;;  %v3215_v36 = vadd.f32 %v3214_v30, %v2960_v32  ;;  %v4362_v37 = vpop.f32.mrb[48].mxu0 }
 0x196   : > { %v1830_v39 = vadd.f32 %v4362_v37, %v5323_v20  ;;  %v1821_v40 = vpop.f32.mrb[49].mxu0 }
 0x197   : > { %v2700_v42 = vadd.f32 %v2699_v35, %v1817_v24  ;;  %v3216_v43 = vadd.f32 %v3215_v36, %v2961_v34  ;;  %v1822_v44 = vadd.f32 %v5323_v20, %v1821_v40  ;;  %v4363_v45 = vpop.f32.mrb[50].mxu0  ;;  %4541 = vmatmul.mubr.msk.bf16.gmra.mrb[100].mxu1 %vm1204_vm1, %v4770_v18  ;;  %v4771_v36 = vld [vmem:[%s5164_s12 + $0x3a0] sm:$0xff]  }
 0x198   : > { %3487 = vst [vmem:[%s5334_s15 + $0x190] sm:$0xff] %v1830_v39  ;;  %v1833_v46 = vadd.f32 %v4363_v45, %v5323_v20  ;;  %v1824_v47 = vpop.f32.mrb[51].mxu0  ;;  %v2965_v56 = vmul.f32 %v1830_v39, %v1830_v39  ;;  %4544 = vmatprep.mubr.msk.bf16.mxu1 %vm1204_vm1, %v4771_v36 }
 0x199   : > { %v3217_v48 = vadd.f32 %v3216_v43, %v2962_v41  ;;  %v2701_v49 = vadd.f32 %v2700_v42, %v1822_v44  ;;  %v2963_v50 = vmul.f32 %v1822_v44, %v1822_v44  ;;  %3485 = vst [vmem:[%s5334_s15 + $0x180] sm:$0xff] %v1822_v44  ;;  %v1825_v51 = vadd.f32 %v5323_v20, %v1824_v47  ;;  %v4772_v41 = vld [vmem:[%s5164_s12 + $0x3a8] sm:$0xff]  }
 0x19a   : > { %3488 = vst [vmem:[%s5334_s15 + $0x198] sm:$0xff] %v1833_v46  ;;  %v2966_v63 = vmul.f32 %v1833_v46, %v1833_v46 }
 0x19b   : > { %v3218_v52 = vadd.f32 %v3217_v48, %v2963_v50  ;;  %v2702_v53 = vadd.f32 %v2701_v49, %v1825_v51  ;;  %v2964_v54 = vmul.f32 %v1825_v51, %v1825_v51  ;;  %3486 = vst [vmem:[%s5334_s15 + $0x188] sm:$0xff] %v1825_v51 }
 0x19d   : > { %v2703_v57 = vadd.f32 %v2702_v53, %v1830_v39  ;;  %v3219_v58 = vadd.f32 %v3218_v52, %v2964_v54  ;;  %v4366_v59 = vpop.f32.mrb[52].mxu0 }
 0x19e   : > { %v1846_v61 = vadd.f32 %v4366_v59, %v5323_v20  ;;  %v1837_v62 = vpop.f32.mrb[53].mxu0  ;;  %v2141_v59 = vpop.f32.mrb[1].mxu1 }
 0x19f   : > { %v2704_v0 = vadd.f32 %v2703_v57, %v1833_v46  ;;  %v3220_v1 = vadd.f32 %v3219_v58, %v2965_v56  ;;  %v1838_v2 = vadd.f32 %v5323_v20, %v1837_v62  ;;  %v4367_v3 = vpop.f32.mrb[54].mxu0  ;;  %4545 = vmatmul.mubr.msk.bf16.gmra.mrb[104].mxu1 %vm1204_vm1, %v4772_v41  ;;  %v4443_v60 = vpop.f32.mrb[2].mxu1 }
 0x1a0   : > { %3491 = vst [vmem:[%s5334_s15 + $0x1b0] sm:$0xff] %v1846_v61  ;;  %v1849_v4 = vadd.f32 %v4367_v3, %v5323_v20  ;;  %v1840_v5 = vpop.f32.mrb[55].mxu0  ;;  %v2969_v14 = vmul.f32 %v1846_v61, %v1846_v61  ;;  %v2144_v3 = vpop.f32.mrb[3].mxu1 }
 0x1a1   : > { %v3221_v6 = vadd.f32 %v3220_v1, %v2966_v63  ;;  %v2705_v7 = vadd.f32 %v2704_v0, %v1838_v2  ;;  %v2967_v8 = vmul.f32 %v1838_v2, %v1838_v2  ;;  %3489 = vst [vmem:[%s5334_s15 + $0x1a0] sm:$0xff] %v1838_v2  ;;  %v1841_v9 = vadd.f32 %v5323_v20, %v1840_v5 }
 0x1a2   : > { %3492 = vst [vmem:[%s5334_s15 + $0x1b8] sm:$0xff] %v1849_v4  ;;  %v2970_v22 = vmul.f32 %v1849_v4, %v1849_v4 }
 0x1a3   : > { %v3222_v10 = vadd.f32 %v3221_v6, %v2967_v8  ;;  %v2706_v11 = vadd.f32 %v2705_v7, %v1841_v9  ;;  %v2968_v12 = vmul.f32 %v1841_v9, %v1841_v9  ;;  %3490 = vst [vmem:[%s5334_s15 + $0x1a8] sm:$0xff] %v1841_v9  ;;  %v2150_v7 = vadd.f32 %v4442_v55, %v5323_v20 }
 0x1a4   : > { %v2142_v8 = vadd.f32 %v5323_v20, %v2141_v59  ;;  %v2153_v9 = vadd.f32 %v4443_v60, %v5323_v20 }
 0x1a5   : > { %v2707_v15 = vadd.f32 %v2706_v11, %v1846_v61  ;;  %v3223_v16 = vadd.f32 %v3222_v10, %v2968_v12  ;;  %v4370_v17 = vpop.f32.mrb[56].mxu0  ;;  %v4773_v61 = vld [vmem:[%s5164_s12 + $0x3b0] sm:$0xff]   ;;  %3567 = vst [vmem:[%s5334_s15 + $0x410] sm:$0xff] %v2150_v7 }
 0x1a6   : > { %v1862_v19 = vadd.f32 %v4370_v17, %v5323_v20  ;;  %v1853_v21 = vpop.f32.mrb[57].mxu0  ;;  %4548 = vmatprep.mubr.msk.bf16.mxu1 %vm1204_vm1, %v4773_v61  ;;  %3565 = vst [vmem:[%s5334_s15 + $0x400] sm:$0xff] %v2142_v8  ;;  %3568 = vst [vmem:[%s5334_s15 + $0x418] sm:$0xff] %v2153_v9 }
 0x1a7   : > { %v2708_v23 = vadd.f32 %v2707_v15, %v1849_v4  ;;  %v3224_v24 = vadd.f32 %v3223_v16, %v2969_v14  ;;  %v1854_v25 = vadd.f32 %v5323_v20, %v1853_v21  ;;  %v4371_v26 = vpop.f32.mrb[58].mxu0  ;;  %v4774_v4 = vld [vmem:[%s5164_s12 + $0x3b8] sm:$0xff]   ;;  %v2145_v14 = vadd.f32 %v5323_v20, %v2144_v3 }
 0x1a8   : > { %3495 = vst [vmem:[%s5334_s15 + $0x1d0] sm:$0xff] %v1862_v19  ;;  %v1865_v27 = vadd.f32 %v4371_v26, %v5323_v20  ;;  %v1856_v28 = vpop.f32.mrb[59].mxu0  ;;  %v2973_v37 = vmul.f32 %v1862_v19, %v1862_v19  ;;  %4549 = vmatmul.mubr.msk.bf16.gmra.mrb[108].mxu1 %vm1204_vm1, %v4774_v4 }
 0x1a9   : > { %v3225_v29 = vadd.f32 %v3224_v24, %v2970_v22  ;;  %v2709_v30 = vadd.f32 %v2708_v23, %v1854_v25  ;;  %v2971_v31 = vmul.f32 %v1854_v25, %v1854_v25  ;;  %3493 = vst [vmem:[%s5334_s15 + $0x1c0] sm:$0xff] %v1854_v25  ;;  %v1857_v32 = vadd.f32 %v5323_v20, %v1856_v28  ;;  %v4446_v22 = vpop.f32.mrb[4].mxu1  ;;  %v4775_v28 = vld [vmem:[%s5164_s12 + $0x3c0] sm:$0xff]  }
 0x1aa   : > { %3496 = vst [vmem:[%s5334_s15 + $0x1d8] sm:$0xff] %v1865_v27  ;;  %v2974_v44 = vmul.f32 %v1865_v27, %v1865_v27  ;;  %3566 = vst [vmem:[%s5334_s15 + $0x408] sm:$0xff] %v2145_v14  ;;  %v2157_v26 = vpop.f32.mrb[5].mxu1  ;;  %4552 = vmatprep.mubr.msk.bf16.mxu1 %vm1204_vm1, %v4775_v28 }
 0x1ab   : > { %v3226_v33 = vadd.f32 %v3225_v29, %v2971_v31  ;;  %v2710_v34 = vadd.f32 %v2709_v30, %v1857_v32  ;;  %v2972_v35 = vmul.f32 %v1857_v32, %v1857_v32  ;;  %3494 = vst [vmem:[%s5334_s15 + $0x1c8] sm:$0xff] %v1857_v32 }
 0x1ad   : > { %v2711_v38 = vadd.f32 %v2710_v34, %v1862_v19  ;;  %v3227_v39 = vadd.f32 %v3226_v33, %v2972_v35  ;;  %v4374_v40 = vpop.f32.mrb[60].mxu0  ;;  %v4776_v35 = vld [vmem:[%s5164_s12 + $0x3c8] sm:$0xff]  }
 0x1ae   : > { %v1878_v42 = vadd.f32 %v4374_v40, %v5323_v20  ;;  %v1869_v43 = vpop.f32.mrb[61].mxu0 }
 0x1af   : > { %v2712_v45 = vadd.f32 %v2711_v38, %v1865_v27  ;;  %v3228_v46 = vadd.f32 %v3227_v39, %v2973_v37  ;;  %v1870_v47 = vadd.f32 %v5323_v20, %v1869_v43  ;;  %v4375_v48 = vpop.f32.mrb[62].mxu0  ;;  %v4447_v27 = vpop.f32.mrb[6].mxu1  ;;  %v5561_v38 = vld [vmem:[#allocation5] ss:$0 sm:$0xff] }
 0x1b0   : > { %3499 = vst [vmem:[%s5334_s15 + $0x1f0] sm:$0xff] %v1878_v42  ;;  %v1881_v49 = vadd.f32 %v4375_v48, %v5323_v20  ;;  %v1872_v50 = vpop.f32.mrb[63].mxu0  ;;  %v2977_v62 = vmul.f32 %v1878_v42, %v1878_v42  ;;  %v2160_v34 = vpop.f32.mrb[7].mxu1  ;;  %v2166_v39 = vadd.f32 %v5561_v38, %v4446_v22  ;;  %v2158_v40 = vadd.f32 %v5561_v38, %v2157_v26 }
 0x1b1   : > { %v3229_v51 = vadd.f32 %v3228_v46, %v2974_v44  ;;  %v2713_v52 = vadd.f32 %v2712_v45, %v1870_v47  ;;  %v2975_v53 = vmul.f32 %v1870_v47, %v1870_v47  ;;  %3497 = vst [vmem:[%s5334_s15 + $0x1e0] sm:$0xff] %v1870_v47  ;;  %v1873_v54 = vadd.f32 %v5323_v20, %v1872_v50 }
 0x1b2   : > { %3500 = vst [vmem:[%s5334_s15 + $0x1f8] sm:$0xff] %v1881_v49  ;;  %v2978_v63 = vmul.f32 %v1881_v49, %v1881_v49  ;;  %v2169_v41 = vadd.f32 %v5561_v38, %v4447_v27  ;;  %v2161_v45 = vadd.f32 %v5561_v38, %v2160_v34  ;;  %4553 = vmatmul.mubr.msk.bf16.gmra.mrb[112].mxu1 %vm1204_vm1, %v4776_v35  ;;  %3571 = vst [vmem:[%s5334_s15 + $0x430] sm:$0xff] %v2166_v39 }
 0x1b3   : > { %v3230_v56 = vadd.f32 %v3229_v51, %v2975_v53  ;;  %v2714_v57 = vadd.f32 %v2713_v52, %v1873_v54  ;;  %v2976_v58 = vmul.f32 %v1873_v54, %v1873_v54  ;;  %3498 = vst [vmem:[%s5334_s15 + $0x1e8] sm:$0xff] %v1873_v54  ;;  %3569 = vst [vmem:[%s5334_s15 + $0x420] sm:$0xff] %v2158_v40  ;;  %v4450_v52 = vpop.f32.mrb[8].mxu1 }
 0x1b4   : > { %3572 = vst [vmem:[%s5334_s15 + $0x438] sm:$0xff] %v2169_v41  ;;  %3570 = vst [vmem:[%s5334_s15 + $0x428] sm:$0xff] %v2161_v45  ;;  %v2182_v4 = vadd.f32 %v5561_v38, %v4450_v52 }
 0x1b5   : > { %v2715_v0 = vadd.f32 %v2714_v57, %v1878_v42  ;;  %v3231_v1 = vadd.f32 %v3230_v56, %v2976_v58  ;;  %v4378_v2 = vpop.f32.mrb[64].mxu0  ;;  %v2173_v56 = vpop.f32.mrb[9].mxu1  ;;  %v4777_v58 = vld [vmem:[%s5164_s12 + $0x3d0] sm:$0xff]  }
 0x1b6   : > { %v1894_v5 = vadd.f32 %v4378_v2, %v5323_v20  ;;  %v1885_v6 = vpop.f32.mrb[65].mxu0  ;;  %v4451_v57 = vpop.f32.mrb[10].mxu1  ;;  %4556 = vmatprep.mubr.msk.bf16.mxu1 %vm1204_vm1, %v4777_v58  ;;  %3575 = vst [vmem:[%s5334_s15 + $0x450] sm:$0xff] %v2182_v4 }
 0x1b7   : > { %v2716_v10 = vadd.f32 %v2715_v0, %v1881_v49  ;;  %v3232_v11 = vadd.f32 %v3231_v1, %v2977_v62  ;;  %v1886_v12 = vadd.f32 %v5323_v20, %v1885_v6  ;;  %v4379_v13 = vpop.f32.mrb[66].mxu0  ;;  %v2176_v0 = vpop.f32.mrb[11].mxu1  ;;  %v4778_v1 = vld [vmem:[%s5164_s12 + $0x3d8] sm:$0xff]   ;;  %v2185_v6 = vadd.f32 %v5561_v38, %v4451_v57 }
 0x1b8   : > { %3503 = vst [vmem:[%s5334_s15 + $0x210] sm:$0xff] %v1894_v5  ;;  %v1897_v15 = vadd.f32 %v4379_v13, %v5323_v20  ;;  %v1888_v16 = vpop.f32.mrb[67].mxu0  ;;  %v2981_v29 = vmul.f32 %v1894_v5, %v1894_v5 }
 0x1b9   : > { %v3233_v17 = vadd.f32 %v3232_v11, %v2978_v63  ;;  %v2717_v18 = vadd.f32 %v2716_v10, %v1886_v12  ;;  %v2979_v19 = vmul.f32 %v1886_v12, %v1886_v12  ;;  %3501 = vst [vmem:[%s5334_s15 + $0x200] sm:$0xff] %v1886_v12  ;;  %v1889_v21 = vadd.f32 %v5323_v20, %v1888_v16 }
 0x1ba   : > { %3504 = vst [vmem:[%s5334_s15 + $0x218] sm:$0xff] %v1897_v15  ;;  %v2982_v30 = vmul.f32 %v1897_v15, %v1897_v15  ;;  %v2177_v11 = vadd.f32 %v5561_v38, %v2176_v0  ;;  %4557 = vmatmul.mubr.msk.bf16.gmra.mrb[116].mxu1 %vm1204_vm1, %v4778_v1  ;;  %3576 = vst [vmem:[%s5334_s15 + $0x458] sm:$0xff] %v2185_v6 }
 0x1bb   : > { %v3234_v23 = vadd.f32 %v3233_v17, %v2979_v19  ;;  %v2718_v24 = vadd.f32 %v2717_v18, %v1889_v21  ;;  %v2980_v25 = vmul.f32 %v1889_v21, %v1889_v21  ;;  %3502 = vst [vmem:[%s5334_s15 + $0x208] sm:$0xff] %v1889_v21  ;;  %v4454_v18 = vpop.f32.mrb[12].mxu1 }
 0x1bc   : > { %3574 = vst [vmem:[%s5334_s15 + $0x448] sm:$0xff] %v2177_v11  ;;  %v2198_v35 = vadd.f32 %v5561_v38, %v4454_v18 }
 0x1bd   : > { %v2719_v31 = vadd.f32 %v2718_v24, %v1894_v5  ;;  %v3235_v32 = vadd.f32 %v3234_v23, %v2980_v25  ;;  %v4382_v33 = vpop.f32.mrb[68].mxu0  ;;  %v2174_v5 = vadd.f32 %v5561_v38, %v2173_v56  ;;  %v2189_v23 = vpop.f32.mrb[13].mxu1  ;;  %v4779_v25 = vld [vmem:[%s5164_s12 + $0x3e0] sm:$0xff]  }
 0x1be   : > { %v1910_v36 = vadd.f32 %v4382_v33, %v5323_v20  ;;  %v1901_v37 = vpop.f32.mrb[69].mxu0  ;;  %v4455_v24 = vpop.f32.mrb[14].mxu1  ;;  %4560 = vmatprep.mubr.msk.bf16.mxu1 %vm1204_vm1, %v4779_v25  ;;  %3579 = vst [vmem:[%s5334_s15 + $0x470] sm:$0xff] %v2198_v35 }
 0x1bf   : > { %v2720_v42 = vadd.f32 %v2719_v31, %v1897_v15  ;;  %v3236_v43 = vadd.f32 %v3235_v32, %v2981_v29  ;;  %v1902_v20 = vadd.f32 %v5561_v38, %v1901_v37  ;;  %v4383_v44 = vpop.f32.mrb[70].mxu0  ;;  %3573 = vst [vmem:[%s5334_s15 + $0x440] sm:$0xff] %v2174_v5  ;;  %v2192_v31 = vpop.f32.mrb[15].mxu1  ;;  %v4780_v32 = vld [vmem:[%s5164_s12 + $0x3e8] sm:$0xff]   ;;  %v2201_v37 = vadd.f32 %v5561_v38, %v4455_v24 }
 0x1c0   : > { %3507 = vst [vmem:[%s5334_s15 + $0x230] sm:$0xff] %v1910_v36  ;;  %v1913_v46 = vadd.f32 %v5561_v38, %v4383_v44  ;;  %v1904_v47 = vpop.f32.mrb[71].mxu0  ;;  %v2985_v59 = vmul.f32 %v1910_v36, %v1910_v36 }
 0x1c1   : > { %v3237_v48 = vadd.f32 %v3236_v43, %v2982_v30  ;;  %v2721_v49 = vadd.f32 %v2720_v42, %v1902_v20  ;;  %v2983_v50 = vmul.f32 %v1902_v20, %v1902_v20  ;;  %3505 = vst [vmem:[%s5334_s15 + $0x220] sm:$0xff] %v1902_v20  ;;  %v1905_v51 = vadd.f32 %v5561_v38, %v1904_v47 }
 0x1c2   : > { %3508 = vst [vmem:[%s5334_s15 + $0x238] sm:$0xff] %v1913_v46  ;;  %v2986_v60 = vmul.f32 %v1913_v46, %v1913_v46  ;;  %v2193_v43 = vadd.f32 %v5561_v38, %v2192_v31  ;;  %4561 = vmatmul.mubr.msk.bf16.gmra.mrb[120].mxu1 %vm1204_vm1, %v4780_v32  ;;  %3580 = vst [vmem:[%s5334_s15 + $0x478] sm:$0xff] %v2201_v37 }
 0x1c3   : > { %v3238_v53 = vadd.f32 %v3237_v48, %v2983_v50  ;;  %v2722_v54 = vadd.f32 %v2721_v49, %v1905_v51  ;;  %v2984_v55 = vmul.f32 %v1905_v51, %v1905_v51  ;;  %3506 = vst [vmem:[%s5334_s15 + $0x228] sm:$0xff] %v1905_v51  ;;  %v4458_v49 = vpop.f32.mrb[16].mxu1 }
 0x1c4   : > { %3578 = vst [vmem:[%s5334_s15 + $0x468] sm:$0xff] %v2193_v43  ;;  %v2214_v1 = vadd.f32 %v5561_v38, %v4458_v49 }
 0x1c5   : > { %v2723_v61 = vadd.f32 %v2722_v54, %v1910_v36  ;;  %v3239_v62 = vadd.f32 %v3238_v53, %v2984_v55  ;;  %v4386_v63 = vpop.f32.mrb[72].mxu0  ;;  %v2190_v36 = vadd.f32 %v5561_v38, %v2189_v23  ;;  %v2205_v53 = vpop.f32.mrb[17].mxu1  ;;  %v4781_v55 = vld [vmem:[%s5164_s12 + $0x3f0] sm:$0xff]  }
 0x1c6   : > { %v1926_v2 = vadd.f32 %v5561_v38, %v4386_v63  ;;  %v1917_v3 = vpop.f32.mrb[73].mxu0  ;;  %v4459_v54 = vpop.f32.mrb[18].mxu1  ;;  %4564 = vmatprep.mubr.msk.bf16.mxu1 %vm1204_vm1, %v4781_v55  ;;  %3583 = vst [vmem:[%s5334_s15 + $0x490] sm:$0xff] %v2214_v1 }
 0x1c7   : > { %v2724_v7 = vadd.f32 %v2723_v61, %v1913_v46  ;;  %v3240_v8 = vadd.f32 %v3239_v62, %v2985_v59  ;;  %v1918_v9 = vadd.f32 %v5561_v38, %v1917_v3  ;;  %v4387_v10 = vpop.f32.mrb[74].mxu0  ;;  %3577 = vst [vmem:[%s5334_s15 + $0x460] sm:$0xff] %v2190_v36  ;;  %v2208_v61 = vpop.f32.mrb[19].mxu1  ;;  %v4782_v62 = vld [vmem:[%s5164_s12 + $0x3f8] sm:$0xff]   ;;  %v2217_v3 = vadd.f32 %v5561_v38, %v4459_v54 }
 0x1c8   : > { %3511 = vst [vmem:[%s5334_s15 + $0x250] sm:$0xff] %v1926_v2  ;;  %v1929_v12 = vadd.f32 %v5561_v38, %v4387_v10  ;;  %v1920_v13 = vpop.f32.mrb[75].mxu0  ;;  %v2989_v26 = vmul.f32 %v1926_v2, %v1926_v2 }
 0x1c9   : > { %v3241_v14 = vadd.f32 %v3240_v8, %v2986_v60  ;;  %v2725_v15 = vadd.f32 %v2724_v7, %v1918_v9  ;;  %v2987_v16 = vmul.f32 %v1918_v9, %v1918_v9  ;;  %3509 = vst [vmem:[%s5334_s15 + $0x240] sm:$0xff] %v1918_v9  ;;  %v1921_v17 = vadd.f32 %v5561_v38, %v1920_v13 }
 0x1ca   : > { %3512 = vst [vmem:[%s5334_s15 + $0x258] sm:$0xff] %v1929_v12  ;;  %v2990_v27 = vmul.f32 %v1929_v12, %v1929_v12  ;;  %v2209_v8 = vadd.f32 %v5561_v38, %v2208_v61  ;;  %4565 = vmatmul.mubr.msk.bf16.gmra.mrb[124].mxu1 %vm1204_vm1, %v4782_v62  ;;  %3584 = vst [vmem:[%s5334_s15 + $0x498] sm:$0xff] %v2217_v3 }
 0x1cb   : > { %v3242_v19 = vadd.f32 %v3241_v14, %v2987_v16  ;;  %v2726_v21 = vadd.f32 %v2725_v15, %v1921_v17  ;;  %v2988_v22 = vmul.f32 %v1921_v17, %v1921_v17  ;;  %3510 = vst [vmem:[%s5334_s15 + $0x248] sm:$0xff] %v1921_v17  ;;  %v4462_v15 = vpop.f32.mrb[20].mxu1 }
 0x1cc   : > { %3582 = vst [vmem:[%s5334_s15 + $0x488] sm:$0xff] %v2209_v8 }
 0x1cd   : > { %v2727_v28 = vadd.f32 %v2726_v21, %v1926_v2  ;;  %v3243_v29 = vadd.f32 %v3242_v19, %v2988_v22  ;;  %v4390_v30 = vpop.f32.mrb[76].mxu0  ;;  %v2206_v2 = vadd.f32 %v5561_v38, %v2205_v53  ;;  %v2221_v19 = vpop.f32.mrb[21].mxu1 }
 0x1ce   : > { %v1942_v33 = vadd.f32 %v5561_v38, %v4390_v30  ;;  %v1933_v34 = vpop.f32.mrb[77].mxu0  ;;  %v4463_v21 = vpop.f32.mrb[22].mxu1  ;;  %v2230_v30 = vadd.f32 %v5561_v38, %v4462_v15  ;;  %v5643_v31 = vadd.f32 %v5561_v38, %v2221_v19 }
 0x1cf   : > { %v2728_v39 = vadd.f32 %v2727_v28, %v1929_v12  ;;  %v3244_v40 = vadd.f32 %v3243_v29, %v2989_v26  ;;  %v1934_v41 = vadd.f32 %v5561_v38, %v1933_v34  ;;  %v4391_v42 = vpop.f32.mrb[78].mxu0  ;;  %3581 = vst [vmem:[%s5334_s15 + $0x480] sm:$0xff] %v2206_v2  ;;  %v2233_v32 = vadd.f32 %v5561_v38, %v4463_v21 }
 0x1d0   : > { %3515 = vst [vmem:[%s5334_s15 + $0x270] sm:$0xff] %v1942_v33  ;;  %v1945_v20 = vadd.f32 %v5561_v38, %v4391_v42  ;;  %v1936_v44 = vpop.f32.mrb[79].mxu0  ;;  %v2993_v56 = vmul.f32 %v1942_v33, %v1942_v33  ;;  %3587 = vst [vmem:[%s5334_s15 + $0x4b0] sm:$0xff] %v2230_v30 }
 0x1d1   : > { %v3245_v45 = vadd.f32 %v3244_v40, %v2990_v27  ;;  %v2729_v46 = vadd.f32 %v2728_v39, %v1934_v41  ;;  %v2991_v47 = vmul.f32 %v1934_v41, %v1934_v41  ;;  %3513 = vst [vmem:[%s5334_s15 + $0x260] sm:$0xff] %v1934_v41  ;;  %v1937_v48 = vadd.f32 %v5561_v38, %v1936_v44  ;;  %v2224_v27 = vpop.f32.mrb[23].mxu1 }
 0x1d2   : > { %3516 = vst [vmem:[%s5334_s15 + $0x278] sm:$0xff] %v1945_v20  ;;  %v2994_v57 = vmul.f32 %v1945_v20, %v1945_v20  ;;  %v5648_v37 = vadd.f32 %v5561_v38, %v2224_v27  ;;  %3585 = vst [vmem:[%s5334_s15 + $0x4a0] sm:$0xff] %v5643_v31  ;;  %v4466_v44 = vpop.f32.mrb[24].mxu1 }
 0x1d3   : > { %v3246_v50 = vadd.f32 %v3245_v45, %v2991_v47  ;;  %v2730_v51 = vadd.f32 %v2729_v46, %v1937_v48  ;;  %v2992_v52 = vmul.f32 %v1937_v48, %v1937_v48  ;;  %3514 = vst [vmem:[%s5334_s15 + $0x268] sm:$0xff] %v1937_v48  ;;  %3588 = vst [vmem:[%s5334_s15 + $0x4b8] sm:$0xff] %v2233_v32  ;;  %v2237_v48 = vpop.f32.mrb[25].mxu1 }
 0x1d4   : > { %3586 = vst [vmem:[%s5334_s15 + $0x4a8] sm:$0xff] %v5648_v37  ;;  %v4467_v49 = vpop.f32.mrb[26].mxu1 }
 0x1d5   : > { %v2731_v58 = vadd.f32 %v2730_v51, %v1942_v33  ;;  %v3247_v59 = vadd.f32 %v3246_v50, %v2992_v52  ;;  %v4394_v60 = vpop.f32.mrb[80].mxu0  ;;  %v2240_v55 = vpop.f32.mrb[27].mxu1 }
 0x1d6   : > { %v1958_v63 = vadd.f32 %v5561_v38, %v4394_v60  ;;  %v1949_v0 = vpop.f32.mrb[81].mxu0  ;;  %v2249_v60 = vadd.f32 %v5561_v38, %v4467_v49  ;;  %v5672_v1 = vadd.f32 %v5561_v38, %v2240_v55  ;;  %v4470_v8 = vpop.f32.mrb[28].mxu1 }
 0x1d7   : > { %v2732_v4 = vadd.f32 %v2731_v58, %v1945_v20  ;;  %v3248_v5 = vadd.f32 %v3247_v59, %v2993_v56  ;;  %v1950_v6 = vadd.f32 %v5561_v38, %v1949_v0  ;;  %v4395_v7 = vpop.f32.mrb[82].mxu0  ;;  %v5664_v58 = vadd.f32 %v5561_v38, %v4466_v44 }
 0x1d8   : > { %3519 = vst [vmem:[%s5334_s15 + $0x290] sm:$0xff] %v1958_v63  ;;  %v1961_v9 = vadd.f32 %v5561_v38, %v4395_v7  ;;  %v1952_v10 = vpop.f32.mrb[83].mxu0  ;;  %v2997_v22 = vmul.f32 %v1958_v63, %v1958_v63  ;;  %v5667_v59 = vadd.f32 %v5561_v38, %v2237_v48  ;;  %3592 = vst [vmem:[%s5334_s15 + $0x4d8] sm:$0xff] %v2249_v60 }
 0x1d9   : > { %v3249_v11 = vadd.f32 %v3248_v5, %v2994_v57  ;;  %v2733_v12 = vadd.f32 %v2732_v4, %v1950_v6  ;;  %v2995_v13 = vmul.f32 %v1950_v6, %v1950_v6  ;;  %3517 = vst [vmem:[%s5334_s15 + $0x280] sm:$0xff] %v1950_v6  ;;  %v1953_v14 = vadd.f32 %v5561_v38, %v1952_v10 }
 0x1da   : > { %3520 = vst [vmem:[%s5334_s15 + $0x298] sm:$0xff] %v1961_v9  ;;  %v2998_v23 = vmul.f32 %v1961_v9, %v1961_v9  ;;  %3591 = vst [vmem:[%s5334_s15 + $0x4d0] sm:$0xff] %v5664_v58 }
 0x1db   : > { %v3250_v16 = vadd.f32 %v3249_v11, %v2995_v13  ;;  %v2734_v17 = vadd.f32 %v2733_v12, %v1953_v14  ;;  %v2996_v18 = vmul.f32 %v1953_v14, %v1953_v14  ;;  %3518 = vst [vmem:[%s5334_s15 + $0x288] sm:$0xff] %v1953_v14  ;;  %3589 = vst [vmem:[%s5334_s15 + $0x4c0] sm:$0xff] %v5667_v59  ;;  %v2253_v12 = vpop.f32.mrb[29].mxu1 }
 0x1dc   : > { %3590 = vst [vmem:[%s5334_s15 + $0x4c8] sm:$0xff] %v5672_v1  ;;  %v4471_v13 = vpop.f32.mrb[30].mxu1 }
 0x1dd   : > { %v2735_v24 = vadd.f32 %v2734_v17, %v1958_v63  ;;  %v3251_v25 = vadd.f32 %v3250_v16, %v2996_v18  ;;  %v4398_v26 = vpop.f32.mrb[84].mxu0  ;;  %v2256_v19 = vpop.f32.mrb[31].mxu1 }
 0x1de   : > { %v1974_v28 = vadd.f32 %v5561_v38, %v4398_v26  ;;  %v1965_v29 = vpop.f32.mrb[85].mxu0  ;;  %v5699_v30 = vadd.f32 %v5561_v38, %v2256_v19 }
 0x1df   : > { %v2736_v33 = vadd.f32 %v2735_v24, %v1961_v9  ;;  %v3252_v34 = vadd.f32 %v3251_v25, %v2997_v22  ;;  %v1966_v35 = vadd.f32 %v5561_v38, %v1965_v29  ;;  %v4399_v36 = vpop.f32.mrb[86].mxu0  ;;  %v5692_v24 = vadd.f32 %v5561_v38, %v2253_v12 }
 0x1e0   : > { %3523 = vst [vmem:[%s5334_s15 + $0x2b0] sm:$0xff] %v1974_v28  ;;  %v1977_v39 = vadd.f32 %v5561_v38, %v4399_v36  ;;  %v1968_v40 = vpop.f32.mrb[87].mxu0  ;;  %v3001_v50 = vmul.f32 %v1974_v28, %v1974_v28  ;;  %v5695_v25 = vadd.f32 %v5561_v38, %v4471_v13  ;;  %3594 = vst [vmem:[%s5334_s15 + $0x4e8] sm:$0xff] %v5699_v30 }
 0x1e1   : > { %v3253_v41 = vadd.f32 %v3252_v34, %v2998_v23  ;;  %v2737_v42 = vadd.f32 %v2736_v33, %v1966_v35  ;;  %v2999_v43 = vmul.f32 %v1966_v35, %v1966_v35  ;;  %3521 = vst [vmem:[%s5334_s15 + $0x2a0] sm:$0xff] %v1966_v35  ;;  %v1969_v20 = vadd.f32 %v5561_v38, %v1968_v40  ;;  %v4474_v40 = vpop.f32.mrb[32].mxu1 }
 0x1e2   : > { %3524 = vst [vmem:[%s5334_s15 + $0x2b8] sm:$0xff] %v1977_v39  ;;  %v3002_v51 = vmul.f32 %v1977_v39, %v1977_v39  ;;  %v5689_v23 = vadd.f32 %v5561_v38, %v4470_v8  ;;  %3593 = vst [vmem:[%s5334_s15 + $0x4e0] sm:$0xff] %v5692_v24 }
 0x1e3   : > { %v3254_v45 = vadd.f32 %v3253_v41, %v2999_v43  ;;  %v2738_v46 = vadd.f32 %v2737_v42, %v1969_v20  ;;  %v3000_v47 = vmul.f32 %v1969_v20, %v1969_v20  ;;  %3522 = vst [vmem:[%s5334_s15 + $0x2a8] sm:$0xff] %v1969_v20  ;;  %3596 = vst [vmem:[%s5334_s15 + $0x4f8] sm:$0xff] %v5695_v25  ;;  %v2269_v20 = vpop.f32.mrb[33].mxu1 }
 0x1e4   : > { %3595 = vst [vmem:[%s5334_s15 + $0x4f0] sm:$0xff] %v5689_v23  ;;  %v4475_v44 = vpop.f32.mrb[34].mxu1 }
 0x1e5   : > { %v2739_v52 = vadd.f32 %v2738_v46, %v1974_v28  ;;  %v3255_v53 = vadd.f32 %v3254_v45, %v3000_v47  ;;  %v4402_v54 = vpop.f32.mrb[88].mxu0  ;;  %v5723_v55 = vadd.f32 %v5561_v38, %v4475_v44 }
 0x1e6   : > { %v1990_v56 = vadd.f32 %v5561_v38, %v4402_v54  ;;  %v1981_v57 = vpop.f32.mrb[89].mxu0  ;;  %v5720_v54 = vadd.f32 %v5561_v38, %v2269_v20 }
 0x1e7   : > { %v2740_v61 = vadd.f32 %v2739_v52, %v1977_v39  ;;  %v3256_v62 = vadd.f32 %v3255_v53, %v3001_v50  ;;  %v1982_v63 = vadd.f32 %v5561_v38, %v1981_v57  ;;  %v4403_v0 = vpop.f32.mrb[90].mxu0  ;;  %v2272_v50 = vpop.f32.mrb[35].mxu1  ;;  %v5717_v53 = vadd.f32 %v5561_v38, %v4474_v40  ;;  %3600 = vst [vmem:[%s5334_s15 + $0x518] sm:$0xff] %v5723_v55 }
 0x1e8   : > { %3527 = vst [vmem:[%s5334_s15 + $0x2d0] sm:$0xff] %v1990_v56  ;;  %v1993_v2 = vadd.f32 %v5561_v38, %v4403_v0  ;;  %v1984_v3 = vpop.f32.mrb[91].mxu0  ;;  %v3005_v14 = vmul.f32 %v1990_v56, %v1990_v56  ;;  %3597 = vst [vmem:[%s5334_s15 + $0x500] sm:$0xff] %v5720_v54 }
 0x1e9   : > { %v3257_v4 = vadd.f32 %v3256_v62, %v3002_v51  ;;  %v2741_v5 = vadd.f32 %v2740_v61, %v1982_v63  ;;  %v3003_v6 = vmul.f32 %v1982_v63, %v1982_v63  ;;  %3525 = vst [vmem:[%s5334_s15 + $0x2c0] sm:$0xff] %v1982_v63  ;;  %v1985_v7 = vadd.f32 %v5561_v38, %v1984_v3 }
 0x1ea   : > { %3528 = vst [vmem:[%s5334_s15 + $0x2d8] sm:$0xff] %v1993_v2  ;;  %v3006_v15 = vmul.f32 %v1993_v2, %v1993_v2  ;;  %v5727_v62 = vadd.f32 %v5561_v38, %v2272_v50  ;;  %3599 = vst [vmem:[%s5334_s15 + $0x510] sm:$0xff] %v5717_v53 }
 0x1eb   : > { %v3258_v9 = vadd.f32 %v3257_v4, %v3003_v6  ;;  %v2742_v10 = vadd.f32 %v2741_v5, %v1985_v7  ;;  %v3004_v11 = vmul.f32 %v1985_v7, %v1985_v7  ;;  %3526 = vst [vmem:[%s5334_s15 + $0x2c8] sm:$0xff] %v1985_v7  ;;  %v4478_v6 = vpop.f32.mrb[36].mxu1 }
 0x1ec   : > { %3598 = vst [vmem:[%s5334_s15 + $0x508] sm:$0xff] %v5727_v62 }
 0x1ed   : > { %v2743_v16 = vadd.f32 %v2742_v10, %v1990_v56  ;;  %v3259_v17 = vadd.f32 %v3258_v9, %v3004_v11  ;;  %v4406_v18 = vpop.f32.mrb[92].mxu0  ;;  %v2285_v10 = vpop.f32.mrb[37].mxu1 }
 0x1ee   : > { %v2006_v21 = vadd.f32 %v5561_v38, %v4406_v18  ;;  %v1997_v22 = vpop.f32.mrb[93].mxu0  ;;  %v4479_v11 = vpop.f32.mrb[38].mxu1 }
 0x1ef   : > { %v2744_v26 = vadd.f32 %v2743_v16, %v1993_v2  ;;  %v3260_v27 = vadd.f32 %v3259_v17, %v3005_v14  ;;  %v1998_v28 = vadd.f32 %v5561_v38, %v1997_v22  ;;  %v4407_v29 = vpop.f32.mrb[94].mxu0  ;;  %v2288_v17 = vpop.f32.mrb[39].mxu1  ;;  %v5748_v22 = vadd.f32 %v5561_v38, %v2285_v10 }
 0x1f0   : > { %3531 = vst [vmem:[%s5334_s15 + $0x2f0] sm:$0xff] %v2006_v21  ;;  %v2009_v32 = vadd.f32 %v5561_v38, %v4407_v29  ;;  %v2000_v33 = vpop.f32.mrb[95].mxu0  ;;  %v3009_v45 = vmul.f32 %v2006_v21, %v2006_v21 }
 0x1f1   : > { %v3261_v34 = vadd.f32 %v3260_v27, %v3006_v15  ;;  %v2745_v35 = vadd.f32 %v2744_v26, %v1998_v28  ;;  %v3007_v36 = vmul.f32 %v1998_v28, %v1998_v28  ;;  %3529 = vst [vmem:[%s5334_s15 + $0x2e0] sm:$0xff] %v1998_v28  ;;  %v2001_v39 = vadd.f32 %v5561_v38, %v2000_v33 }
 0x1f2   : > { %3532 = vst [vmem:[%s5334_s15 + $0x2f8] sm:$0xff] %v2009_v32  ;;  %v3010_v46 = vmul.f32 %v2009_v32, %v2009_v32  ;;  %v5751_v26 = vadd.f32 %v5561_v38, %v4479_v11  ;;  %v5755_v33 = vadd.f32 %v5561_v38, %v2288_v17  ;;  %3601 = vst [vmem:[%s5334_s15 + $0x520] sm:$0xff] %v5748_v22 }
 0x1f3   : > { %v3262_v41 = vadd.f32 %v3261_v34, %v3007_v36  ;;  %v2746_v42 = vadd.f32 %v2745_v35, %v2001_v39  ;;  %v3008_v43 = vmul.f32 %v2001_v39, %v2001_v39  ;;  %3530 = vst [vmem:[%s5334_s15 + $0x2e8] sm:$0xff] %v2001_v39 }
 0x1f4   : > { %3604 = vst [vmem:[%s5334_s15 + $0x538] sm:$0xff] %v5751_v26  ;;  %3602 = vst [vmem:[%s5334_s15 + $0x528] sm:$0xff] %v5755_v33 }
 0x1f5   : > { %v2747_v47 = vadd.f32 %v2746_v42, %v2006_v21  ;;  %v3263_v48 = vadd.f32 %v3262_v41, %v3008_v43  ;;  %v4410_v49 = vpop.f32.mrb[96].mxu0  ;;  %v5745_v21 = vadd.f32 %v5561_v38, %v4478_v6  ;;  %v4482_v42 = vpop.f32.mrb[40].mxu1 }
 0x1f6   : > { %v2022_v51 = vadd.f32 %v5561_v38, %v4410_v49  ;;  %v2013_v52 = vpop.f32.mrb[97].mxu0 }
 0x1f7   : > { %v2748_v56 = vadd.f32 %v2747_v47, %v2009_v32  ;;  %v3264_v57 = vadd.f32 %v3263_v48, %v3009_v45  ;;  %v2014_v60 = vadd.f32 %v5561_v38, %v2013_v52  ;;  %v4411_v61 = vpop.f32.mrb[98].mxu0  ;;  %3603 = vst [vmem:[%s5334_s15 + $0x530] sm:$0xff] %v5745_v21  ;;  %v2301_v45 = vpop.f32.mrb[41].mxu1 }
 0x1f8   : > { %3535 = vst [vmem:[%s5334_s15 + $0x310] sm:$0xff] %v2022_v51  ;;  %v2025_v63 = vadd.f32 %v5561_v38, %v4411_v61  ;;  %v2016_v0 = vpop.f32.mrb[99].mxu0  ;;  %v3013_v12 = vmul.f32 %v2022_v51, %v2022_v51  ;;  %v5776_v61 = vadd.f32 %v5561_v38, %v2301_v45 }
 0x1f9   : > { %v3265_v2 = vadd.f32 %v3264_v57, %v3010_v46  ;;  %v2749_v3 = vadd.f32 %v2748_v56, %v2014_v60  ;;  %v3011_v4 = vmul.f32 %v2014_v60, %v2014_v60  ;;  %3533 = vst [vmem:[%s5334_s15 + $0x300] sm:$0xff] %v2014_v60  ;;  %v2017_v5 = vadd.f32 %v5561_v38, %v2016_v0  ;;  %v4483_v46 = vpop.f32.mrb[42].mxu1 }
 0x1fa   : > { %3536 = vst [vmem:[%s5334_s15 + $0x318] sm:$0xff] %v2025_v63  ;;  %v3014_v13 = vmul.f32 %v2025_v63, %v2025_v63  ;;  %v2304_v52 = vpop.f32.mrb[43].mxu1  ;;  %v5773_v60 = vadd.f32 %v5561_v38, %v4482_v42  ;;  %3605 = vst [vmem:[%s5334_s15 + $0x540] sm:$0xff] %v5776_v61 }
 0x1fb   : > { %v3266_v7 = vadd.f32 %v3265_v2, %v3011_v4  ;;  %v2750_v8 = vadd.f32 %v2749_v3, %v2017_v5  ;;  %v3012_v9 = vmul.f32 %v2017_v5, %v2017_v5  ;;  %3534 = vst [vmem:[%s5334_s15 + $0x308] sm:$0xff] %v2017_v5  ;;  %v5783_v5 = vadd.f32 %v5561_v38, %v2304_v52 }
 0x1fc   : > { %3607 = vst [vmem:[%s5334_s15 + $0x550] sm:$0xff] %v5773_v60 }
 0x1fd   : > { %v2751_v14 = vadd.f32 %v2750_v8, %v2022_v51  ;;  %v3267_v15 = vadd.f32 %v3266_v7, %v3012_v9  ;;  %v4414_v16 = vpop.f32.mrb[100].mxu0  ;;  %3606 = vst [vmem:[%s5334_s15 + $0x548] sm:$0xff] %v5783_v5 }
 0x1fe   : > { %v2038_v18 = vadd.f32 %v5561_v38, %v4414_v16  ;;  %v2029_v19 = vpop.f32.mrb[101].mxu0 }
 0x1ff   : > { %v2752_v27 = vadd.f32 %v2751_v14, %v2025_v63  ;;  %v3268_v28 = vadd.f32 %v3267_v15, %v3013_v12  ;;  %v2030_v29 = vadd.f32 %v5561_v38, %v2029_v19  ;;  %v4415_v32 = vpop.f32.mrb[102].mxu0  ;;  %v5779_v63 = vadd.f32 %v5561_v38, %v4483_v46  ;;  %v4486_v12 = vpop.f32.mrb[44].mxu1 }
 0x200   : > { %3539 = vst [vmem:[%s5334_s15 + $0x330] sm:$0xff] %v2038_v18  ;;  %v2041_v34 = vadd.f32 %v5561_v38, %v4415_v32  ;;  %v2032_v35 = vpop.f32.mrb[103].mxu0  ;;  %v3017_v47 = vmul.f32 %v2038_v18, %v2038_v18  ;;  %v2317_v16 = vpop.f32.mrb[45].mxu1 }
 0x201   : > { %v3269_v36 = vadd.f32 %v3268_v28, %v3014_v13  ;;  %v2753_v39 = vadd.f32 %v2752_v27, %v2030_v29  ;;  %v3015_v40 = vmul.f32 %v2030_v29, %v2030_v29  ;;  %3537 = vst [vmem:[%s5334_s15 + $0x320] sm:$0xff] %v2030_v29  ;;  %v2033_v41 = vadd.f32 %v5561_v38, %v2032_v35  ;;  %v4487_v17 = vpop.f32.mrb[46].mxu1 }
 0x202   : > { %3540 = vst [vmem:[%s5334_s15 + $0x338] sm:$0xff] %v2041_v34  ;;  %v3018_v48 = vmul.f32 %v2041_v34, %v2041_v34  ;;  %3608 = vst [vmem:[%s5334_s15 + $0x558] sm:$0xff] %v5779_v63  ;;  %v2320_v32 = vpop.f32.mrb[47].mxu1 }
 0x203   : > { %v3270_v43 = vadd.f32 %v3269_v36, %v3015_v40  ;;  %v2754_v20 = vadd.f32 %v2753_v39, %v2033_v41  ;;  %v3016_v44 = vmul.f32 %v2033_v41, %v2033_v41  ;;  %3538 = vst [vmem:[%s5334_s15 + $0x328] sm:$0xff] %v2033_v41  ;;  %v5801_v36 = vadd.f32 %v5561_v38, %v4486_v12 }
 0x204   : > { %v5804_v39 = vadd.f32 %v5561_v38, %v2317_v16  ;;  %v5807_v40 = vadd.f32 %v5561_v38, %v4487_v17 }
 0x205   : > { %v2755_v49 = vadd.f32 %v2754_v20, %v2038_v18  ;;  %v3271_v50 = vadd.f32 %v3270_v43, %v3016_v44  ;;  %v4418_v51 = vpop.f32.mrb[104].mxu0  ;;  %v5811_v44 = vadd.f32 %v5561_v38, %v2320_v32  ;;  %3611 = vst [vmem:[%s5334_s15 + $0x570] sm:$0xff] %v5801_v36 }
 0x206   : > { %v2054_v56 = vadd.f32 %v5561_v38, %v4418_v51  ;;  %v2045_v57 = vpop.f32.mrb[105].mxu0  ;;  %3609 = vst [vmem:[%s5334_s15 + $0x560] sm:$0xff] %v5804_v39  ;;  %3612 = vst [vmem:[%s5334_s15 + $0x578] sm:$0xff] %v5807_v40  ;;  %v4490_v51 = vpop.f32.mrb[48].mxu1 }
 0x207   : > { %v2756_v0 = vadd.f32 %v2755_v49, %v2041_v34  ;;  %v3272_v2 = vadd.f32 %v3271_v50, %v3017_v47  ;;  %v2046_v3 = vadd.f32 %v5561_v38, %v2045_v57  ;;  %v4419_v4 = vpop.f32.mrb[106].mxu0  ;;  %3610 = vst [vmem:[%s5334_s15 + $0x568] sm:$0xff] %v5811_v44  ;;  %v5829_v12 = vadd.f32 %v5561_v38, %v4490_v51 }
 0x208   : > { %3543 = vst [vmem:[%s5334_s15 + $0x350] sm:$0xff] %v2054_v56  ;;  %v2057_v6 = vadd.f32 %v5561_v38, %v4419_v4  ;;  %v2048_v7 = vpop.f32.mrb[107].mxu0  ;;  %v3021_v18 = vmul.f32 %v2054_v56, %v2054_v56 }
 0x209   : > { %v3273_v8 = vadd.f32 %v3272_v2, %v3018_v48  ;;  %v2757_v9 = vadd.f32 %v2756_v0, %v2046_v3  ;;  %v3019_v10 = vmul.f32 %v2046_v3, %v2046_v3  ;;  %3541 = vst [vmem:[%s5334_s15 + $0x340] sm:$0xff] %v2046_v3  ;;  %v2049_v11 = vadd.f32 %v5561_v38, %v2048_v7  ;;  %v2333_v0 = vpop.f32.mrb[49].mxu1 }
 0x20a   : > { %3544 = vst [vmem:[%s5334_s15 + $0x358] sm:$0xff] %v2057_v6  ;;  %v3022_v19 = vmul.f32 %v2057_v6, %v2057_v6  ;;  %v4491_v2 = vpop.f32.mrb[50].mxu1  ;;  %3615 = vst [vmem:[%s5334_s15 + $0x590] sm:$0xff] %v5829_v12 }
 0x20b   : > { %v3274_v13 = vadd.f32 %v3273_v8, %v3019_v10  ;;  %v2758_v14 = vadd.f32 %v2757_v9, %v2049_v11  ;;  %v3020_v15 = vmul.f32 %v2049_v11, %v2049_v11  ;;  %3542 = vst [vmem:[%s5334_s15 + $0x348] sm:$0xff] %v2049_v11  ;;  %v2336_v9 = vpop.f32.mrb[51].mxu1 }
 0x20d   : > { %v2759_v27 = vadd.f32 %v2758_v14, %v2054_v56  ;;  %v3275_v28 = vadd.f32 %v3274_v13, %v3020_v15  ;;  %v4422_v29 = vpop.f32.mrb[108].mxu0  ;;  %v5832_v13 = vadd.f32 %v5561_v38, %v2333_v0  ;;  %v5835_v14 = vadd.f32 %v5561_v38, %v4491_v2 }
 0x20e   : > { %v2070_v34 = vadd.f32 %v5561_v38, %v4422_v29  ;;  %v2061_v35 = vpop.f32.mrb[109].mxu0 }
 0x20f   : > { %v2760_v41 = vadd.f32 %v2759_v27, %v2057_v6  ;;  %v3276_v42 = vadd.f32 %v3275_v28, %v3021_v18  ;;  %v2062_v43 = vadd.f32 %v5561_v38, %v2061_v35  ;;  %v4423_v20 = vpop.f32.mrb[110].mxu0  ;;  %3613 = vst [vmem:[%s5334_s15 + $0x580] sm:$0xff] %v5832_v13  ;;  %3616 = vst [vmem:[%s5334_s15 + $0x598] sm:$0xff] %v5835_v14 }
 0x210   : > { %3547 = vst [vmem:[%s5334_s15 + $0x370] sm:$0xff] %v2070_v34  ;;  %v2073_v45 = vadd.f32 %v5561_v38, %v4423_v20  ;;  %v2064_v46 = vpop.f32.mrb[111].mxu0  ;;  %v3025_v3 = vmul.f32 %v2070_v34, %v2070_v34 }
 0x211   : > { %v3277_v47 = vadd.f32 %v3276_v42, %v3022_v19  ;;  %v2761_v48 = vadd.f32 %v2760_v41, %v2062_v43  ;;  %v3023_v49 = vmul.f32 %v2062_v43, %v2062_v43  ;;  %3545 = vst [vmem:[%s5334_s15 + $0x360] sm:$0xff] %v2062_v43  ;;  %v2065_v50 = vadd.f32 %v5561_v38, %v2064_v46  ;;  %v4494_v41 = vpop.f32.mrb[52].mxu1 }
 0x212   : > { %3548 = vst [vmem:[%s5334_s15 + $0x378] sm:$0xff] %v2073_v45  ;;  %v3026_v4 = vmul.f32 %v2073_v45, %v2073_v45  ;;  %v5839_v19 = vadd.f32 %v5561_v38, %v2336_v9  ;;  %v5857_v0 = vadd.f32 %v5561_v38, %v4494_v41 }
 0x213   : > { %v3278_v52 = vadd.f32 %v3277_v47, %v3023_v49  ;;  %v2762_v56 = vadd.f32 %v2761_v48, %v2065_v50  ;;  %v3024_v57 = vmul.f32 %v2065_v50, %v2065_v50  ;;  %3546 = vst [vmem:[%s5334_s15 + $0x368] sm:$0xff] %v2065_v50 }
 0x214   : > { %3614 = vst [vmem:[%s5334_s15 + $0x588] sm:$0xff] %v5839_v19  ;;  %3619 = vst [vmem:[%s5334_s15 + $0x5b0] sm:$0xff] %v5857_v0 }
 0x215   : > { %v2763_v6 = vadd.f32 %v2762_v56, %v2070_v34  ;;  %v3279_v7 = vadd.f32 %v3278_v52, %v3024_v57  ;;  %v4426_v8 = vpop.f32.mrb[112].mxu0 }
 0x216   : > { %v2086_v10 = vadd.f32 %v5561_v38, %v4426_v8  ;;  %v2077_v11 = vpop.f32.mrb[113].mxu0 }
 0x217   : > { %v2764_v15 = vadd.f32 %v2763_v6, %v2073_v45  ;;  %v3280_v16 = vadd.f32 %v3279_v7, %v3025_v3  ;;  %v2078_v17 = vadd.f32 %v5561_v38, %v2077_v11  ;;  %v4427_v18 = vpop.f32.mrb[114].mxu0  ;;  %v2349_v45 = vpop.f32.mrb[53].mxu1 }
 0x218   : > { %3551 = vst [vmem:[%s5334_s15 + $0x390] sm:$0xff] %v2086_v10  ;;  %v2089_v27 = vadd.f32 %v5561_v38, %v4427_v18  ;;  %v2080_v28 = vpop.f32.mrb[115].mxu0  ;;  %v4495_v46 = vpop.f32.mrb[54].mxu1  ;;  %v3029_v47 = vmul.f32 %v2086_v10, %v2086_v10  ;;  %v5860_v2 = vadd.f32 %v5561_v38, %v2349_v45 }
 0x219   : > { %v3281_v29 = vadd.f32 %v3280_v16, %v3026_v4  ;;  %v2765_v32 = vadd.f32 %v2764_v15, %v2078_v17  ;;  %v3027_v34 = vmul.f32 %v2078_v17, %v2078_v17  ;;  %3549 = vst [vmem:[%s5334_s15 + $0x380] sm:$0xff] %v2078_v17  ;;  %v2081_v35 = vadd.f32 %v5561_v38, %v2080_v28  ;;  %v2352_v52 = vpop.f32.mrb[55].mxu1 }
 0x21a   : > { %3552 = vst [vmem:[%s5334_s15 + $0x398] sm:$0xff] %v2089_v27  ;;  %v3030_v48 = vmul.f32 %v2089_v27, %v2089_v27  ;;  %v5863_v3 = vadd.f32 %v5561_v38, %v4495_v46  ;;  %v5867_v9 = vadd.f32 %v5561_v38, %v2352_v52  ;;  %3617 = vst [vmem:[%s5334_s15 + $0x5a0] sm:$0xff] %v5860_v2 }
 0x21b   : > { %v3282_v42 = vadd.f32 %v3281_v29, %v3027_v34  ;;  %v2766_v43 = vadd.f32 %v2765_v32, %v2081_v35  ;;  %v3028_v20 = vmul.f32 %v2081_v35, %v2081_v35  ;;  %3550 = vst [vmem:[%s5334_s15 + $0x388] sm:$0xff] %v2081_v35 }
 0x21c   : > { %3620 = vst [vmem:[%s5334_s15 + $0x5b8] sm:$0xff] %v5863_v3  ;;  %3618 = vst [vmem:[%s5334_s15 + $0x5a8] sm:$0xff] %v5867_v9 }
 0x21d   : > { %v2767_v49 = vadd.f32 %v2766_v43, %v2086_v10  ;;  %v3283_v50 = vadd.f32 %v3282_v42, %v3028_v20  ;;  %v4430_v51 = vpop.f32.mrb[116].mxu0 }
 0x21e   : > { %v2102_v56 = vadd.f32 %v5561_v38, %v4430_v51  ;;  %v2093_v57 = vpop.f32.mrb[117].mxu0 }
 0x21f   : > { %v2768_v4 = vadd.f32 %v2767_v49, %v2089_v27  ;;  %v3284_v6 = vadd.f32 %v3283_v50, %v3029_v47  ;;  %v2094_v7 = vadd.f32 %v5561_v38, %v2093_v57  ;;  %v4431_v8 = vpop.f32.mrb[118].mxu0  ;;  %v4498_v27 = vpop.f32.mrb[56].mxu1 }
 0x220   : > { %3555 = vst [vmem:[%s5334_s15 + $0x3b0] sm:$0xff] %v2102_v56  ;;  %v2105_v10 = vadd.f32 %v5561_v38, %v4431_v8  ;;  %v2096_v11 = vpop.f32.mrb[119].mxu0  ;;  %v2365_v34 = vpop.f32.mrb[57].mxu1  ;;  %v3033_v41 = vmul.f32 %v2102_v56, %v2102_v56  ;;  %v5885_v49 = vadd.f32 %v5561_v38, %v4498_v27 }
 0x221   : > { %v3285_v15 = vadd.f32 %v3284_v6, %v3030_v48  ;;  %v2769_v16 = vadd.f32 %v2768_v4, %v2094_v7  ;;  %v3031_v17 = vmul.f32 %v2094_v7, %v2094_v7  ;;  %3553 = vst [vmem:[%s5334_s15 + $0x3a0] sm:$0xff] %v2094_v7  ;;  %v2097_v18 = vadd.f32 %v5561_v38, %v2096_v11  ;;  %v4499_v35 = vpop.f32.mrb[58].mxu1 }
 0x222   : > { %3556 = vst [vmem:[%s5334_s15 + $0x3b8] sm:$0xff] %v2105_v10  ;;  %v3034_v42 = vmul.f32 %v2105_v10, %v2105_v10  ;;  %v2368_v46 = vpop.f32.mrb[59].mxu1  ;;  %v5888_v50 = vadd.f32 %v5561_v38, %v2365_v34  ;;  %v5891_v51 = vadd.f32 %v5561_v38, %v4499_v35  ;;  %3623 = vst [vmem:[%s5334_s15 + $0x5d0] sm:$0xff] %v5885_v49 }
 0x223   : > { %v3286_v28 = vadd.f32 %v3285_v15, %v3031_v17  ;;  %v2770_v29 = vadd.f32 %v2769_v16, %v2097_v18  ;;  %v3032_v32 = vmul.f32 %v2097_v18, %v2097_v18  ;;  %3554 = vst [vmem:[%s5334_s15 + $0x3a8] sm:$0xff] %v2097_v18  ;;  %v5895_v6 = vadd.f32 %v5561_v38, %v2368_v46  ;;  %v4502_v17 = vpop.f32.mrb[60].mxu1 }
 0x224   : > { %3621 = vst [vmem:[%s5334_s15 + $0x5c0] sm:$0xff] %v5888_v50  ;;  %3624 = vst [vmem:[%s5334_s15 + $0x5d8] sm:$0xff] %v5891_v51 }
 0x225   : > { %v2771_v43 = vadd.f32 %v2770_v29, %v2102_v56  ;;  %v3287_v20 = vadd.f32 %v3286_v28, %v3032_v32  ;;  %v4434_v45 = vpop.f32.mrb[120].mxu0  ;;  %3622 = vst [vmem:[%s5334_s15 + $0x5c8] sm:$0xff] %v5895_v6  ;;  %v2381_v29 = vpop.f32.mrb[61].mxu1 }
 0x226   : > { %v2118_v47 = vadd.f32 %v5561_v38, %v4434_v45  ;;  %v2109_v48 = vpop.f32.mrb[121].mxu0  ;;  %v4503_v32 = vpop.f32.mrb[62].mxu1 }
 0x227   : > { %v2772_v52 = vadd.f32 %v2771_v43, %v2105_v10  ;;  %v3288_v56 = vadd.f32 %v3287_v20, %v3033_v41  ;;  %v2110_v57 = vadd.f32 %v5561_v38, %v2109_v48  ;;  %v4435_v4 = vpop.f32.mrb[122].mxu0  ;;  %v2384_v20 = vpop.f32.mrb[63].mxu1 }
 0x228   : > { %3559 = vst [vmem:[%s5334_s15 + $0x3d0] sm:$0xff] %v2118_v47  ;;  %v2121_v7 = vadd.f32 %v5561_v38, %v4435_v4  ;;  %v2112_v8 = vpop.f32.mrb[123].mxu0  ;;  %v3037_v34 = vmul.f32 %v2118_v47, %v2118_v47 }
 0x229   : > { %v3289_v10 = vadd.f32 %v3288_v56, %v3034_v42  ;;  %v2773_v11 = vadd.f32 %v2772_v52, %v2110_v57  ;;  %v3035_v15 = vmul.f32 %v2110_v57, %v2110_v57  ;;  %3557 = vst [vmem:[%s5334_s15 + $0x3c0] sm:$0xff] %v2110_v57  ;;  %v2113_v16 = vadd.f32 %v5561_v38, %v2112_v8  ;;  %v5911_v38 = vld [vmem:[#allocation5] ss:$0 sm:$0xff] }
 0x22a   : > { %3560 = vst [vmem:[%s5334_s15 + $0x3d8] sm:$0xff] %v2121_v7  ;;  %v3038_v35 = vmul.f32 %v2121_v7, %v2121_v7  ;;  %v5915_v48 = vadd.f32 %v5911_v38, %v4502_v17  ;;  %v5918_v52 = vadd.f32 %v5911_v38, %v2381_v29 }
 0x22b   : > { %v3290_v18 = vadd.f32 %v3289_v10, %v3035_v15  ;;  %v2774_v27 = vadd.f32 %v2773_v11, %v2113_v16  ;;  %v3036_v28 = vmul.f32 %v2113_v16, %v2113_v16  ;;  %3558 = vst [vmem:[%s5334_s15 + $0x3c8] sm:$0xff] %v2113_v16  ;;  %v5925_v10 = vadd.f32 %v5911_v38, %v2384_v20 }
 0x22c   : > { %3627 = vst [vmem:[%s5334_s15 + $0x5f0] sm:$0xff] %v5915_v48  ;;  %3625 = vst [vmem:[%s5334_s15 + $0x5e0] sm:$0xff] %v5918_v52 }
 0x22d   : > { %v2775_v41 = vadd.f32 %v2774_v27, %v2118_v47  ;;  %v3291_v42 = vadd.f32 %v3290_v18, %v3036_v28  ;;  %v4438_v43 = vpop.f32.mrb[124].mxu0  ;;  %v5921_v47 = vadd.f32 %v5911_v38, %v4503_v32  ;;  %3626 = vst [vmem:[%s5334_s15 + $0x5e8] sm:$0xff] %v5925_v10  ;;  %v4506_v27 = vpop.f32.mrb[64].mxu1 }
 0x22e   : > { %v2134_v45 = vadd.f32 %v5911_v38, %v4438_v43  ;;  %v2125_v46 = vpop.f32.mrb[125].mxu0 }
 0x22f   : > { %v2776_v56 = vadd.f32 %v2775_v41, %v2121_v7  ;;  %v3292_v57 = vadd.f32 %v3291_v42, %v3037_v34  ;;  %v2126_v4 = vadd.f32 %v5911_v38, %v2125_v46  ;;  %v4439_v8 = vpop.f32.mrb[126].mxu0  ;;  %3628 = vst [vmem:[%s5334_s15 + $0x5f8] sm:$0xff] %v5921_v47  ;;  %v2397_v34 = vpop.f32.mrb[65].mxu1  ;;  %v5942_v46 = vadd.f32 %v5911_v38, %v4506_v27 }
 0x230   : > { %3563 = vst [vmem:[%s5334_s15 + $0x3f0] sm:$0xff] %v2134_v45  ;;  %v2137_v11 = vadd.f32 %v5911_v38, %v4439_v8  ;;  %v2128_v15 = vpop.f32.mrb[127].mxu0  ;;  %v4507_v41 = vpop.f32.mrb[66].mxu1 }
 0x231   : > { %v3293_v7 = vadd.f32 %v3292_v57, %v3038_v35  ;;  %v2777_v16 = vadd.f32 %v2776_v56, %v2126_v4  ;;  %v3039_v17 = vmul.f32 %v2126_v4, %v2126_v4  ;;  %3561 = vst [vmem:[%s5334_s15 + $0x3e0] sm:$0xff] %v2126_v4  ;;  %v2129_v18 = vadd.f32 %v5911_v38, %v2128_v15  ;;  %v2400_v20 = vpop.f32.mrb[67].mxu1 }
 0x232   : > { %3564 = vst [vmem:[%s5334_s15 + $0x3f8] sm:$0xff] %v2137_v11  ;;  %v3041_v35 = vmul.f32 %v2134_v45, %v2134_v45  ;;  %v5945_v56 = vadd.f32 %v5911_v38, %v2397_v34  ;;  %v5948_v57 = vadd.f32 %v5911_v38, %v4507_v41  ;;  %v5951_v4 = vadd.f32 %v5911_v38, %v2400_v20  ;;  %v4510_v27 = vpop.f32.mrb[68].mxu1 }
 0x233   : > { %v3294_v28 = vadd.f32 %v3293_v7, %v3039_v17  ;;  %v2778_v29 = vadd.f32 %v2777_v16, %v2129_v18  ;;  %v3040_v32 = vmul.f32 %v2129_v18, %v2129_v18  ;;  %3562 = vst [vmem:[%s5334_s15 + $0x3e8] sm:$0xff] %v2129_v18  ;;  %v3042_v8 = vmul.f32 %v2137_v11, %v2137_v11  ;;  %v2413_v34 = vpop.f32.mrb[69].mxu1 }
 0x234   : > { %6776 = vst [vmem:[#allocation15_spill] sm:$0xff] %v5948_v57  ;;  %3631 = vst [vmem:[%s5334_s15 + $0x610] sm:$0xff] %v5942_v46  ;;  %v4511_v41 = vpop.f32.mrb[70].mxu1 }
 0x235   : > { %v2779_v42 = vadd.f32 %v2778_v29, %v2134_v45  ;;  %v3295_v43 = vadd.f32 %v3294_v28, %v3040_v32  ;;  %v4785_v45 = vld [vmem:[%s5334_s15 + $0x400] sm:$0xff]  ;;  %3629 = vst [vmem:[%s5334_s15 + $0x600] sm:$0xff] %v5945_v56  ;;  %3632 = vst [vmem:[%s5334_s15 + $0x618] sm:$0xff] %v5948_v57  ;;  %v4786_v29 = vld [vmem:[%s5334_s15 + $0x408] sm:$0xff]  ;;  %v2416_v57 = vpop.f32.mrb[71].mxu1 }
 0x236   : > { %v3043_v16 = vmul.f32 %v4785_v45, %v4785_v45  ;;  %3630 = vst [vmem:[%s5334_s15 + $0x608] sm:$0xff] %v5951_v4 }
 0x237   : > { %v2780_v15 = vadd.f32 %v2779_v42, %v2137_v11  ;;  %v3296_v7 = vadd.f32 %v3295_v43, %v3041_v35  ;;  %v3044_v11 = vmul.f32 %v4786_v29, %v4786_v29  ;;  %v4787_v35 = vld [vmem:[%s5334_s15 + $0x410] sm:$0xff] }
 0x238   : > { %v3045_v42 = vmul.f32 %v4787_v35, %v4787_v35 }
 0x239   : > { %v3297_v17 = vadd.f32 %v3296_v7, %v3042_v8  ;;  %v2781_v18 = vadd.f32 %v4785_v45, %v2780_v15  ;;  %v5965_v8 = vadd.f32 %v5911_v38, %v4510_v27  ;;  %v5968_v15 = vadd.f32 %v5911_v38, %v2413_v34  ;;  %v4514_v34 = vpop.f32.mrb[72].mxu1 }
 0x23a   : > { %v5971_v7 = vadd.f32 %v5911_v38, %v4511_v41  ;;  %v5974_v45 = vadd.f32 %v5911_v38, %v2416_v57  ;;  %v4790_v41 = vld [vmem:[%s5334_s15 + $0x428] sm:$0xff] }
 0x23b   : > { %v3298_v28 = vadd.f32 %v3297_v17, %v3043_v16  ;;  %v2782_v32 = vadd.f32 %v4786_v29, %v2781_v18  ;;  %6777 = vst [vmem:[#allocation16_spill] sm:$0xff] %v5965_v8  ;;  %6778 = vst [vmem:[#allocation17_spill] sm:$0xff] %v5968_v15  ;;  %v4788_v16 = vld [vmem:[%s5334_s15 + $0x418] sm:$0xff] }
 0x23c   : > { %6779 = vst [vmem:[#allocation18_spill] sm:$0xff] %v5971_v7  ;;  %6780 = vst [vmem:[#allocation19_spill] sm:$0xff] %v5974_v45  ;;  %v3046_v17 = vmul.f32 %v4788_v16, %v4788_v16 }
 0x23d   : > { %v2783_v43 = vadd.f32 %v4787_v35, %v2782_v32  ;;  %v3299_v20 = vadd.f32 %v3298_v28, %v3044_v11  ;;  %v4789_v28 = vld [vmem:[%s5334_s15 + $0x420] sm:$0xff]  ;;  %3635 = vst [vmem:[%s5334_s15 + $0x630] sm:$0xff] %v5965_v8  ;;  %3633 = vst [vmem:[%s5334_s15 + $0x620] sm:$0xff] %v5968_v15 }
 0x23e   : > { %v3047_v32 = vmul.f32 %v4789_v28, %v4789_v28  ;;  %3636 = vst [vmem:[%s5334_s15 + $0x638] sm:$0xff] %v5971_v7  ;;  %3634 = vst [vmem:[%s5334_s15 + $0x628] sm:$0xff] %v5974_v45 }
 0x23f   : > { %v2784_v18 = vadd.f32 %v4788_v16, %v2783_v43  ;;  %v3300_v29 = vadd.f32 %v3299_v20, %v3045_v42  ;;  %v3048_v43 = vmul.f32 %v4790_v41, %v4790_v41  ;;  %v2429_v42 = vpop.f32.mrb[73].mxu1  ;;  %v4791_v16 = vld [vmem:[%s5334_s15 + $0x430] sm:$0xff] }
 0x240   : > { %v4515_v20 = vpop.f32.mrb[74].mxu1  ;;  %v3049_v8 = vmul.f32 %v4791_v16, %v4791_v16 }
 0x241   : > { %v3301_v27 = vadd.f32 %v3300_v29, %v3046_v17  ;;  %v2785_v11 = vadd.f32 %v4789_v28, %v2784_v18  ;;  %v2432_v45 = vpop.f32.mrb[75].mxu1  ;;  %v5989_v17 = vadd.f32 %v5911_v38, %v4514_v34  ;;  %v5992_v18 = vadd.f32 %v5911_v38, %v2429_v42 }
 0x242   : > { %v5995_v29 = vadd.f32 %v5911_v38, %v4515_v20  ;;  %v5998_v28 = vadd.f32 %v5911_v38, %v2432_v45  ;;  %v4518_v42 = vpop.f32.mrb[76].mxu1  ;;  %v4794_v20 = vld [vmem:[%s5334_s15 + $0x448] sm:$0xff] }
 0x243   : > { %v3302_v57 = vadd.f32 %v3301_v27, %v3047_v32  ;;  %v2786_v35 = vadd.f32 %v4790_v41, %v2785_v11  ;;  %6781 = vst [vmem:[#allocation20_spill] sm:$0xff] %v5989_v17  ;;  %6782 = vst [vmem:[#allocation21_spill] sm:$0xff] %v5992_v18  ;;  %v4792_v32 = vld [vmem:[%s5334_s15 + $0x438] sm:$0xff] }
 0x244   : > { %6783 = vst [vmem:[#allocation22_spill] sm:$0xff] %v5995_v29  ;;  %6784 = vst [vmem:[#allocation23_spill] sm:$0xff] %v5998_v28  ;;  %v3050_v27 = vmul.f32 %v4792_v32, %v4792_v32 }
 0x245   : > { %v2787_v15 = vadd.f32 %v4791_v16, %v2786_v35  ;;  %v3303_v7 = vadd.f32 %v3302_v57, %v3048_v43  ;;  %v4793_v57 = vld [vmem:[%s5334_s15 + $0x440] sm:$0xff]  ;;  %3639 = vst [vmem:[%s5334_s15 + $0x650] sm:$0xff] %v5989_v17  ;;  %3637 = vst [vmem:[%s5334_s15 + $0x640] sm:$0xff] %v5992_v18 }
 0x246   : > { %v3051_v35 = vmul.f32 %v4793_v57, %v4793_v57  ;;  %3640 = vst [vmem:[%s5334_s15 + $0x658] sm:$0xff] %v5995_v29  ;;  %3638 = vst [vmem:[%s5334_s15 + $0x648] sm:$0xff] %v5998_v28 }
 0x247   : > { %v2788_v11 = vadd.f32 %v4792_v32, %v2787_v15  ;;  %v3304_v41 = vadd.f32 %v3303_v7, %v3049_v8  ;;  %v3052_v15 = vmul.f32 %v4794_v20, %v4794_v20  ;;  %v2445_v8 = vpop.f32.mrb[77].mxu1  ;;  %v4795_v32 = vld [vmem:[%s5334_s15 + $0x450] sm:$0xff] }
 0x248   : > { %v4519_v7 = vpop.f32.mrb[78].mxu1  ;;  %v3053_v17 = vmul.f32 %v4795_v32, %v4795_v32 }
 0x249   : > { %v3305_v34 = vadd.f32 %v3304_v41, %v3050_v27  ;;  %v2789_v43 = vadd.f32 %v4793_v57, %v2788_v11  ;;  %v2448_v28 = vpop.f32.mrb[79].mxu1  ;;  %v6013_v27 = vadd.f32 %v5911_v38, %v4518_v42  ;;  %v6016_v11 = vadd.f32 %v5911_v38, %v2445_v8 }
 0x24a   : > { %v6019_v41 = vadd.f32 %v5911_v38, %v4519_v7  ;;  %v6022_v57 = vadd.f32 %v5911_v38, %v2448_v28  ;;  %v4522_v8 = vpop.f32.mrb[80].mxu1  ;;  %v4798_v7 = vld [vmem:[%s5334_s15 + $0x468] sm:$0xff] }
 0x24b   : > { %v3306_v45 = vadd.f32 %v3305_v34, %v3051_v35  ;;  %v2790_v16 = vadd.f32 %v4794_v20, %v2789_v43  ;;  %6785 = vst [vmem:[#allocation24_spill] sm:$0xff] %v6013_v27  ;;  %6786 = vst [vmem:[#allocation25_spill] sm:$0xff] %v6016_v11  ;;  %v4796_v35 = vld [vmem:[%s5334_s15 + $0x458] sm:$0xff] }
 0x24c   : > { %6787 = vst [vmem:[#allocation26_spill] sm:$0xff] %v6019_v41  ;;  %6788 = vst [vmem:[#allocation27_spill] sm:$0xff] %v6022_v57  ;;  %v3054_v34 = vmul.f32 %v4796_v35, %v4796_v35 }
 0x24d   : > { %v2791_v18 = vadd.f32 %v4795_v32, %v2790_v16  ;;  %v3307_v29 = vadd.f32 %v3306_v45, %v3052_v15  ;;  %v4797_v45 = vld [vmem:[%s5334_s15 + $0x460] sm:$0xff]  ;;  %3643 = vst [vmem:[%s5334_s15 + $0x670] sm:$0xff] %v6013_v27  ;;  %3641 = vst [vmem:[%s5334_s15 + $0x660] sm:$0xff] %v6016_v11 }
 0x24e   : > { %v3055_v16 = vmul.f32 %v4797_v45, %v4797_v45  ;;  %3644 = vst [vmem:[%s5334_s15 + $0x678] sm:$0xff] %v6019_v41  ;;  %3642 = vst [vmem:[%s5334_s15 + $0x668] sm:$0xff] %v6022_v57 }
 0x24f   : > { %v2792_v43 = vadd.f32 %v4796_v35, %v2791_v18  ;;  %v3308_v20 = vadd.f32 %v3307_v29, %v3053_v17  ;;  %v3056_v18 = vmul.f32 %v4798_v7, %v4798_v7  ;;  %v2461_v17 = vpop.f32.mrb[81].mxu1  ;;  %v4799_v35 = vld [vmem:[%s5334_s15 + $0x470] sm:$0xff] }
 0x250   : > { %v4523_v29 = vpop.f32.mrb[82].mxu1  ;;  %v3057_v27 = vmul.f32 %v4799_v35, %v4799_v35 }
 0x251   : > { %v3309_v42 = vadd.f32 %v3308_v20, %v3054_v34  ;;  %v2793_v15 = vadd.f32 %v4797_v45, %v2792_v43  ;;  %v2464_v57 = vpop.f32.mrb[83].mxu1  ;;  %v6037_v34 = vadd.f32 %v5911_v38, %v4522_v8  ;;  %v6040_v43 = vadd.f32 %v5911_v38, %v2461_v17 }
 0x252   : > { %v6043_v20 = vadd.f32 %v5911_v38, %v4523_v29  ;;  %v6046_v45 = vadd.f32 %v5911_v38, %v2464_v57  ;;  %v4526_v17 = vpop.f32.mrb[84].mxu1  ;;  %v4802_v29 = vld [vmem:[%s5334_s15 + $0x488] sm:$0xff] }
 0x253   : > { %v3310_v28 = vadd.f32 %v3309_v42, %v3055_v16  ;;  %v2794_v32 = vadd.f32 %v4798_v7, %v2793_v15  ;;  %6789 = vst [vmem:[#allocation28_spill] sm:$0xff] %v6037_v34  ;;  %6790 = vst [vmem:[#allocation29_spill] sm:$0xff] %v6040_v43  ;;  %v4800_v16 = vld [vmem:[%s5334_s15 + $0x478] sm:$0xff] }
 0x254   : > { %6791 = vst [vmem:[#allocation30_spill] sm:$0xff] %v6043_v20  ;;  %6792 = vst [vmem:[#allocation31_spill] sm:$0xff] %v6046_v45  ;;  %v3058_v42 = vmul.f32 %v4800_v16, %v4800_v16 }
 0x255   : > { %v2795_v11 = vadd.f32 %v4799_v35, %v2794_v32  ;;  %v3311_v41 = vadd.f32 %v3310_v28, %v3056_v18  ;;  %v4801_v28 = vld [vmem:[%s5334_s15 + $0x480] sm:$0xff]  ;;  %3647 = vst [vmem:[%s5334_s15 + $0x690] sm:$0xff] %v6037_v34  ;;  %3645 = vst [vmem:[%s5334_s15 + $0x680] sm:$0xff] %v6040_v43 }
 0x256   : > { %v3059_v32 = vmul.f32 %v4801_v28, %v4801_v28  ;;  %3648 = vst [vmem:[%s5334_s15 + $0x698] sm:$0xff] %v6043_v20  ;;  %3646 = vst [vmem:[%s5334_s15 + $0x688] sm:$0xff] %v6046_v45 }
 0x257   : > { %v2796_v15 = vadd.f32 %v4800_v16, %v2795_v11  ;;  %v3312_v7 = vadd.f32 %v3311_v41, %v3057_v27  ;;  %v3060_v11 = vmul.f32 %v4802_v29, %v4802_v29  ;;  %v2477_v27 = vpop.f32.mrb[85].mxu1  ;;  %v4803_v16 = vld [vmem:[%s5334_s15 + $0x490] sm:$0xff] }
 0x258   : > { %v4527_v41 = vpop.f32.mrb[86].mxu1  ;;  %v3061_v34 = vmul.f32 %v4803_v16, %v4803_v16 }
 0x259   : > { %v3313_v8 = vadd.f32 %v3312_v7, %v3058_v42  ;;  %v2797_v18 = vadd.f32 %v4801_v28, %v2796_v15  ;;  %v2480_v45 = vpop.f32.mrb[87].mxu1  ;;  %v6061_v42 = vadd.f32 %v5911_v38, %v4526_v17  ;;  %v6064_v15 = vadd.f32 %v5911_v38, %v2477_v27 }
 0x25a   : > { %v6067_v7 = vadd.f32 %v5911_v38, %v4527_v41  ;;  %v6070_v28 = vadd.f32 %v5911_v38, %v2480_v45  ;;  %v4806_v41 = vld [vmem:[%s5334_s15 + $0x4b0] sm:$0xff] }
 0x25b   : > { %v3314_v57 = vadd.f32 %v3313_v8, %v3059_v32  ;;  %v2798_v35 = vadd.f32 %v4802_v29, %v2797_v18  ;;  %6793 = vst [vmem:[#allocation32_spill] sm:$0xff] %v6061_v42  ;;  %v4804_v32 = vld [vmem:[%s5334_s15 + $0x498] sm:$0xff]  ;;  %3651 = vst [vmem:[%s5334_s15 + $0x6b0] sm:$0xff] %v6061_v42 }
 0x25c   : > { %6794 = vst [vmem:[#allocation33_spill] sm:$0xff] %v6067_v7  ;;  %v3062_v8 = vmul.f32 %v4804_v32, %v4804_v32  ;;  %3649 = vst [vmem:[%s5334_s15 + $0x6a0] sm:$0xff] %v6064_v15 }
 0x25d   : > { %v2799_v43 = vadd.f32 %v4803_v16, %v2798_v35  ;;  %v3315_v20 = vadd.f32 %v3314_v57, %v3060_v11  ;;  %v3063_v57 = vmul.f32 %v5643_v31, %v5643_v31  ;;  %3652 = vst [vmem:[%s5334_s15 + $0x6b8] sm:$0xff] %v6067_v7  ;;  %3650 = vst [vmem:[%s5334_s15 + $0x6a8] sm:$0xff] %v6070_v28  ;;  %v4805_v35 = vld [vmem:[%s5334_s15 + $0x4a0] sm:$0xff]  ;;  %v4530_v11 = vpop.f32.mrb[88].mxu1 }
 0x25e   : > { %v2493_v31 = vpop.f32.mrb[89].mxu1  ;;  %v3065_v16 = vmul.f32 %v4806_v41, %v4806_v41 }
 0x25f   : > { %v2800_v18 = vadd.f32 %v4804_v32, %v2799_v43  ;;  %v3316_v29 = vadd.f32 %v3315_v20, %v3061_v34  ;;  %v3064_v34 = vmul.f32 %v5648_v37, %v5648_v37  ;;  %v4531_v20 = vpop.f32.mrb[90].mxu1 }
 0x261   : > { %v3317_v17 = vadd.f32 %v3316_v29, %v3062_v8  ;;  %v2801_v45 = vadd.f32 %v4805_v35, %v2800_v18  ;;  %v2496_v29 = vpop.f32.mrb[91].mxu1  ;;  %v6089_v18 = vadd.f32 %v5911_v38, %v4530_v11  ;;  %v4807_v35 = vld [vmem:[%s5334_s15 + $0x4b8] sm:$0xff] }
 0x263   : > { %v3318_v27 = vadd.f32 %v3317_v17, %v3063_v57  ;;  %v2802_v43 = vadd.f32 %v2801_v45, %v5648_v37  ;;  %v6092_v57 = vadd.f32 %v5911_v38, %v2493_v31  ;;  %v6095_v17 = vadd.f32 %v5911_v38, %v4531_v20  ;;  %3655 = vst [vmem:[%s5334_s15 + $0x6d0] sm:$0xff] %v6089_v18 }
 0x264   : > { %v6098_v37 = vadd.f32 %v5911_v38, %v2496_v29  ;;  %v3066_v45 = vmul.f32 %v4807_v35, %v4807_v35 }
 0x265   : > { %v2803_v32 = vadd.f32 %v4806_v41, %v2802_v43  ;;  %v3319_v8 = vadd.f32 %v3318_v27, %v3064_v34  ;;  %6795 = vst [vmem:[#allocation34_spill] sm:$0xff] %v6095_v17  ;;  %v3067_v27 = vmul.f32 %v5667_v59, %v5667_v59  ;;  %3653 = vst [vmem:[%s5334_s15 + $0x6c0] sm:$0xff] %v6092_v57  ;;  %v4534_v34 = vpop.f32.mrb[92].mxu1 }
 0x266   : > { %3656 = vst [vmem:[%s5334_s15 + $0x6d8] sm:$0xff] %v6095_v17  ;;  %3654 = vst [vmem:[%s5334_s15 + $0x6c8] sm:$0xff] %v6098_v37  ;;  %v3068_v41 = vmul.f32 %v5672_v1, %v5672_v1 }
 0x267   : > { %v2804_v7 = vadd.f32 %v4807_v35, %v2803_v32  ;;  %v3320_v42 = vadd.f32 %v3319_v8, %v3065_v16  ;;  %v2509_v16 = vpop.f32.mrb[93].mxu1  ;;  %v3069_v8 = vmul.f32 %v5664_v58, %v5664_v58 }
 0x268   : > { %v4535_v32 = vpop.f32.mrb[94].mxu1  ;;  %v6122_v35 = vadd.f32 %v5911_v38, %v2509_v16 }
 0x269   : > { %v3321_v11 = vadd.f32 %v3320_v42, %v3066_v45  ;;  %v2805_v43 = vadd.f32 %v2804_v7, %v5667_v59  ;;  %v2512_v59 = vpop.f32.mrb[95].mxu1  ;;  %v6119_v7 = vadd.f32 %v5911_v38, %v4534_v34 }
 0x26a   : > { %v6128_v45 = vadd.f32 %v5911_v38, %v2512_v59  ;;  %3657 = vst [vmem:[%s5334_s15 + $0x6e0] sm:$0xff] %v6122_v35 }
 0x26b   : > { %v3322_v31 = vadd.f32 %v3321_v11, %v3067_v27  ;;  %v2806_v20 = vadd.f32 %v2805_v43, %v5672_v1  ;;  %v6125_v1 = vadd.f32 %v5911_v38, %v4535_v32  ;;  %v4808_v27 = vld [vmem:[%s5334_s15 + $0x4d8] sm:$0xff]  ;;  %3659 = vst [vmem:[%s5334_s15 + $0x6f0] sm:$0xff] %v6119_v7  ;;  %v3072_v32 = vmul.f32 %v5699_v30, %v5699_v30 }
 0x26c   : > { %v3070_v11 = vmul.f32 %v4808_v27, %v4808_v27  ;;  %3658 = vst [vmem:[%s5334_s15 + $0x6e8] sm:$0xff] %v6128_v45 }
 0x26d   : > { %v2807_v42 = vadd.f32 %v2806_v20, %v5664_v58  ;;  %v3323_v29 = vadd.f32 %v3322_v31, %v3068_v41  ;;  %v3071_v58 = vmul.f32 %v5692_v24, %v5692_v24  ;;  %3660 = vst [vmem:[%s5334_s15 + $0x6f8] sm:$0xff] %v6125_v1  ;;  %v4538_v20 = vpop.f32.mrb[96].mxu1 }
 0x26f   : > { %v2808_v43 = vadd.f32 %v4808_v27, %v2807_v42  ;;  %v3324_v17 = vadd.f32 %v3323_v29, %v3069_v8  ;;  %v2525_v8 = vpop.f32.mrb[97].mxu1  ;;  %v3073_v29 = vmul.f32 %v5689_v23, %v5689_v23  ;;  %v6149_v27 = vadd.f32 %v5911_v38, %v4538_v20 }
 0x270   : > { %v4539_v42 = vpop.f32.mrb[98].mxu1 }
 0x271   : > { %v3325_v34 = vadd.f32 %v3324_v17, %v3070_v11  ;;  %v2809_v31 = vadd.f32 %v2808_v43, %v5692_v24  ;;  %v2528_v24 = vpop.f32.mrb[99].mxu1  ;;  %v6152_v11 = vadd.f32 %v5911_v38, %v2525_v8  ;;  %3663 = vst [vmem:[%s5334_s15 + $0x710] sm:$0xff] %v6149_v27 }
 0x272   : > { %v6158_v43 = vadd.f32 %v5911_v38, %v2528_v24 }
 0x273   : > { %v3326_v41 = vadd.f32 %v3325_v34, %v3071_v58  ;;  %v2810_v16 = vadd.f32 %v2809_v31, %v5699_v30  ;;  %v6155_v30 = vadd.f32 %v5911_v38, %v4539_v42  ;;  %v3074_v58 = vmul.f32 %v5695_v25, %v5695_v25  ;;  %3661 = vst [vmem:[%s5334_s15 + $0x700] sm:$0xff] %v6152_v11 }
 0x274   : > { %v3075_v31 = vmul.f32 %v5720_v54, %v5720_v54  ;;  %3662 = vst [vmem:[%s5334_s15 + $0x708] sm:$0xff] %v6158_v43 }
 0x275   : > { %v2811_v17 = vadd.f32 %v2810_v16, %v5689_v23  ;;  %v3327_v59 = vadd.f32 %v3326_v41, %v3072_v32  ;;  %3664 = vst [vmem:[%s5334_s15 + $0x718] sm:$0xff] %v6155_v30  ;;  %v4542_v16 = vpop.f32.mrb[100].mxu1 }
 0x276   : > { %v2541_v42 = vpop.f32.mrb[101].mxu1 }
 0x277   : > { %v2812_v34 = vadd.f32 %v2811_v17, %v5695_v25  ;;  %v3328_v23 = vadd.f32 %v3327_v59, %v3073_v29  ;;  %v3076_v25 = vmul.f32 %v5727_v62, %v5727_v62  ;;  %v4543_v29 = vpop.f32.mrb[102].mxu1  ;;  %v3077_v17 = vmul.f32 %v5717_v53, %v5717_v53 }
 0x279   : > { %v3329_v20 = vadd.f32 %v3328_v23, %v3074_v58  ;;  %v2813_v41 = vadd.f32 %v2812_v34, %v5720_v54  ;;  %v2544_v54 = vpop.f32.mrb[103].mxu1  ;;  %v6181_v58 = vadd.f32 %v5911_v38, %v4542_v16  ;;  %v6184_v34 = vadd.f32 %v5911_v38, %v2541_v42 }
 0x27a   : > { %v6190_v23 = vadd.f32 %v5911_v38, %v2544_v54 }
 0x27b   : > { %v3330_v32 = vadd.f32 %v3329_v20, %v3075_v31  ;;  %v2814_v8 = vadd.f32 %v2813_v41, %v5727_v62  ;;  %v6187_v62 = vadd.f32 %v5911_v38, %v4543_v29  ;;  %v3078_v31 = vmul.f32 %v5723_v55, %v5723_v55  ;;  %3667 = vst [vmem:[%s5334_s15 + $0x730] sm:$0xff] %v6181_v58 }
 0x27c   : > { %v3079_v41 = vmul.f32 %v5748_v22, %v5748_v22  ;;  %3665 = vst [vmem:[%s5334_s15 + $0x720] sm:$0xff] %v6184_v34  ;;  %3666 = vst [vmem:[%s5334_s15 + $0x728] sm:$0xff] %v6190_v23 }
 0x27d   : > { %v2815_v59 = vadd.f32 %v2814_v8, %v5717_v53  ;;  %v3331_v24 = vadd.f32 %v3330_v32, %v3076_v25  ;;  %3668 = vst [vmem:[%s5334_s15 + $0x738] sm:$0xff] %v6187_v62  ;;  %v4546_v8 = vpop.f32.mrb[104].mxu1 }
 0x27e   : > { %v2557_v29 = vpop.f32.mrb[105].mxu1 }
 0x27f   : > { %v2816_v20 = vadd.f32 %v2815_v59, %v5723_v55  ;;  %v3332_v53 = vadd.f32 %v3331_v24, %v3077_v17  ;;  %v3080_v55 = vmul.f32 %v5755_v33, %v5755_v33  ;;  %v4547_v17 = vpop.f32.mrb[106].mxu1  ;;  %v3081_v59 = vmul.f32 %v5745_v21, %v5745_v21 }
 0x281   : > { %v3333_v16 = vadd.f32 %v3332_v53, %v3078_v31  ;;  %v2817_v32 = vadd.f32 %v2816_v20, %v5748_v22  ;;  %v2560_v22 = vpop.f32.mrb[107].mxu1  ;;  %v6213_v31 = vadd.f32 %v5911_v38, %v4546_v8  ;;  %v6216_v20 = vadd.f32 %v5911_v38, %v2557_v29 }
 0x282   : > { %v6222_v53 = vadd.f32 %v5911_v38, %v2560_v22 }
 0x283   : > { %v3334_v25 = vadd.f32 %v3333_v16, %v3079_v41  ;;  %v2818_v42 = vadd.f32 %v2817_v32, %v5755_v33  ;;  %v6219_v33 = vadd.f32 %v5911_v38, %v4547_v17  ;;  %v3082_v41 = vmul.f32 %v5751_v26, %v5751_v26  ;;  %3671 = vst [vmem:[%s5334_s15 + $0x750] sm:$0xff] %v6213_v31 }
 0x284   : > { %v3083_v32 = vmul.f32 %v5776_v61, %v5776_v61  ;;  %3669 = vst [vmem:[%s5334_s15 + $0x740] sm:$0xff] %v6216_v20  ;;  %3670 = vst [vmem:[%s5334_s15 + $0x748] sm:$0xff] %v6222_v53 }
 0x285   : > { %v2819_v24 = vadd.f32 %v2818_v42, %v5745_v21  ;;  %v3335_v54 = vadd.f32 %v3334_v25, %v3080_v55  ;;  %3672 = vst [vmem:[%s5334_s15 + $0x758] sm:$0xff] %v6219_v33  ;;  %v4550_v42 = vpop.f32.mrb[108].mxu1 }
 0x286   : > { %v2573_v17 = vpop.f32.mrb[109].mxu1 }
 0x287   : > { %v2820_v16 = vadd.f32 %v2819_v24, %v5751_v26  ;;  %v3336_v21 = vadd.f32 %v3335_v54, %v3081_v59  ;;  %v3084_v26 = vmul.f32 %v5783_v5, %v5783_v5  ;;  %v4551_v59 = vpop.f32.mrb[110].mxu1  ;;  %v3085_v24 = vmul.f32 %v5773_v60, %v5773_v60 }
 0x289   : > { %v3337_v8 = vadd.f32 %v3336_v21, %v3082_v41  ;;  %v2821_v25 = vadd.f32 %v2820_v16, %v5776_v61  ;;  %v2576_v61 = vpop.f32.mrb[111].mxu1  ;;  %v6245_v41 = vadd.f32 %v5911_v38, %v4550_v42  ;;  %v6248_v16 = vadd.f32 %v5911_v38, %v2573_v17 }
 0x28a   : > { %v6254_v21 = vadd.f32 %v5911_v38, %v2576_v61 }
 0x28b   : > { %v3338_v55 = vadd.f32 %v3337_v8, %v3083_v32  ;;  %v2822_v29 = vadd.f32 %v2821_v25, %v5783_v5  ;;  %v6251_v5 = vadd.f32 %v5911_v38, %v4551_v59  ;;  %v3086_v32 = vmul.f32 %v5779_v63, %v5779_v63  ;;  %3675 = vst [vmem:[%s5334_s15 + $0x770] sm:$0xff] %v6245_v41 }
 0x28c   : > { %v3087_v25 = vmul.f32 %v5804_v39, %v5804_v39  ;;  %3673 = vst [vmem:[%s5334_s15 + $0x760] sm:$0xff] %v6248_v16  ;;  %3674 = vst [vmem:[%s5334_s15 + $0x768] sm:$0xff] %v6254_v21 }
 0x28d   : > { %v2823_v54 = vadd.f32 %v2822_v29, %v5773_v60  ;;  %v3339_v22 = vadd.f32 %v3338_v55, %v3084_v26  ;;  %3676 = vst [vmem:[%s5334_s15 + $0x778] sm:$0xff] %v6251_v5  ;;  %v4554_v29 = vpop.f32.mrb[112].mxu1 }
 0x28e   : > { %v2589_v59 = vpop.f32.mrb[113].mxu1 }
 0x28f   : > { %v2824_v8 = vadd.f32 %v2823_v54, %v5779_v63  ;;  %v3340_v60 = vadd.f32 %v3339_v22, %v3085_v24  ;;  %v3088_v63 = vmul.f32 %v5811_v44, %v5811_v44  ;;  %v4555_v24 = vpop.f32.mrb[114].mxu1  ;;  %v3089_v54 = vmul.f32 %v5801_v36, %v5801_v36 }
 0x291   : > { %v3341_v42 = vadd.f32 %v3340_v60, %v3086_v32  ;;  %v2825_v55 = vadd.f32 %v2824_v8, %v5804_v39  ;;  %v2592_v39 = vpop.f32.mrb[115].mxu1  ;;  %v6277_v32 = vadd.f32 %v5911_v38, %v4554_v29  ;;  %v6280_v8 = vadd.f32 %v5911_v38, %v2589_v59 }
 0x292   : > { %v6286_v60 = vadd.f32 %v5911_v38, %v2592_v39 }
 0x293   : > { %v3342_v26 = vadd.f32 %v3341_v42, %v3087_v25  ;;  %v2826_v17 = vadd.f32 %v2825_v55, %v5811_v44  ;;  %v6283_v44 = vadd.f32 %v5911_v38, %v4555_v24  ;;  %v3090_v25 = vmul.f32 %v5807_v40, %v5807_v40  ;;  %3679 = vst [vmem:[%s5334_s15 + $0x790] sm:$0xff] %v6277_v32 }
 0x294   : > { %v3091_v55 = vmul.f32 %v5832_v13, %v5832_v13  ;;  %3677 = vst [vmem:[%s5334_s15 + $0x780] sm:$0xff] %v6280_v8  ;;  %3678 = vst [vmem:[%s5334_s15 + $0x788] sm:$0xff] %v6286_v60 }
 0x295   : > { %v2827_v22 = vadd.f32 %v2826_v17, %v5801_v36  ;;  %v3343_v61 = vadd.f32 %v3342_v26, %v3088_v63  ;;  %3680 = vst [vmem:[%s5334_s15 + $0x798] sm:$0xff] %v6283_v44  ;;  %v4558_v17 = vpop.f32.mrb[116].mxu1 }
 0x296   : > { %v2605_v24 = vpop.f32.mrb[117].mxu1 }
 0x297   : > { %v2828_v42 = vadd.f32 %v2827_v22, %v5807_v40  ;;  %v3344_v36 = vadd.f32 %v3343_v61, %v3089_v54  ;;  %v3092_v40 = vmul.f32 %v5839_v19, %v5839_v19  ;;  %v4559_v54 = vpop.f32.mrb[118].mxu1  ;;  %v3093_v22 = vmul.f32 %v5829_v12, %v5829_v12 }
 0x299   : > { %v3345_v29 = vadd.f32 %v3344_v36, %v3090_v25  ;;  %v2829_v26 = vadd.f32 %v2828_v42, %v5832_v13  ;;  %v2608_v13 = vpop.f32.mrb[119].mxu1  ;;  %v6309_v25 = vadd.f32 %v5911_v38, %v4558_v17  ;;  %v6312_v42 = vadd.f32 %v5911_v38, %v2605_v24 }
 0x29a   : > { %v6318_v36 = vadd.f32 %v5911_v38, %v2608_v13 }
 0x29b   : > { %v3346_v63 = vadd.f32 %v3345_v29, %v3091_v55  ;;  %v2830_v59 = vadd.f32 %v2829_v26, %v5839_v19  ;;  %v6315_v19 = vadd.f32 %v5911_v38, %v4559_v54  ;;  %v3094_v55 = vmul.f32 %v5835_v14, %v5835_v14  ;;  %3683 = vst [vmem:[%s5334_s15 + $0x7b0] sm:$0xff] %v6309_v25 }
 0x29c   : > { %v3095_v26 = vmul.f32 %v5860_v2, %v5860_v2  ;;  %3681 = vst [vmem:[%s5334_s15 + $0x7a0] sm:$0xff] %v6312_v42  ;;  %3682 = vst [vmem:[%s5334_s15 + $0x7a8] sm:$0xff] %v6318_v36 }
 0x29d   : > { %v2831_v61 = vadd.f32 %v2830_v59, %v5829_v12  ;;  %v3347_v39 = vadd.f32 %v3346_v63, %v3092_v40  ;;  %3684 = vst [vmem:[%s5334_s15 + $0x7b8] sm:$0xff] %v6315_v19  ;;  %v4562_v59 = vpop.f32.mrb[120].mxu1 }
 0x29e   : > { %v2621_v54 = vpop.f32.mrb[121].mxu1 }
 0x29f   : > { %v2832_v29 = vadd.f32 %v2831_v61, %v5835_v14  ;;  %v3348_v12 = vadd.f32 %v3347_v39, %v3093_v22  ;;  %v3096_v14 = vmul.f32 %v5867_v9, %v5867_v9  ;;  %v4563_v22 = vpop.f32.mrb[122].mxu1  ;;  %v3097_v61 = vmul.f32 %v5857_v0, %v5857_v0 }
 0x2a1   : > { %v3349_v17 = vadd.f32 %v3348_v12, %v3094_v55  ;;  %v2833_v63 = vadd.f32 %v2832_v29, %v5860_v2  ;;  %v2624_v2 = vpop.f32.mrb[123].mxu1  ;;  %v6341_v55 = vadd.f32 %v5911_v38, %v4562_v59  ;;  %v6344_v29 = vadd.f32 %v5911_v38, %v2621_v54 }
 0x2a2   : > { %v6350_v12 = vadd.f32 %v5911_v38, %v2624_v2 }
 0x2a3   : > { %v3350_v40 = vadd.f32 %v3349_v17, %v3095_v26  ;;  %v2834_v24 = vadd.f32 %v2833_v63, %v5867_v9  ;;  %v6347_v9 = vadd.f32 %v5911_v38, %v4563_v22  ;;  %v3098_v26 = vmul.f32 %v5863_v3, %v5863_v3  ;;  %3687 = vst [vmem:[%s5334_s15 + $0x7d0] sm:$0xff] %v6341_v55 }
 0x2a4   : > { %v3099_v63 = vmul.f32 %v5888_v50, %v5888_v50  ;;  %3685 = vst [vmem:[%s5334_s15 + $0x7c0] sm:$0xff] %v6344_v29  ;;  %3686 = vst [vmem:[%s5334_s15 + $0x7c8] sm:$0xff] %v6350_v12 }
 0x2a5   : > { %v2835_v39 = vadd.f32 %v2834_v24, %v5857_v0  ;;  %v3351_v13 = vadd.f32 %v3350_v40, %v3096_v14  ;;  %3688 = vst [vmem:[%s5334_s15 + $0x7d8] sm:$0xff] %v6347_v9  ;;  %v4566_v24 = vpop.f32.mrb[124].mxu1 }
 0x2a6   : > { %v2637_v22 = vpop.f32.mrb[125].mxu1 }
 0x2a7   : > { %v2836_v17 = vadd.f32 %v2835_v39, %v5863_v3  ;;  %v3352_v0 = vadd.f32 %v3351_v13, %v3097_v61  ;;  %v3100_v3 = vmul.f32 %v5895_v6, %v5895_v6  ;;  %v4567_v61 = vpop.f32.mrb[126].mxu1  ;;  %v3101_v39 = vmul.f32 %v5885_v49, %v5885_v49 }
 0x2a9   : > { %v3353_v59 = vadd.f32 %v3352_v0, %v3098_v26  ;;  %v2837_v40 = vadd.f32 %v2836_v17, %v5888_v50  ;;  %v2640_v50 = vpop.f32.mrb[127].mxu1  ;;  %v6373_v26 = vadd.f32 %v5911_v38, %v4566_v24  ;;  %v6376_v17 = vadd.f32 %v5911_v38, %v2637_v22 }
 0x2aa   : > { %v6382_v0 = vadd.f32 %v5911_v38, %v2640_v50 }
 0x2ab   : > { %v3354_v14 = vadd.f32 %v3353_v59, %v3099_v63  ;;  %v2838_v54 = vadd.f32 %v2837_v40, %v5895_v6  ;;  %v6379_v6 = vadd.f32 %v5911_v38, %v4567_v61  ;;  %v3102_v63 = vmul.f32 %v5891_v51, %v5891_v51  ;;  %3691 = vst [vmem:[%s5334_s15 + $0x7f0] sm:$0xff] %v6373_v26 }
 0x2ac   : > { %v3103_v40 = vmul.f32 %v5918_v52, %v5918_v52  ;;  %3689 = vst [vmem:[%s5334_s15 + $0x7e0] sm:$0xff] %v6376_v17  ;;  %3690 = vst [vmem:[%s5334_s15 + $0x7e8] sm:$0xff] %v6382_v0 }
 0x2ad   : > { %v2839_v13 = vadd.f32 %v2838_v54, %v5885_v49  ;;  %v3355_v2 = vadd.f32 %v3354_v14, %v3100_v3  ;;  %3692 = vst [vmem:[%s5334_s15 + $0x7f8] sm:$0xff] %v6379_v6  ;;  %v3105_v3 = vmul.f32 %v5915_v48, %v5915_v48 }
 0x2af   : > { %v2840_v59 = vadd.f32 %v2839_v13, %v5891_v51  ;;  %v3356_v49 = vadd.f32 %v3355_v2, %v3101_v39  ;;  %v3104_v51 = vmul.f32 %v5925_v10, %v5925_v10  ;;  %v3106_v39 = vmul.f32 %v5921_v47, %v5921_v47 }
 0x2b1   : > { %v3357_v24 = vadd.f32 %v3356_v49, %v3102_v63  ;;  %v2841_v38 = vadd.f32 %v2840_v59, %v5918_v52  ;;  %v3107_v52 = vmul.f32 %v5945_v56, %v5945_v56  ;;  %v3108_v49 = vmul.f32 %v5951_v4, %v5951_v4 }
 0x2b3   : > { %v3358_v14 = vadd.f32 %v3357_v24, %v3103_v40  ;;  %v2842_v54 = vadd.f32 %v2841_v38, %v5925_v10 }
 0x2b5   : > { %v2843_v22 = vadd.f32 %v2842_v54, %v5915_v48  ;;  %v3359_v61 = vadd.f32 %v3358_v14, %v3104_v51  ;;  %v3109_v48 = vmul.f32 %v5942_v46, %v5942_v46  ;;  %v6797_v51 = vld [vmem:[#allocation17_spill] sm:$0xff] }
 0x2b7   : > { %v2844_v13 = vadd.f32 %v2843_v22, %v5921_v47  ;;  %v3360_v2 = vadd.f32 %v3359_v61, %v3105_v3  ;;  %v6796_v47 = vld [vmem:[#allocation15_spill] sm:$0xff] }
 0x2b8   : > { %v3110_v38 = vmul.f32 %v6796_v47, %v6796_v47  ;;  %v6798_v61 = vld [vmem:[#allocation19_spill] sm:$0xff] }
 0x2b9   : > { %v3361_v50 = vadd.f32 %v3360_v2, %v3106_v39  ;;  %v2845_v63 = vadd.f32 %v2844_v13, %v5945_v56  ;;  %v3111_v56 = vmul.f32 %v6797_v51, %v6797_v51  ;;  %v6799_v13 = vld [vmem:[#allocation16_spill] sm:$0xff] }
 0x2ba   : > { %v3113_v2 = vmul.f32 %v6799_v13, %v6799_v13 }
 0x2bb   : > { %v3362_v59 = vadd.f32 %v3361_v50, %v3107_v52  ;;  %v2846_v10 = vadd.f32 %v2845_v63, %v5951_v4  ;;  %v6800_v63 = vld [vmem:[#allocation18_spill] sm:$0xff] }
 0x2bd   : > { %v2847_v40 = vadd.f32 %v2846_v10, %v5942_v46  ;;  %v3363_v24 = vadd.f32 %v3362_v59, %v3108_v49  ;;  %v3112_v46 = vmul.f32 %v6798_v61, %v6798_v61  ;;  %v3114_v59 = vmul.f32 %v6800_v63, %v6800_v63 }
 0x2bf   : > { %v3364_v14 = vadd.f32 %v3363_v24, %v3109_v48  ;;  %v2848_v54 = vadd.f32 %v2847_v40, %v6796_v47  ;;  %v6801_v48 = vld [vmem:[#allocation21_spill] sm:$0xff] }
 0x2c0   : > { %v3115_v40 = vmul.f32 %v6801_v48, %v6801_v48 }
 0x2c1   : > { %v2849_v3 = vadd.f32 %v2848_v54, %v6797_v51  ;;  %v3365_v4 = vadd.f32 %v3364_v14, %v3110_v38  ;;  %v6802_v14 = vld [vmem:[#allocation23_spill] sm:$0xff] }
 0x2c2   : > { %v3116_v51 = vmul.f32 %v6802_v14, %v6802_v14 }
 0x2c3   : > { %v3366_v22 = vadd.f32 %v3365_v4, %v3111_v56  ;;  %v2850_v39 = vadd.f32 %v2849_v3, %v6798_v61  ;;  %v6803_v56 = vld [vmem:[#allocation20_spill] sm:$0xff] }
 0x2c4   : > { %v3117_v3 = vmul.f32 %v6803_v56, %v6803_v56 }
 0x2c5   : > { %v2851_v52 = vadd.f32 %v2850_v39, %v6799_v13  ;;  %v3367_v50 = vadd.f32 %v3366_v22, %v3112_v46 }
 0x2c7   : > { %v3368_v10 = vadd.f32 %v3367_v50, %v3113_v2  ;;  %v2852_v49 = vadd.f32 %v2851_v52, %v6800_v63 }
 0x2c9   : > { %v2853_v24 = vadd.f32 %v2852_v49, %v6801_v48  ;;  %v3369_v47 = vadd.f32 %v3368_v10, %v3114_v59 }
 0x2cb   : > { %v3370_v38 = vadd.f32 %v3369_v47, %v3115_v40  ;;  %v2854_v54 = vadd.f32 %v2853_v24, %v6802_v14 }
 0x2cd   : > { %v2855_v4 = vadd.f32 %v2854_v54, %v6803_v56  ;;  %v3371_v22 = vadd.f32 %v3370_v38, %v3116_v51 }
 0x2ce   : > { %4878 = shalt.err (!%p4875_p11)
}
 0x2cf   : > { %s4879_s11 = scalar_lea.hbm %s6442_s26, 32768  ;;  %s4883_s15 = scalar_lea.hbm %s6721_s3, 131072 }
 0x2d0   : > { %p4880_p13 = scmp.ne.s32.totalorder %s6442_s26, %s4879_s11  ;;  %p4884_p6 = scmp.lt.u32.totalorder %s6442_s26, %s6721_s3 }
 0x2d1   : > { %p4885_p9 = scmp.lt.u32.totalorder %s4883_s15, %s4879_s11  ;;  %p4887_p12 = scmp.lt.u32.totalorder %s4879_s11, %s6442_s26 }
 0x2d2   : > { %p4881_p0 = pnand %p4880_p13, %p6804_p1 }
 0x2d3   : > { %p4886_p10 = por %p4885_p9, %p4884_p6 }
 0x2d4   : > { %p4882_p5 = pneg %p4881_p0 }
 0x2d5   : > { %p4888_p2 = por %p4887_p12, %p4886_p10 }
 0x2d7   : > { %p4889_p3 = pnand %p4888_p2, %p4882_p5 }
 0x2d9   : > { %4892 = shalt.err (!%p4889_p3)
}
 0x2da   : > { %s5003_s7 = smov 128   ;;  %s5004_s9 = smov 8   ;;  %v6805_v61 = vld [vmem:[#allocation22_spill] sm:$0xff]  ;;  %v3372_v46 = vadd.f32 %v3371_v22, %v3117_v3  ;;  %v6806_v2 = vld [vmem:[#allocation25_spill] sm:$0xff]  ;;  %v6807_v10 = vld [vmem:[#allocation27_spill] sm:$0xff] }
 0x2db   : > { %4584 = dma.vmem_to_hbm [thread:$0]  (%p6804_p1), %s6444_s17, 32768, %s6442_s26, %s3694_s6, %s5003_s7, %s5003_s7, %s5004_s9   ;;  %v3118_v39 = vmul.f32 %v6805_v61, %v6805_v61  ;;  %v2856_v13 = vadd.f32 %v2855_v4, %v6805_v61  ;;  %v3119_v52 = vmul.f32 %v6806_v2, %v6806_v2  ;;  %v3120_v48 = vmul.f32 %v6807_v10, %v6807_v10  ;;  %v6808_v40 = vld [vmem:[#allocation24_spill] sm:$0xff]  ;;  %v6809_v14 = vld [vmem:[#allocation26_spill] sm:$0xff]  ;;  %v6810_v3 = vld [vmem:[#allocation29_spill] sm:$0xff] }
 0x2dc   : > { %v3121_v24 = vmul.f32 %v6808_v40, %v6808_v40  ;;  %v3122_v54 = vmul.f32 %v6809_v14, %v6809_v14  ;;  %v3123_v4 = vmul.f32 %v6810_v3, %v6810_v3  ;;  %s3897_s17 = sshll.u32 %s5317_s13, 3  ;;  %s3698_s26 = sand.u32 1, %s5058_s22  }
 0x2dd   : > { %v2857_v50 = vadd.f32 %v2856_v13, %v6806_v2  ;;  %v3373_v63 = vadd.f32 %v3372_v46, %v3118_v39  ;;  %v6811_v46 = vld [vmem:[#allocation31_spill] sm:$0xff]  ;;  %s4167_s6 = sshll.u32 %s5058_s22, 7  ;;  %s257_s8 = scalar_lea.vmem [#allocation8], %s3897_s17 }
 0x2de   : > { %v3124_v2 = vmul.f32 %v6811_v46, %v6811_v46  ;;  %s3733_s10 = sshll.u32 %s257_s8, 4  ;;  %s6635_s30 = scalar_lea.vmem [#allocation10], %s3897_s17  ;;  %s6643_s10 = int_to_ptr.vmem [resolvable:$true] %s3733_s10 }
 0x2df   : > { %v3374_v59 = vadd.f32 %v3373_v63, %v3119_v52  ;;  %v2858_v49 = vadd.f32 %v2857_v50, %v6807_v10  ;;  %v6812_v52 = vld [vmem:[#allocation28_spill] sm:$0xff]  ;;  %v6813_v10 = vld [vmem:[#allocation30_spill] sm:$0xff]  ;;  %s3746_s11 = sshll.u32 %s6635_s30, 4  ;;  %s6641_s14 = scalar_lea.hbm %s6722_s4, %s4167_s6  ;;  %s6650_s11 = int_to_ptr.vmem [resolvable:$true] %s3746_s11 }
 0x2e0   : > { %v3125_v50 = vmul.f32 %v6812_v52, %v6812_v52  ;;  %s6648_s16 = scalar_lea.hbm %s6723_s5, %s4167_s6  ;;  %s6652_s25 = scalar_lea.sflag [#allocation9], %s3698_s26 }
 0x2e1   : > { %v2859_v47 = vadd.f32 %v2858_v49, %v6808_v40  ;;  %v3375_v38 = vadd.f32 %v3374_v59, %v3120_v48  ;;  %v3126_v49 = vmul.f32 %v6813_v10, %v6813_v10  ;;  %s4893_s7 = scalar_lea.vmem %s6643_s10, 128  ;;  %s5005_s9 = smov [#allocation8]  }
 0x2e2   : > { %p4894_p4 = scmp.ne.s32.totalorder %s6643_s10, %s4893_s7  ;;  %s4897_s17 = sshll.u32 %s5005_s9, 4  ;;  %s4898_s17 = int_to_ptr.vmem [resolvable:$false] %s4897_s17 }
 0x2e3   : > { %v3376_v51 = vadd.f32 %v3375_v38, %v3121_v24  ;;  %v2860_v56 = vadd.f32 %v2859_v47, %v6809_v14  ;;  %v3127_v24 = vmul.f32 %v6064_v15, %v6064_v15  ;;  %s4899_s13 = scalar_lea.vmem %s4898_s17, 256  ;;  %p4900_p11 = scmp.lt.s32.totalorder %s6643_s10, %s4898_s17 }
 0x2e4   : > { %p4895_p7 = pnand %p4894_p4, %p6804_p1  ;;  %p4901_p13 = scmp.lt.s32.totalorder %s4899_s13, %s4893_s7 }
 0x2e5   : > { %v2861_v22 = vadd.f32 %v2860_v56, %v6810_v3  ;;  %v3377_v61 = vadd.f32 %v3376_v51, %v3122_v54  ;;  %v3128_v51 = vmul.f32 %v6070_v28, %v6070_v28  ;;  %v6814_v56 = vld [vmem:[#allocation32_spill] sm:$0xff] }
 0x2e6   : > { %v3129_v3 = vmul.f32 %v6814_v56, %v6814_v56  ;;  %p4896_p8 = pneg %p4895_p7  ;;  %p4902_p0 = por %p4901_p13, %p4900_p11 }
 0x2e7   : > { %v3378_v39 = vadd.f32 %v3377_v61, %v3123_v4  ;;  %v2862_v13 = vadd.f32 %v2861_v22, %v6811_v46  ;;  %v6815_v61 = vld [vmem:[#allocation33_spill] sm:$0xff] }
 0x2e8   : > { %p4903_p5 = pnand %p4902_p0, %p4896_p8 }
 0x2e9   : > { %v2863_v63 = vadd.f32 %v2862_v13, %v6812_v52  ;;  %v3379_v59 = vadd.f32 %v3378_v39, %v3124_v2  ;;  %v3130_v39 = vmul.f32 %v6815_v61, %v6815_v61 }
 0x2eb   : > { %v3380_v48 = vadd.f32 %v3379_v59, %v3125_v50  ;;  %v2864_v40 = vadd.f32 %v2863_v63, %v6813_v10  ;;  %v3132_v63 = vmul.f32 %v6098_v37, %v6098_v37  ;;  %v3133_v59 = vmul.f32 %v6089_v18, %v6089_v18 }
 0x2ed   : > { %v2865_v47 = vadd.f32 %v2864_v40, %v6064_v15  ;;  %v3381_v38 = vadd.f32 %v3380_v48, %v3126_v49  ;;  %v3131_v15 = vmul.f32 %v6092_v57, %v6092_v57  ;;  %v6816_v48 = vld [vmem:[#allocation34_spill] sm:$0xff] }
 0x2ee   : > { %v3134_v40 = vmul.f32 %v6816_v48, %v6816_v48 }
 0x2ef   : > { %v3382_v14 = vadd.f32 %v3381_v38, %v3127_v24  ;;  %v2866_v54 = vadd.f32 %v2865_v47, %v6070_v28 }
 0x2f1   : > { %v2867_v4 = vadd.f32 %v2866_v54, %v6814_v56  ;;  %v3383_v22 = vadd.f32 %v3382_v14, %v3128_v51  ;;  %v3136_v51 = vmul.f32 %v6128_v45, %v6128_v45 }
 0x2f3   : > { %v3384_v46 = vadd.f32 %v3383_v22, %v3129_v3  ;;  %v2868_v13 = vadd.f32 %v2867_v4, %v6815_v61  ;;  %v3138_v4 = vmul.f32 %v6125_v1, %v6125_v1 }
 0x2f5   : > { %v2869_v2 = vadd.f32 %v2868_v13, %v6092_v57  ;;  %v3385_v52 = vadd.f32 %v3384_v46, %v3130_v39  ;;  %v3135_v57 = vmul.f32 %v6122_v35, %v6122_v35 }
 0x2f7   : > { %v3386_v50 = vadd.f32 %v3385_v52, %v3131_v15  ;;  %v2870_v28 = vadd.f32 %v2869_v2, %v6098_v37  ;;  %v3140_v15 = vmul.f32 %v6158_v43, %v6158_v43 }
 0x2f9   : > { %v2871_v10 = vadd.f32 %v2870_v28, %v6089_v18  ;;  %v3387_v49 = vadd.f32 %v3386_v50, %v3132_v63  ;;  %v3137_v18 = vmul.f32 %v6119_v7, %v6119_v7 }
 0x2fb   : > { %v3388_v24 = vadd.f32 %v3387_v49, %v3133_v59  ;;  %v2872_v47 = vadd.f32 %v2871_v10, %v6816_v48  ;;  %v3144_v49 = vmul.f32 %v6190_v23, %v6190_v23 }
 0x2fd   : > { %v2873_v38 = vadd.f32 %v2872_v47, %v6122_v35  ;;  %v3389_v14 = vadd.f32 %v3388_v24, %v3134_v40  ;;  %v3139_v35 = vmul.f32 %v6152_v11, %v6152_v11 }
 0x2ff   : > { %v3390_v54 = vadd.f32 %v3389_v14, %v3135_v57  ;;  %v2874_v37 = vadd.f32 %v2873_v38, %v6128_v45 }
 0x301   : > { %v2875_v56 = vadd.f32 %v2874_v37, %v6119_v7  ;;  %v3391_v3 = vadd.f32 %v3390_v54, %v3136_v51  ;;  %v3141_v7 = vmul.f32 %v6149_v27, %v6149_v27  ;;  %v3148_v54 = vmul.f32 %v6222_v53, %v6222_v53 }
 0x303   : > { %v3392_v22 = vadd.f32 %v3391_v3, %v3137_v18  ;;  %v2876_v61 = vadd.f32 %v2875_v56, %v6125_v1  ;;  %v3142_v1 = vmul.f32 %v6155_v30, %v6155_v30 }
 0x305   : > { %v2877_v39 = vadd.f32 %v2876_v61, %v6152_v11  ;;  %v3393_v46 = vadd.f32 %v3392_v22, %v3138_v4  ;;  %v3143_v11 = vmul.f32 %v6184_v34, %v6184_v34  ;;  %v3152_v61 = vmul.f32 %v6254_v21, %v6254_v21 }
 0x307   : > { %v3394_v13 = vadd.f32 %v3393_v46, %v3139_v35  ;;  %v2878_v45 = vadd.f32 %v2877_v39, %v6158_v43 }
 0x309   : > { %v2879_v2 = vadd.f32 %v2878_v45, %v6149_v27  ;;  %v3395_v52 = vadd.f32 %v3394_v13, %v3140_v15  ;;  %v3145_v27 = vmul.f32 %v6181_v58, %v6181_v58 }
 0x30b   : > { %v3396_v50 = vadd.f32 %v3395_v52, %v3141_v7  ;;  %v2880_v28 = vadd.f32 %v2879_v2, %v6155_v30  ;;  %v3146_v30 = vmul.f32 %v6187_v62, %v6187_v62  ;;  %v3156_v2 = vmul.f32 %v6286_v60, %v6286_v60 }
 0x30d   : > { %v2881_v63 = vadd.f32 %v2880_v28, %v6184_v34  ;;  %v3397_v59 = vadd.f32 %v3396_v50, %v3142_v1  ;;  %v3147_v34 = vmul.f32 %v6216_v20, %v6216_v20 }
 0x30f   : > { %v3398_v10 = vadd.f32 %v3397_v59, %v3143_v11  ;;  %v2882_v43 = vadd.f32 %v2881_v63, %v6190_v23 }
 0x311   : > { %v2883_v48 = vadd.f32 %v2882_v43, %v6181_v58  ;;  %v3399_v40 = vadd.f32 %v3398_v10, %v3144_v49  ;;  %v3149_v58 = vmul.f32 %v6213_v31, %v6213_v31  ;;  %v3160_v10 = vmul.f32 %v6318_v36, %v6318_v36 }
 0x313   : > { %v3400_v24 = vadd.f32 %v3399_v40, %v3145_v27  ;;  %v2884_v47 = vadd.f32 %v2883_v48, %v6187_v62  ;;  %v3150_v62 = vmul.f32 %v6219_v33, %v6219_v33 }
 0x315   : > { %v2885_v57 = vadd.f32 %v2884_v47, %v6216_v20  ;;  %v3401_v38 = vadd.f32 %v3400_v24, %v3146_v30  ;;  %v3151_v20 = vmul.f32 %v6248_v16, %v6248_v16  ;;  %v3164_v47 = vmul.f32 %v6350_v12, %v6350_v12 }
 0x317   : > { %v3402_v14 = vadd.f32 %v3401_v38, %v3147_v34  ;;  %v2886_v23 = vadd.f32 %v2885_v57, %v6222_v53 }
 0x319   : > { %v2887_v37 = vadd.f32 %v2886_v23, %v6213_v31  ;;  %v3403_v51 = vadd.f32 %v3402_v14, %v3148_v54  ;;  %v3153_v31 = vmul.f32 %v6245_v41, %v6245_v41 }
 0x31b   : > { %v3404_v18 = vadd.f32 %v3403_v51, %v3149_v58  ;;  %v2888_v56 = vadd.f32 %v2887_v37, %v6219_v33  ;;  %v3154_v33 = vmul.f32 %v6251_v5, %v6251_v5  ;;  %v3169_v37 = vmul.f32 %v6373_v26, %v6373_v26 }
 0x31d   : > { %v2889_v3 = vadd.f32 %v2888_v56, %v6248_v16  ;;  %v3405_v4 = vadd.f32 %v3404_v18, %v3150_v62  ;;  %v3155_v16 = vmul.f32 %v6280_v8, %v6280_v8  ;;  %v3170_v62 = vmul.f32 %v6379_v6, %v6379_v6 }
 0x31f   : > { %v3406_v22 = vadd.f32 %v3405_v4, %v3151_v20  ;;  %v2890_v53 = vadd.f32 %v2889_v3, %v6254_v21  ;;  %v2652_v3 = vlaneseq }
 0x321   : > { %v2891_v35 = vadd.f32 %v2890_v53, %v6245_v41  ;;  %v3407_v39 = vadd.f32 %v3406_v22, %v3152_v61  ;;  %v3157_v41 = vmul.f32 %v6277_v32, %v6277_v32  ;;  %v2653_v61 = vshrl.u32 %v2652_v3, 7 }
 0x323   : > { %v3408_v46 = vadd.f32 %v3407_v39, %v3153_v31  ;;  %v2892_v13 = vadd.f32 %v2891_v35, %v6251_v5  ;;  %v3158_v5 = vmul.f32 %v6283_v44, %v6283_v44  ;;  %vm3432_vm2 = vcmp.eq.s32.totalorder %v2653_v61, 0 }
 0x325   : > { %v2893_v45 = vadd.f32 %v2892_v13, %v6280_v8  ;;  %v3409_v15 = vadd.f32 %v3408_v46, %v3154_v33  ;;  %v3159_v8 = vmul.f32 %v6312_v42, %v6312_v42 }
 0x327   : > { %v3410_v7 = vadd.f32 %v3409_v15, %v3155_v16  ;;  %v2894_v21 = vadd.f32 %v2893_v45, %v6286_v60 }
 0x329   : > { %v2895_v52 = vadd.f32 %v2894_v21, %v6277_v32  ;;  %v3411_v1 = vadd.f32 %v3410_v7, %v3156_v2  ;;  %v3161_v32 = vmul.f32 %v6309_v25, %v6309_v25 }
 0x32b   : > { %v3412_v50 = vadd.f32 %v3411_v1, %v3157_v41  ;;  %v2896_v28 = vadd.f32 %v2895_v52, %v6283_v44  ;;  %v3162_v44 = vmul.f32 %v6315_v19, %v6315_v19 }
 0x32d   : > { %v2897_v11 = vadd.f32 %v2896_v28, %v6312_v42  ;;  %v3413_v63 = vadd.f32 %v3412_v50, %v3158_v5  ;;  %v3163_v42 = vmul.f32 %v6344_v29, %v6344_v29 }
 0x32f   : > { %v3414_v59 = vadd.f32 %v3413_v63, %v3159_v8  ;;  %v2898_v60 = vadd.f32 %v2897_v11, %v6318_v36 }
 0x331   : > { %v2899_v43 = vadd.f32 %v2898_v60, %v6309_v25  ;;  %v3415_v49 = vadd.f32 %v3414_v59, %v3160_v10  ;;  %v3165_v25 = vmul.f32 %v6341_v55, %v6341_v55 }
 0x333   : > { %v3416_v27 = vadd.f32 %v3415_v49, %v3161_v32  ;;  %v2900_v48 = vadd.f32 %v2899_v43, %v6315_v19  ;;  %v3166_v19 = vmul.f32 %v6347_v9, %v6347_v9 }
 0x335   : > { %v2901_v40 = vadd.f32 %v2900_v48, %v6344_v29  ;;  %v3417_v30 = vadd.f32 %v3416_v27, %v3162_v44  ;;  %v3167_v29 = vmul.f32 %v6376_v17, %v6376_v17 }
 0x337   : > { %v3418_v24 = vadd.f32 %v3417_v30, %v3163_v42  ;;  %v2902_v36 = vadd.f32 %v2901_v40, %v6350_v12 }
 0x339   : > { %v2903_v34 = vadd.f32 %v2902_v36, %v6341_v55  ;;  %v3419_v57 = vadd.f32 %v3418_v24, %v3164_v47  ;;  %v3168_v55 = vmul.f32 %v6382_v0, %v6382_v0 }
 0x33b   : > { %v3420_v38 = vadd.f32 %v3419_v57, %v3165_v25  ;;  %v2904_v14 = vadd.f32 %v2903_v34, %v6347_v9 }
 0x33d   : > { %v2905_v23 = vadd.f32 %v2904_v14, %v6376_v17  ;;  %v3421_v54 = vadd.f32 %v3420_v38, %v3166_v19 }
 0x33f   : > { %v3422_v12 = vadd.f32 %v3421_v54, %v3167_v29  ;;  %v2906_v58 = vadd.f32 %v2905_v23, %v6382_v0 }
 0x341   : > { %v2907_v51 = vadd.f32 %v2906_v58, %v6373_v26  ;;  %v3423_v9 = vadd.f32 %v3422_v12, %v3168_v55 }
 0x343   : > { %v2908_v17 = vadd.f32 %v2907_v51, %v6379_v6  ;;  %v3424_v18 = vadd.f32 %v3423_v9, %v3169_v37 }
 0x345   : > { %v2909_v56 = vrot.slane %v2908_v17, 4  ;;  %v3425_v20 = vadd.f32 %v3424_v18, %v3170_v62 }
 0x347   : > { %v2910_v4 = vadd.f32 %v2909_v56, %v2908_v17  ;;  %v3426_v22 = vrot.slane %v3425_v20, 4 }
 0x349   : > { %v2911_v0 = vrot.slane %v2910_v4, 2  ;;  %v3427_v53 = vadd.f32 %v3426_v22, %v3425_v20 }
 0x34b   : > { %v3428_v31 = vrot.slane %v3427_v53, 2  ;;  %v2912_v26 = vadd.f32 %v2911_v0, %v2910_v4 }
 0x34d   : > { %v2913_v35 = vrot.slane %v2912_v26, 1  ;;  %v3429_v39 = vadd.f32 %v3428_v31, %v3427_v53 }
 0x34f   : > { %v2914_v6 = vadd.f32 %v2913_v35, %v2912_v26  ;;  %v3430_v33 = vrot.slane %v3429_v39, 1 }
 0x351   : > { %v3431_v46 = vadd.f32 %v3430_v33, %v3429_v39  ;;  %v3433_v13 = vsel %vm3432_vm2, %v2914_v6, 0.0 }
 0x352   : > { %3434 = vst [vmem:[%s257_s8] sm:$0xff] %v3433_v13 }
 0x353   : > { %v3435_v16 = vsel %vm3432_vm2, %v3431_v46, 0.0 }
 0x354   : > { %4906 = shalt.err (!%p4903_p5)
}
 0x355   : > { %s4907_s26 = scalar_lea.hbm %s6641_s14, 128  ;;  %s4911_s12 = scalar_lea.hbm %s6722_s4, 512 }
 0x356   : > { %p4908_p6 = scmp.ne.s32.totalorder %s6641_s14, %s4907_s26  ;;  %p4912_p12 = scmp.lt.u32.totalorder %s6641_s14, %s6722_s4 }
 0x357   : > { %p4913_p2 = scmp.lt.u32.totalorder %s4911_s12, %s4907_s26  ;;  %p4915_p4 = scmp.lt.u32.totalorder %s4907_s26, %s6641_s14 }
 0x358   : > { %p4909_p9 = pnand %p4908_p6, %p6804_p1 }
 0x359   : > { %p4914_p3 = por %p4913_p2, %p4912_p12 }
 0x35a   : > { %p4910_p10 = pneg %p4909_p9 }
 0x35b   : > { %p4916_p7 = por %p4915_p4, %p4914_p3 }
 0x35d   : > { %p4917_p8 = pnand %p4916_p7, %p4910_p10 }
 0x35f   : > { %4920 = shalt.err (!%p4917_p8)
}
 0x360   : > { %4585 = dma.vmem_to_hbm [thread:$0]  (%p6804_p1), %s6643_s10, 128, %s6641_s14, %s6652_s25   ;;  %3436 = vst [vmem:[%s6635_s30] sm:$0xff] %v3435_v16 }
 0x361   : > { %s4921_s7 = scalar_lea.vmem %s6650_s11, 128  ;;  %s5006_s9 = smov [#allocation10]  }
 0x362   : > { %p4922_p11 = scmp.ne.s32.totalorder %s6650_s11, %s4921_s7  ;;  %s4925_s17 = sshll.u32 %s5006_s9, 4  ;;  %s4926_s17 = int_to_ptr.vmem [resolvable:$false] %s4925_s17 }
 0x363   : > { %s4927_s13 = scalar_lea.vmem %s4926_s17, 256  ;;  %p4928_p5 = scmp.lt.s32.totalorder %s6650_s11, %s4926_s17 }
 0x364   : > { %p4923_p13 = pnand %p4922_p11, %p6804_p1  ;;  %p4929_p6 = scmp.lt.s32.totalorder %s4927_s13, %s4921_s7 }
 0x366   : > { %p4924_p0 = pneg %p4923_p13  ;;  %p4930_p9 = por %p4929_p6, %p4928_p5 }
 0x368   : > { %p4931_p10 = pnand %p4930_p9, %p4924_p0 }
 0x36a   : > { %4934 = shalt.err (!%p4931_p10)
}
 0x36b   : > { %s4935_s10 = scalar_lea.hbm %s6648_s16, 128  ;;  %s4939_s26 = scalar_lea.hbm %s6723_s5, 512 }
 0x36c   : > { %p4936_p12 = scmp.ne.s32.totalorder %s6648_s16, %s4935_s10  ;;  %p4940_p4 = scmp.lt.u32.totalorder %s6648_s16, %s6723_s5 }
 0x36d   : > { %p4941_p7 = scmp.lt.u32.totalorder %s4939_s26, %s4935_s10  ;;  %p4943_p11 = scmp.lt.u32.totalorder %s4935_s10, %s6648_s16 }
 0x36e   : > { %p4937_p2 = pnand %p4936_p12, %p6804_p1 }
 0x36f   : > { %p4942_p8 = por %p4941_p7, %p4940_p4 }
 0x370   : > { %p4938_p3 = pneg %p4937_p2 }
 0x371   : > { %p4944_p13 = por %p4943_p11, %p4942_p8 }
 0x373   : > { %p4945_p0 = pnand %p4944_p13, %p4938_p3 }
 0x375   : > { %4948 = shalt.err (!%p4945_p0)
}
 0x376   : > { %4586 = dma.vmem_to_hbm [thread:$0]  (%p6804_p1), %s6650_s11, 128, %s6648_s16, %s6652_s25  }
 0x377 PF: > { %p4611_p5 = scmp.ge.s32.totalorder %s4995_s21, 2  ;;  %s3758_s12 = sand.u32 1, %s4983_s18  }
 0x378   : > { %p6817_p6 = scmp.ne.s32.totalorder %s6768_s29, 0  ;;  %s3759_s22 = scalar_lea.sflag [#allocation4], %s3758_s12 }
 0x37a   : > { %p4598_p9 = pnand %p4611_p5, %p6817_p6 }
 0x37c   : > { %4974 = dma.done.wait (!%p4598_p9), %s3759_s22, 32768  }
 0x37d   : > { %4976 = vsyncadd (!%p4598_p9), %s3759_s22, 4294934528  ;;  %s3767_s15 = sand.u32 1, %s3888_s23  }
 0x37e   : > { %s3768_s7 = scalar_lea.sflag [#allocation9], %s3767_s15 }
 0x37f   : > { %4978 = dma.done.wait (!%p4598_p9), %s3768_s7, 256  }
 0x380   : > { %4980 = vsyncadd (!%p4598_p9), %s3768_s7, 4294967040  ;;  %p21_p1 = scmp.ge.s32.totalorder %s5062_s24, 6   ;;  %s6818_s18 = smov %s4987_s19 }
 0x381   : > { %s6819_s19 = smov %s4991_s20  ;;  %s6820_s20 = smov %s5075_s27 }
 0x382   : > { %s6821_s21 = smov %s5062_s24  ;;  %23 = sbr.rel (!%p21_p1) target bundleno = 7 (0x7), region = 108 }
 0x389   :  { %3782 = vsyncpa [#allocation3], 1 }
 0x38a   :  { %3784 = vsyncpa [#allocation3 + $0x1], 1 }
 0x38b   :  { %3785 = vsyncpa [#allocation6], 1 }
 0x38c   :  { %3786 = vsyncpa [#allocation4], 1 }
 0x38d   :  { %3788 = vsyncpa [#allocation4 + $0x1], 1 }
 0x38e   :  { %3789 = vsyncpa [#allocation9], 1 }
 0x38f   :  { %3791 = vsyncpa [#allocation9 + $0x1], 1 }

</bundles_post_ra>
